<compile_context>
chip_gen: v5e
topology: v5e:2x2
jax: 0.10.0
libtpu: 0.0.40
codegen_flags: <defaults>
</compile_context>

<pallas_src>
import jax
import jax.numpy as jnp
from jax import lax
from jax.experimental import pallas as pl
from jax.experimental.pallas import tpu as pltpu

# ---------------------------------------------------------------------------
# CONSTANTS.py equivalents (chosen small & deterministic for this synthetic run)
# ---------------------------------------------------------------------------
BYTE_VOCAB_DIM = 260            # 256 bytes + special tokens
BYTE_EMBED_DIM = 8
PACKET_REP_DIM = 32             # bidirectional packet LSTM -> 16 hidden per direction
PACKET_ENC_LAYERS = 1
CONVERSATIONAL_HIDDEN_DIM = 32
CONVERSATIONAL_LAYERS = 2
NEXT_PACKET_LAYERS = 2
BYTE_CONTEXT_LEN = 4
OUTPUT_VOCAB_DIM = 256
NULL = 0
SOS = 257
INT = 260                       # next-packet byte-embedding vocab (bytes + specials)

assert PACKET_ENC_LAYERS == 1
assert CONVERSATIONAL_LAYERS == 2
assert NEXT_PACKET_LAYERS == 2


# ---------------------------------------------------------------------------
# In-kernel helpers
# ---------------------------------------------------------------------------
def _mm(x, w_ref):
    """MXU matmul of an f32 value against a weight ref; bf16 operands,
    f32 accumulation."""
    return jnp.dot(x.astype(jnp.bfloat16), w_ref[...].astype(jnp.bfloat16),
                   preferred_element_type=jnp.float32)


def _input_proj(x, w_ref, b_ref):
    """Hoisted input projection: one [T*R, D] x [D, 4H] MXU matmul (+ bias)."""
    T, R, D = x.shape
    return (_mm(x.reshape(T * R, D), w_ref) + b_ref[...]).reshape(T, R, -1)


def _lstm_gates(gx, h, c, whh):
    """One LSTM cell update.  gx already contains x @ W_ih + bias.
    Gate column order is (i, f, o, g)."""
    H = h.shape[-1]
    gates = gx + jnp.dot(h.astype(whh.dtype), whh,
                         preferred_element_type=jnp.float32)
    sig = jax.nn.sigmoid(gates[:, :3 * H])     # i | f | o in one EUP issue
    g_g = jnp.tanh(gates[:, 3 * H:])
    c_new = sig[:, H:2 * H] * c + sig[:, :H] * g_g
    h_new = sig[:, 2 * H:3 * H] * jnp.tanh(c_new)
    return h_new, c_new


def _cell_from_zero(gx, H):
    """One LSTM cell update from (h0, c0) = 0: h@W_hh and f*c are elided."""
    sig = jax.nn.sigmoid(gx[:, :3 * H])
    g_g = jnp.tanh(gx[:, 3 * H:])
    c_new = sig[:, :H] * g_g
    return sig[:, 2 * H:3 * H] * jnp.tanh(c_new)


def _run_layer(gx_scr, whh_ref, h_seq_scr=None):
    """Serial recurrence over T steps; gx_scr holds precomputed x@W_ih + b.
    W_hh is loaded (and cast) once, outside the fori_loop."""
    T, R, H4 = gx_scr.shape
    H = H4 // 4
    whh = whh_ref[...].astype(jnp.bfloat16)      # hoisted: 1 load, not T loads
    zeros = jnp.zeros((R, H), jnp.float32)

    def body(t, carry):
        h, c = carry
        h, c = _lstm_gates(gx_scr[t], h, c, whh)
        if h_seq_scr is not None:
            h_seq_scr[t] = h
        return (h, c)

    # unroll=True is fine while T <= ~16; switch to partial unroll if S/CTX/L grow.
    return lax.fori_loop(0, T, body, (zeros, zeros), unroll=True)


# ---------------------------------------------------------------------------
# Fused forward kernel (single pallas_call)
# ---------------------------------------------------------------------------
def fused_forward_kernel(
        # data
        x_pkt_ref, meta_pkt_ref, dec_meta_ref, dec_win_ref,
        # packet encoder weights
        wih_f_ref, whh_f_ref, b_f_ref,
        wih_b_ref, whh_b_ref, b_b_ref,
        wm_ref, bm_ref,
        wc_f_ref, wc_b_ref, wc_m_ref, bc_ref,
        # conversation LSTM weights
        wih_c1_ref, whh_c1_ref, b_c1_ref,
        wih_c2_ref, whh_c2_ref, b_c2_ref,
        # decoder weights
        wd1_ctx_ref, wd1_meta_ref, wd1_win_ref, whh_d1_ref, b_d1_ref,
        wih_d2_ref, whh_d2_ref, b_d2_ref,
        wo_ref, bo_ref,
        # output
        out_ref,
        # scratch
        gx_pkt, gx_c1, h_c1, gx_c2, gx_d1, h_d1, gx_d2, h_d2):
    S = x_pkt_ref.shape[0]
    Hp = whh_f_ref.shape[0]
    CTX, Bp, Hc4 = gx_c1.shape
    Hc = Hc4 // 4
    L = gx_d1.shape[0]
    V = wo_ref.shape[1]

    # ---------------- Stage 1: packet encoder (rows = CTX*Bp, CTX-major) ----
    # Forward byte LSTM: hoisted input projection + serial recurrence.
    gx_pkt[...] = _input_proj(x_pkt_ref[...], wih_f_ref, b_f_ref)
    h_fwd, _ = _run_layer(gx_pkt, whh_f_ref)                     # [Rc, Hp]

    # Backward direction: output[:, -1] needs exactly one step on x[S-1].
    gx_b = _mm(x_pkt_ref[S - 1], wih_b_ref) + b_b_ref[...]
    h_bwd = _cell_from_zero(gx_b, Hp)                            # [Rc, Hp]

    # Metadata MLP (+ReLU) and packet combiner (+ReLU); the combiner weight is
    # split by source so no lane-axis concatenation is needed.
    meta_r = jnp.maximum(_mm(meta_pkt_ref[...], wm_ref) + bm_ref[...], 0.0)
    reps = jnp.maximum(
        _mm(h_fwd, wc_f_ref) + _mm(h_bwd, wc_b_ref)
        + _mm(meta_r, wc_m_ref) + bc_ref[...], 0.0)              # [Rc, PACKET_REP_DIM]

    # ---------------- Stage 2: conversation LSTM (2 layers, last step only) --
    # CTX-major rows => regrouping is a pure sublane reshape.
    gx_c1[...] = (_mm(reps, wih_c1_ref) + b_c1_ref[...]).reshape(CTX, Bp, Hc4)
    _run_layer(gx_c1, whh_c1_ref, h_c1)
    gx_c2[...] = _input_proj(h_c1[...], wih_c2_ref, b_c2_ref)
    final_ctx, _ = _run_layer(gx_c2, whh_c2_ref)                 # [Bp, Hc]

    # ---------------- Stage 3: decoder LSTM (2 layers) + output projection ---
    # First-layer input projection split by source (ctx / meta / window);
    # the ctx+meta part is constant across L and computed once.
    base = (_mm(final_ctx, wd1_ctx_ref)
            + _mm(dec_meta_ref[...], wd1_meta_ref) + b_d1_ref[...])      # [Bp, 4Hc]
    win = dec_win_ref[...]
    win_proj = _mm(win.reshape(L * Bp, win.shape[-1]),
                   wd1_win_ref).reshape(L, Bp, Hc4)
    gx_d1[...] = win_proj + jnp.broadcast_to(base[None], (L, Bp, Hc4))
    _run_layer(gx_d1, whh_d1_ref, h_d1)

    gx_d2[...] = _input_proj(h_d1[...], wih_d2_ref, b_d2_ref)
    _run_layer(gx_d2, whh_d2_ref, h_d2)

    logits = _mm(h_d2[...].reshape(L * Bp, Hc), wo_ref) + bo_ref[...]
    out_ref[...] = logits.reshape(L, Bp, V)                      # lane-dense (256)


# ---------------------------------------------------------------------------
# Pallas wrapper
# ---------------------------------------------------------------------------
def _round8(n):
    return ((n + 7) // 8) * 8


def _pad_rows(x, rp, axis):
    pad = rp - x.shape[axis]
    if pad == 0:
        return x
    widths = [(0, 0)] * x.ndim
    widths[axis] = (0, pad)
    return jnp.pad(x, widths)


def _full_spec(x):
    nd = x.ndim
    return pl.BlockSpec(x.shape, lambda i, _nd=nd: (0,) * _nd)


def run_fused(params, x_pkt, meta_pkt, dec_meta, dec_win):
    """x_pkt [S, CTX*Bp, E], meta_pkt [CTX*Bp, Md], dec_meta [Bp, Md],
    dec_win [L, Bp, C*E]  ->  logits [L, Bp, OUTPUT_VOCAB_DIM]."""
    S, Rc, _ = x_pkt.shape
    L, Bp, _ = dec_win.shape
    CTX = Rc // Bp

    enc, pred = params["enc"], params["pred"]
    wih_f, whh_f, b_f = enc["pkt_fwd"]
    wih_b, whh_b, b_b = enc["pkt_bwd"]
    wm, bm = enc["metadata_mlp"]
    wc_f, wc_b, wc_m, bc = enc["combiner"]
    (wih_c1, whh_c1, b_c1), (wih_c2, whh_c2, b_c2) = params["conv"]
    wd1_ctx, wd1_meta, wd1_win, whh_d1, b_d1 = pred["dec1"]
    wih_d2, whh_d2, b_d2 = pred["dec2"]
    wo, bo = pred["out_proj"]

    Hp = whh_f.shape[0]
    Hc = whh_c1.shape[0]
    V = wo.shape[1]

    inputs = (x_pkt, meta_pkt, dec_meta, dec_win,
              wih_f, whh_f, b_f, wih_b, whh_b, b_b,
              wm, bm, wc_f, wc_b, wc_m, bc,
              wih_c1, whh_c1, b_c1, wih_c2, whh_c2, b_c2,
              wd1_ctx, wd1_meta, wd1_win, whh_d1, b_d1,
              wih_d2, whh_d2, b_d2, wo, bo)

    return pl.pallas_call(
        fused_forward_kernel,
        out_shape=jax.ShapeDtypeStruct((L, Bp, V), jnp.float32),
        grid=(1,),
        in_specs=[_full_spec(a) for a in inputs],
        out_specs=pl.BlockSpec((L, Bp, V), lambda i: (0, 0, 0)),
        scratch_shapes=[
            pltpu.VMEM((S, Rc, 4 * Hp), jnp.float32),    # gx_pkt
            pltpu.VMEM((CTX, Bp, 4 * Hc), jnp.float32),  # gx_c1
            pltpu.VMEM((CTX, Bp, Hc), jnp.float32),      # h_c1
            pltpu.VMEM((CTX, Bp, 4 * Hc), jnp.float32),  # gx_c2
            pltpu.VMEM((L, Bp, 4 * Hc), jnp.float32),    # gx_d1
            pltpu.VMEM((L, Bp, Hc), jnp.float32),        # h_d1
            pltpu.VMEM((L, Bp, 4 * Hc), jnp.float32),    # gx_d2
            pltpu.VMEM((L, Bp, Hc), jnp.float32),        # h_d2
        ],
        compiler_params=pltpu.CompilerParams(dimension_semantics=("arbitrary",)),
    )(*inputs)


# ---------------------------------------------------------------------------
# Parameter initialization (deterministic, synthetic)
# ---------------------------------------------------------------------------
def _init_lstm(key, in_dim, hidden):
    """Weights pre-transposed to [in_dim, 4H]; gate column order (i, f, o, g).
    (For real PyTorch weights, permute the (i, f, g, o) columns accordingly.)"""
    k1, k2, k3, k4 = jax.random.split(key, 4)
    w_ih_t = jax.random.normal(k1, (in_dim, 4 * hidden), jnp.float32) * 0.05
    w_hh_t = jax.random.normal(k2, (hidden, 4 * hidden), jnp.float32) * 0.05
    # b_ih + b_hh folded into one bias.
    b = (jax.random.normal(k3, (1, 4 * hidden), jnp.float32) * 0.01
         + jax.random.normal(k4, (1, 4 * hidden), jnp.float32) * 0.01)
    return (w_ih_t, w_hh_t, b)


def _init_linear(key, in_dim, out_dim):
    k1, k2 = jax.random.split(key)
    w_t = jax.random.normal(k1, (in_dim, out_dim), jnp.float32) * 0.05
    b = jax.random.normal(k2, (1, out_dim), jnp.float32) * 0.01
    return (w_t, b)


def _init_embedding(key, vocab, dim):
    return jax.random.normal(key, (vocab, dim), jnp.float32) * 0.1


def init_params(key, categorical_dims, numerical_dim):
    keys = jax.random.split(key, 10)
    # NB: reference PyTorch uses max(50, cat_size // 2).
    cat_embed_dims = [max(50, c // 2) for c in categorical_dims]
    cat_embed_dim = sum(cat_embed_dims)
    meta_dim = cat_embed_dim + numerical_dim
    h_pkt = PACKET_REP_DIM // 2
    Hc = CONVERSATIONAL_HIDDEN_DIM

    # --- PacketEncoder ---
    enc = {}
    enc["byte_emb"] = _init_embedding(keys[0], BYTE_VOCAB_DIM, BYTE_EMBED_DIM)
    enc["cat_emb"] = [_init_embedding(jax.random.fold_in(keys[1], i), c, d)
                      for i, (c, d) in enumerate(zip(categorical_dims, cat_embed_dims))]
    enc["pkt_fwd"] = _init_lstm(jax.random.fold_in(keys[2], 0), BYTE_EMBED_DIM, h_pkt)
    enc["pkt_bwd"] = _init_lstm(jax.random.fold_in(keys[2], 1), BYTE_EMBED_DIM, h_pkt)
    enc["metadata_mlp"] = _init_linear(keys[3], meta_dim, PACKET_REP_DIM // 4)
    wc, bc = _init_linear(keys[4], PACKET_REP_DIM + PACKET_REP_DIM // 4, PACKET_REP_DIM)
    # Split combiner weight by input source: [h_fwd | h_bwd | meta].
    enc["combiner"] = (wc[:h_pkt], wc[h_pkt:2 * h_pkt], wc[2 * h_pkt:], bc)

    # --- ConversationLSTM (2 layers) ---
    conv = []
    in_dim = PACKET_REP_DIM
    for layer in range(CONVERSATIONAL_LAYERS):
        conv.append(_init_lstm(jax.random.fold_in(keys[5], layer), in_dim, Hc))
        in_dim = Hc

    # --- NextPacketPredictor ---
    pred = {}
    pred["cat_emb"] = [_init_embedding(jax.random.fold_in(keys[6], i), c, d)
                       for i, (c, d) in enumerate(zip(categorical_dims, cat_embed_dims))]
    pred["byte_emb"] = _init_embedding(keys[7], INT, BYTE_EMBED_DIM)
    dec_in = Hc + meta_dim + BYTE_CONTEXT_LEN * BYTE_EMBED_DIM
    wd1, whh_d1, b_d1 = _init_lstm(jax.random.fold_in(keys[8], 0), dec_in, Hc)
    # Split layer-1 W_ih by input source: [conversation ctx | meta | byte window].
    pred["dec1"] = (wd1[:Hc], wd1[Hc:Hc + meta_dim], wd1[Hc + meta_dim:], whh_d1, b_d1)
    pred["dec2"] = _init_lstm(jax.random.fold_in(keys[8], 1), Hc, Hc)
    pred["out_proj"] = _init_linear(keys[9], Hc, OUTPUT_VOCAB_DIM)

    return {"enc": enc, "conv": conv, "pred": pred}


# ---------------------------------------------------------------------------
# Model forward (embedding gathers in JAX, everything else in ONE Pallas call)
# ---------------------------------------------------------------------------
def _embed_cats(tables, cat_ids):
    return jnp.concatenate([tables[i][cat_ids[:, i]] for i in range(len(tables))], axis=-1)


def hierarchical_forward(params, payloads, cat_feats, num_feats,
                         next_cat, next_numerical, target_payload):
    """
    payloads       [B, CTX, S] int32
    cat_feats      [B, CTX, n_cat] int32
    num_feats      [B, CTX, num_dim] f32
    next_cat       [B, n_cat] int32
    next_numerical [B, num_dim] f32
    target_payload [B, L] int32 (teacher forcing / training path)
    returns logits [B, L, OUTPUT_VOCAB_DIM]
    """
    B, CTX, S = payloads.shape
    L = target_payload.shape[1]
    Bp = _round8(B)
    enc, pred = params["enc"], params["pred"]

    # Pad the batch dimension once (pad rows are discarded at the end).
    payloads_p = _pad_rows(payloads, Bp, 0)
    cat_p = _pad_rows(cat_feats, Bp, 0)
    num_p = _pad_rows(num_feats, Bp, 0)
    next_cat_p = _pad_rows(next_cat, Bp, 0)
    next_num_p = _pad_rows(next_numerical, Bp, 0)
    target_p = _pad_rows(target_payload, Bp, 0)

    # ---- packet-encoder inputs: fold CTX into rows, CTX-major ----
    pay_cm = jnp.transpose(payloads_p, (1, 0, 2)).reshape(CTX * Bp, S)
    x_pkt = jnp.transpose(enc["byte_emb"][pay_cm], (1, 0, 2))        # [S, CTX*Bp, E]
    cat_cm = jnp.transpose(cat_p, (1, 0, 2)).reshape(CTX * Bp, -1)
    num_cm = jnp.transpose(num_p, (1, 0, 2)).reshape(CTX * Bp, -1)
    meta_pkt = jnp.concatenate([_embed_cats(enc["cat_emb"], cat_cm), num_cm], axis=-1)

    # ---- decoder inputs: constant (cat+num) meta and byte-context windows ----
    dec_meta = jnp.concatenate([_embed_cats(pred["cat_emb"], next_cat_p), next_num_p],
                               axis=-1)                              # [Bp, meta_dim]
    C = BYTE_CONTEXT_LEN
    padded = jnp.concatenate(
        [jnp.full((Bp, C - 1), NULL, jnp.int32),
         jnp.full((Bp, 1), SOS, jnp.int32),
         target_p.astype(jnp.int32)], axis=-1)                       # [Bp, L + C]
    idx = jnp.arange(L)[:, None] + jnp.arange(C)[None, :]            # [L, C]
    win_tok = padded[:, idx]                                         # [Bp, L, C] single gather
    win_emb = pred["byte_emb"][win_tok].reshape(Bp, L, C * BYTE_EMBED_DIM)
    dec_win = jnp.transpose(win_emb, (1, 0, 2))                      # [L, Bp, C*E]

    # ---- ONE fused Pallas call: encoder -> conversation LSTM -> decoder ----
    logits = run_fused(params, x_pkt, meta_pkt, dec_meta, dec_win)   # [L, Bp, V]
    return jnp.transpose(logits, (1, 0, 2))[:B]                      # [B, L, V]


# ---------------------------------------------------------------------------
# Demo
# ---------------------------------------------------------------------------
if __name__ == "__main__":
    B, CTX, S, L = 2, 3, 8, 6
    CAT_DIMS = [10, 6]
    NUM_DIM = 4

    root = jax.random.PRNGKey(0)
    params = init_params(jax.random.fold_in(root, 0), CAT_DIMS, NUM_DIM)

    k = [jax.random.fold_in(root, i) for i in range(1, 9)]
    payloads = jax.random.randint(k[0], (B, CTX, S), 0, 256, dtype=jnp.int32)
    cat_feats = jnp.stack(
        [jax.random.randint(jax.random.fold_in(k[1], i), (B, CTX), 0, CAT_DIMS[i], dtype=jnp.int32)
         for i in range(len(CAT_DIMS))], axis=-1)
    num_feats = jax.random.normal(k[2], (B, CTX, NUM_DIM), jnp.float32)
    next_cat = jnp.stack(
        [jax.random.randint(jax.random.fold_in(k[3], i), (B,), 0, CAT_DIMS[i], dtype=jnp.int32)
         for i in range(len(CAT_DIMS))], axis=-1)
    next_numerical = jax.random.normal(k[4], (B, NUM_DIM), jnp.float32)
    target_payload = jax.random.randint(k[5], (B, L), 1, 256, dtype=jnp.int32)

    forward = jax.jit(hierarchical_forward)
    logits = forward(params, payloads, cat_feats, num_feats,
                     next_cat, next_numerical, target_payload)
    jax.block_until_ready(logits)

    assert logits.shape == (B, L, OUTPUT_VOCAB_DIM), logits.shape
    assert logits.dtype == jnp.float32
    assert bool(jnp.all(jnp.isfinite(logits)))
    print("KERNEL_OK")
</pallas_src>

<mosaic_0001>
module attributes {stable_mosaic.version = 11 : i64} {
  func.func @fused_forward_kernel(%arg0: i32, %arg1: memref<8x24x8xf32, #tpu.memory_space<vmem>>, %arg2: memref<24x104xf32, #tpu.memory_space<vmem>>, %arg3: memref<8x104xf32, #tpu.memory_space<vmem>>, %arg4: memref<6x8x32xf32, #tpu.memory_space<vmem>>, %arg5: memref<8x64xf32, #tpu.memory_space<vmem>>, %arg6: memref<16x64xf32, #tpu.memory_space<vmem>>, %arg7: memref<1x64xf32, #tpu.memory_space<vmem>>, %arg8: memref<8x64xf32, #tpu.memory_space<vmem>>, %arg9: memref<16x64xf32, #tpu.memory_space<vmem>>, %arg10: memref<1x64xf32, #tpu.memory_space<vmem>>, %arg11: memref<104x8xf32, #tpu.memory_space<vmem>>, %arg12: memref<1x8xf32, #tpu.memory_space<vmem>>, %arg13: memref<16x32xf32, #tpu.memory_space<vmem>>, %arg14: memref<16x32xf32, #tpu.memory_space<vmem>>, %arg15: memref<8x32xf32, #tpu.memory_space<vmem>>, %arg16: memref<1x32xf32, #tpu.memory_space<vmem>>, %arg17: memref<32x128xf32, #tpu.memory_space<vmem>>, %arg18: memref<32x128xf32, #tpu.memory_space<vmem>>, %arg19: memref<1x128xf32, #tpu.memory_space<vmem>>, %arg20: memref<32x128xf32, #tpu.memory_space<vmem>>, %arg21: memref<32x128xf32, #tpu.memory_space<vmem>>, %arg22: memref<1x128xf32, #tpu.memory_space<vmem>>, %arg23: memref<32x128xf32, #tpu.memory_space<vmem>>, %arg24: memref<104x128xf32, #tpu.memory_space<vmem>>, %arg25: memref<32x128xf32, #tpu.memory_space<vmem>>, %arg26: memref<32x128xf32, #tpu.memory_space<vmem>>, %arg27: memref<1x128xf32, #tpu.memory_space<vmem>>, %arg28: memref<32x128xf32, #tpu.memory_space<vmem>>, %arg29: memref<32x128xf32, #tpu.memory_space<vmem>>, %arg30: memref<1x128xf32, #tpu.memory_space<vmem>>, %arg31: memref<32x256xf32, #tpu.memory_space<vmem>>, %arg32: memref<1x256xf32, #tpu.memory_space<vmem>>, %arg33: memref<6x8x256xf32, #tpu.memory_space<vmem>>, %arg34: memref<8x24x64xf32, #tpu.memory_space<vmem>>, %arg35: memref<3x8x128xf32, #tpu.memory_space<vmem>>, %arg36: memref<3x8x32xf32, #tpu.memory_space<vmem>>, %arg37: memref<3x8x128xf32, #tpu.memory_space<vmem>>, %arg38: memref<6x8x128xf32, #tpu.memory_space<vmem>>, %arg39: memref<6x8x32xf32, #tpu.memory_space<vmem>>, %arg40: memref<6x8x128xf32, #tpu.memory_space<vmem>>, %arg41: memref<6x8x32xf32, #tpu.memory_space<vmem>>) attributes {dimension_semantics = [#tpu.dimension_semantics<arbitrary>], iteration_bounds = array<i64: 1>, scalar_prefetch = 0 : i64, scratch_operands = 8 : i64, tpu.core_type = #tpu.core_type<tc>, window_params = [{pipeline_mode = #tpu.pipeline_mode<synchronous>, transform_indices = @transform_0, window_bounds = array<i64: 8, 24, 8>}, {pipeline_mode = #tpu.pipeline_mode<synchronous>, transform_indices = @transform_1, window_bounds = array<i64: 24, 104>}, {pipeline_mode = #tpu.pipeline_mode<synchronous>, transform_indices = @transform_2, window_bounds = array<i64: 8, 104>}, {pipeline_mode = #tpu.pipeline_mode<synchronous>, transform_indices = @transform_3, window_bounds = array<i64: 6, 8, 32>}, {pipeline_mode = #tpu.pipeline_mode<synchronous>, transform_indices = @transform_4, window_bounds = array<i64: 8, 64>}, {pipeline_mode = #tpu.pipeline_mode<synchronous>, transform_indices = @transform_5, window_bounds = array<i64: 16, 64>}, {pipeline_mode = #tpu.pipeline_mode<synchronous>, transform_indices = @transform_6, window_bounds = array<i64: 1, 64>}, {pipeline_mode = #tpu.pipeline_mode<synchronous>, transform_indices = @transform_7, window_bounds = array<i64: 8, 64>}, {pipeline_mode = #tpu.pipeline_mode<synchronous>, transform_indices = @transform_8, window_bounds = array<i64: 16, 64>}, {pipeline_mode = #tpu.pipeline_mode<synchronous>, transform_indices = @transform_9, window_bounds = array<i64: 1, 64>}, {pipeline_mode = #tpu.pipeline_mode<synchronous>, transform_indices = @transform_10, window_bounds = array<i64: 104, 8>}, {pipeline_mode = #tpu.pipeline_mode<synchronous>, transform_indices = @transform_11, window_bounds = array<i64: 1, 8>}, {pipeline_mode = #tpu.pipeline_mode<synchronous>, transform_indices = @transform_12, window_bounds = array<i64: 16, 32>}, {pipeline_mode = #tpu.pipeline_mode<synchronous>, transform_indices = @transform_13, window_bounds = array<i64: 16, 32>}, {pipeline_mode = #tpu.pipeline_mode<synchronous>, transform_indices = @transform_14, window_bounds = array<i64: 8, 32>}, {pipeline_mode = #tpu.pipeline_mode<synchronous>, transform_indices = @transform_15, window_bounds = array<i64: 1, 32>}, {pipeline_mode = #tpu.pipeline_mode<synchronous>, transform_indices = @transform_16, window_bounds = array<i64: 32, 128>}, {pipeline_mode = #tpu.pipeline_mode<synchronous>, transform_indices = @transform_17, window_bounds = array<i64: 32, 128>}, {pipeline_mode = #tpu.pipeline_mode<synchronous>, transform_indices = @transform_18, window_bounds = array<i64: 1, 128>}, {pipeline_mode = #tpu.pipeline_mode<synchronous>, transform_indices = @transform_19, window_bounds = array<i64: 32, 128>}, {pipeline_mode = #tpu.pipeline_mode<synchronous>, transform_indices = @transform_20, window_bounds = array<i64: 32, 128>}, {pipeline_mode = #tpu.pipeline_mode<synchronous>, transform_indices = @transform_21, window_bounds = array<i64: 1, 128>}, {pipeline_mode = #tpu.pipeline_mode<synchronous>, transform_indices = @transform_22, window_bounds = array<i64: 32, 128>}, {pipeline_mode = #tpu.pipeline_mode<synchronous>, transform_indices = @transform_23, window_bounds = array<i64: 104, 128>}, {pipeline_mode = #tpu.pipeline_mode<synchronous>, transform_indices = @transform_24, window_bounds = array<i64: 32, 128>}, {pipeline_mode = #tpu.pipeline_mode<synchronous>, transform_indices = @transform_25, window_bounds = array<i64: 32, 128>}, {pipeline_mode = #tpu.pipeline_mode<synchronous>, transform_indices = @transform_26, window_bounds = array<i64: 1, 128>}, {pipeline_mode = #tpu.pipeline_mode<synchronous>, transform_indices = @transform_27, window_bounds = array<i64: 32, 128>}, {pipeline_mode = #tpu.pipeline_mode<synchronous>, transform_indices = @transform_28, window_bounds = array<i64: 32, 128>}, {pipeline_mode = #tpu.pipeline_mode<synchronous>, transform_indices = @transform_29, window_bounds = array<i64: 1, 128>}, {pipeline_mode = #tpu.pipeline_mode<synchronous>, transform_indices = @transform_30, window_bounds = array<i64: 32, 256>}, {pipeline_mode = #tpu.pipeline_mode<synchronous>, transform_indices = @transform_31, window_bounds = array<i64: 1, 256>}, {pipeline_mode = #tpu.pipeline_mode<synchronous>, transform_indices = @transform_32, window_bounds = array<i64: 6, 8, 256>}]} {
    %c0 = arith.constant 0 : index
    %c0_0 = arith.constant 0 : index
    %c0_1 = arith.constant 0 : index
    %0 = vector.load %arg1[%c0, %c0_0, %c0_1] : memref<8x24x8xf32, #tpu.memory_space<vmem>>, vector<8x24x8xf32>
    %1 = vector.shape_cast %0 : vector<8x24x8xf32> to vector<192x8xf32>
    %2 = arith.truncf %1 : vector<192x8xf32> to vector<192x8xbf16>
    %c0_2 = arith.constant 0 : index
    %c0_3 = arith.constant 0 : index
    %3 = vector.load %arg5[%c0_2, %c0_3] : memref<8x64xf32, #tpu.memory_space<vmem>>, vector<8x64xf32>
    %4 = arith.truncf %3 : vector<8x64xf32> to vector<8x64xbf16>
    %cst = arith.constant dense<0.000000e+00> : vector<192x64xf32>
    %5 = tpu.matmul %2, %4, %cst {dimension_numbers = #tpu.dot_dimension_numbers<[1], [0], [0], [1], [0, 0, 1, 1], [], []>} : vector<192x8xbf16>, vector<8x64xbf16>, vector<192x64xf32> -> vector<192x64xf32>
    %c0_4 = arith.constant 0 : index
    %c0_5 = arith.constant 0 : index
    %6 = vector.load %arg7[%c0_4, %c0_5] : memref<1x64xf32, #tpu.memory_space<vmem>>, vector<1x64xf32>
    %7 = vector.broadcast %6 : vector<1x64xf32> to vector<192x64xf32>
    %8 = arith.addf %5, %7 : vector<192x64xf32>
    %9 = vector.shape_cast %8 : vector<192x64xf32> to vector<8x24x64xf32>
    %c0_6 = arith.constant 0 : index
    %c0_7 = arith.constant 0 : index
    %c0_8 = arith.constant 0 : index
    %10 = vector.load %arg34[%c0_6, %c0_7, %c0_8] : memref<8x24x64xf32, #tpu.memory_space<vmem>>, vector<8x24x64xf32>
    tpu.vector_store %arg34[%c0_6, %c0_7, %c0_8], %9 {strides = array<i32>} : memref<8x24x64xf32, #tpu.memory_space<vmem>>, vector<8x24x64xf32>,
    %c0_9 = arith.constant 0 : index
    %c0_10 = arith.constant 0 : index
    %11 = vector.load %arg6[%c0_9, %c0_10] : memref<16x64xf32, #tpu.memory_space<vmem>>, vector<16x64xf32>
    %12 = arith.truncf %11 : vector<16x64xf32> to vector<16x64xbf16>
    %cst_11 = arith.constant 0.000000e+00 : f32
    %13 = vector.broadcast %cst_11 : f32 to vector<24x16xf32>
    %c0_i32 = arith.constant 0 : i32
    %14 = arith.index_cast %c0_i32 : i32 to index
    %c0_12 = arith.constant 0 : index
    %c0_13 = arith.constant 0 : index
    %15 = vector.load %arg34[%14, %c0_12, %c0_13] : memref<8x24x64xf32, #tpu.memory_space<vmem>>, vector<1x24x64xf32>
    %16 = vector.shape_cast %15 : vector<1x24x64xf32> to vector<24x64xf32>
    %17 = arith.truncf %13 : vector<24x16xf32> to vector<24x16xbf16>
    %cst_14 = arith.constant dense<0.000000e+00> : vector<24x64xf32>
    %18 = tpu.matmul %17, %12, %cst_14 {dimension_numbers = #tpu.dot_dimension_numbers<[1], [0], [0], [1], [0, 0, 1, 1], [], []>} : vector<24x16xbf16>, vector<16x64xbf16>, vector<24x64xf32> -> vector<24x64xf32>
    %19 = arith.addf %16, %18 : vector<24x64xf32>
    %20 = vector.extract_strided_slice %19 {offsets = [0, 0], sizes = [24, 48], strides = [1, 1]} : vector<24x64xf32> to vector<24x48xf32>
    %21 = arith.negf %20 : vector<24x48xf32>
    %22 = math.exp %21 : vector<24x48xf32>
    %cst_15 = arith.constant 1.000000e+00 : f32
    %23 = vector.broadcast %cst_15 : f32 to vector<24x48xf32>
    %24 = arith.addf %23, %22 : vector<24x48xf32>
    %25 = arith.divf %23, %24 : vector<24x48xf32>
    %26 = vector.extract_strided_slice %19 {offsets = [0, 48], sizes = [24, 16], strides = [1, 1]} : vector<24x64xf32> to vector<24x16xf32>
    %27 = math.tanh %26 : vector<24x16xf32>
    %28 = vector.extract_strided_slice %25 {offsets = [0, 16], sizes = [24, 16], strides = [1, 1]} : vector<24x48xf32> to vector<24x16xf32>
    %29 = arith.mulf %28, %13 : vector<24x16xf32>
    %30 = vector.extract_strided_slice %25 {offsets = [0, 0], sizes = [24, 16], strides = [1, 1]} : vector<24x48xf32> to vector<24x16xf32>
    %31 = arith.mulf %30, %27 : vector<24x16xf32>
    %32 = arith.addf %29, %31 : vector<24x16xf32>
    %33 = vector.extract_strided_slice %25 {offsets = [0, 32], sizes = [24, 16], strides = [1, 1]} : vector<24x48xf32> to vector<24x16xf32>
    %34 = math.tanh %32 : vector<24x16xf32>
    %35 = arith.mulf %33, %34 : vector<24x16xf32>
    %c1_i32 = arith.constant 1 : i32
    %36 = arith.index_cast %c1_i32 : i32 to index
    %c0_16 = arith.constant 0 : index
    %c0_17 = arith.constant 0 : index
    %37 = vector.load %arg34[%36, %c0_16, %c0_17] : memref<8x24x64xf32, #tpu.memory_space<vmem>>, vector<1x24x64xf32>
    %38 = vector.shape_cast %37 : vector<1x24x64xf32> to vector<24x64xf32>
    %39 = arith.truncf %35 : vector<24x16xf32> to vector<24x16xbf16>
    %cst_18 = arith.constant dense<0.000000e+00> : vector<24x64xf32>
    %40 = tpu.matmul %39, %12, %cst_18 {dimension_numbers = #tpu.dot_dimension_numbers<[1], [0], [0], [1], [0, 0, 1, 1], [], []>} : vector<24x16xbf16>, vector<16x64xbf16>, vector<24x64xf32> -> vector<24x64xf32>
    %41 = arith.addf %38, %40 : vector<24x64xf32>
    %42 = vector.extract_strided_slice %41 {offsets = [0, 0], sizes = [24, 48], strides = [1, 1]} : vector<24x64xf32> to vector<24x48xf32>
    %43 = arith.negf %42 : vector<24x48xf32>
    %44 = math.exp %43 : vector<24x48xf32>
    %cst_19 = arith.constant 1.000000e+00 : f32
    %45 = vector.broadcast %cst_19 : f32 to vector<24x48xf32>
    %46 = arith.addf %45, %44 : vector<24x48xf32>
    %47 = arith.divf %45, %46 : vector<24x48xf32>
    %48 = vector.extract_strided_slice %41 {offsets = [0, 48], sizes = [24, 16], strides = [1, 1]} : vector<24x64xf32> to vector<24x16xf32>
    %49 = math.tanh %48 : vector<24x16xf32>
    %50 = vector.extract_strided_slice %47 {offsets = [0, 16], sizes = [24, 16], strides = [1, 1]} : vector<24x48xf32> to vector<24x16xf32>
    %51 = arith.mulf %50, %32 : vector<24x16xf32>
    %52 = vector.extract_strided_slice %47 {offsets = [0, 0], sizes = [24, 16], strides = [1, 1]} : vector<24x48xf32> to vector<24x16xf32>
    %53 = arith.mulf %52, %49 : vector<24x16xf32>
    %54 = arith.addf %51, %53 : vector<24x16xf32>
    %55 = vector.extract_strided_slice %47 {offsets = [0, 32], sizes = [24, 16], strides = [1, 1]} : vector<24x48xf32> to vector<24x16xf32>
    %56 = math.tanh %54 : vector<24x16xf32>
    %57 = arith.mulf %55, %56 : vector<24x16xf32>
    %c2_i32 = arith.constant 2 : i32
    %58 = arith.index_cast %c2_i32 : i32 to index
    %c0_20 = arith.constant 0 : index
    %c0_21 = arith.constant 0 : index
    %59 = vector.load %arg34[%58, %c0_20, %c0_21] : memref<8x24x64xf32, #tpu.memory_space<vmem>>, vector<1x24x64xf32>
    %60 = vector.shape_cast %59 : vector<1x24x64xf32> to vector<24x64xf32>
    %61 = arith.truncf %57 : vector<24x16xf32> to vector<24x16xbf16>
    %cst_22 = arith.constant dense<0.000000e+00> : vector<24x64xf32>
    %62 = tpu.matmul %61, %12, %cst_22 {dimension_numbers = #tpu.dot_dimension_numbers<[1], [0], [0], [1], [0, 0, 1, 1], [], []>} : vector<24x16xbf16>, vector<16x64xbf16>, vector<24x64xf32> -> vector<24x64xf32>
    %63 = arith.addf %60, %62 : vector<24x64xf32>
    %64 = vector.extract_strided_slice %63 {offsets = [0, 0], sizes = [24, 48], strides = [1, 1]} : vector<24x64xf32> to vector<24x48xf32>
    %65 = arith.negf %64 : vector<24x48xf32>
    %66 = math.exp %65 : vector<24x48xf32>
    %cst_23 = arith.constant 1.000000e+00 : f32
    %67 = vector.broadcast %cst_23 : f32 to vector<24x48xf32>
    %68 = arith.addf %67, %66 : vector<24x48xf32>
    %69 = arith.divf %67, %68 : vector<24x48xf32>
    %70 = vector.extract_strided_slice %63 {offsets = [0, 48], sizes = [24, 16], strides = [1, 1]} : vector<24x64xf32> to vector<24x16xf32>
    %71 = math.tanh %70 : vector<24x16xf32>
    %72 = vector.extract_strided_slice %69 {offsets = [0, 16], sizes = [24, 16], strides = [1, 1]} : vector<24x48xf32> to vector<24x16xf32>
    %73 = arith.mulf %72, %54 : vector<24x16xf32>
    %74 = vector.extract_strided_slice %69 {offsets = [0, 0], sizes = [24, 16], strides = [1, 1]} : vector<24x48xf32> to vector<24x16xf32>
    %75 = arith.mulf %74, %71 : vector<24x16xf32>
    %76 = arith.addf %73, %75 : vector<24x16xf32>
    %77 = vector.extract_strided_slice %69 {offsets = [0, 32], sizes = [24, 16], strides = [1, 1]} : vector<24x48xf32> to vector<24x16xf32>
    %78 = math.tanh %76 : vector<24x16xf32>
    %79 = arith.mulf %77, %78 : vector<24x16xf32>
    %c3_i32 = arith.constant 3 : i32
    %80 = arith.index_cast %c3_i32 : i32 to index
    %c0_24 = arith.constant 0 : index
    %c0_25 = arith.constant 0 : index
    %81 = vector.load %arg34[%80, %c0_24, %c0_25] : memref<8x24x64xf32, #tpu.memory_space<vmem>>, vector<1x24x64xf32>
    %82 = vector.shape_cast %81 : vector<1x24x64xf32> to vector<24x64xf32>
    %83 = arith.truncf %79 : vector<24x16xf32> to vector<24x16xbf16>
    %cst_26 = arith.constant dense<0.000000e+00> : vector<24x64xf32>
    %84 = tpu.matmul %83, %12, %cst_26 {dimension_numbers = #tpu.dot_dimension_numbers<[1], [0], [0], [1], [0, 0, 1, 1], [], []>} : vector<24x16xbf16>, vector<16x64xbf16>, vector<24x64xf32> -> vector<24x64xf32>
    %85 = arith.addf %82, %84 : vector<24x64xf32>
    %86 = vector.extract_strided_slice %85 {offsets = [0, 0], sizes = [24, 48], strides = [1, 1]} : vector<24x64xf32> to vector<24x48xf32>
    %87 = arith.negf %86 : vector<24x48xf32>
    %88 = math.exp %87 : vector<24x48xf32>
    %cst_27 = arith.constant 1.000000e+00 : f32
    %89 = vector.broadcast %cst_27 : f32 to vector<24x48xf32>
    %90 = arith.addf %89, %88 : vector<24x48xf32>
    %91 = arith.divf %89, %90 : vector<24x48xf32>
    %92 = vector.extract_strided_slice %85 {offsets = [0, 48], sizes = [24, 16], strides = [1, 1]} : vector<24x64xf32> to vector<24x16xf32>
    %93 = math.tanh %92 : vector<24x16xf32>
    %94 = vector.extract_strided_slice %91 {offsets = [0, 16], sizes = [24, 16], strides = [1, 1]} : vector<24x48xf32> to vector<24x16xf32>
    %95 = arith.mulf %94, %76 : vector<24x16xf32>
    %96 = vector.extract_strided_slice %91 {offsets = [0, 0], sizes = [24, 16], strides = [1, 1]} : vector<24x48xf32> to vector<24x16xf32>
    %97 = arith.mulf %96, %93 : vector<24x16xf32>
    %98 = arith.addf %95, %97 : vector<24x16xf32>
    %99 = vector.extract_strided_slice %91 {offsets = [0, 32], sizes = [24, 16], strides = [1, 1]} : vector<24x48xf32> to vector<24x16xf32>
    %100 = math.tanh %98 : vector<24x16xf32>
    %101 = arith.mulf %99, %100 : vector<24x16xf32>
    %c4_i32 = arith.constant 4 : i32
    %102 = arith.index_cast %c4_i32 : i32 to index
    %c0_28 = arith.constant 0 : index
    %c0_29 = arith.constant 0 : index
    %103 = vector.load %arg34[%102, %c0_28, %c0_29] : memref<8x24x64xf32, #tpu.memory_space<vmem>>, vector<1x24x64xf32>
    %104 = vector.shape_cast %103 : vector<1x24x64xf32> to vector<24x64xf32>
    %105 = arith.truncf %101 : vector<24x16xf32> to vector<24x16xbf16>
    %cst_30 = arith.constant dense<0.000000e+00> : vector<24x64xf32>
    %106 = tpu.matmul %105, %12, %cst_30 {dimension_numbers = #tpu.dot_dimension_numbers<[1], [0], [0], [1], [0, 0, 1, 1], [], []>} : vector<24x16xbf16>, vector<16x64xbf16>, vector<24x64xf32> -> vector<24x64xf32>
    %107 = arith.addf %104, %106 : vector<24x64xf32>
    %108 = vector.extract_strided_slice %107 {offsets = [0, 0], sizes = [24, 48], strides = [1, 1]} : vector<24x64xf32> to vector<24x48xf32>
    %109 = arith.negf %108 : vector<24x48xf32>
    %110 = math.exp %109 : vector<24x48xf32>
    %cst_31 = arith.constant 1.000000e+00 : f32
    %111 = vector.broadcast %cst_31 : f32 to vector<24x48xf32>
    %112 = arith.addf %111, %110 : vector<24x48xf32>
    %113 = arith.divf %111, %112 : vector<24x48xf32>
    %114 = vector.extract_strided_slice %107 {offsets = [0, 48], sizes = [24, 16], strides = [1, 1]} : vector<24x64xf32> to vector<24x16xf32>
    %115 = math.tanh %114 : vector<24x16xf32>
    %116 = vector.extract_strided_slice %113 {offsets = [0, 16], sizes = [24, 16], strides = [1, 1]} : vector<24x48xf32> to vector<24x16xf32>
    %117 = arith.mulf %116, %98 : vector<24x16xf32>
    %118 = vector.extract_strided_slice %113 {offsets = [0, 0], sizes = [24, 16], strides = [1, 1]} : vector<24x48xf32> to vector<24x16xf32>
    %119 = arith.mulf %118, %115 : vector<24x16xf32>
    %120 = arith.addf %117, %119 : vector<24x16xf32>
    %121 = vector.extract_strided_slice %113 {offsets = [0, 32], sizes = [24, 16], strides = [1, 1]} : vector<24x48xf32> to vector<24x16xf32>
    %122 = math.tanh %120 : vector<24x16xf32>
    %123 = arith.mulf %121, %122 : vector<24x16xf32>
    %c5_i32 = arith.constant 5 : i32
    %124 = arith.index_cast %c5_i32 : i32 to index
    %c0_32 = arith.constant 0 : index
    %c0_33 = arith.constant 0 : index
    %125 = vector.load %arg34[%124, %c0_32, %c0_33] : memref<8x24x64xf32, #tpu.memory_space<vmem>>, vector<1x24x64xf32>
    %126 = vector.shape_cast %125 : vector<1x24x64xf32> to vector<24x64xf32>
    %127 = arith.truncf %123 : vector<24x16xf32> to vector<24x16xbf16>
    %cst_34 = arith.constant dense<0.000000e+00> : vector<24x64xf32>
    %128 = tpu.matmul %127, %12, %cst_34 {dimension_numbers = #tpu.dot_dimension_numbers<[1], [0], [0], [1], [0, 0, 1, 1], [], []>} : vector<24x16xbf16>, vector<16x64xbf16>, vector<24x64xf32> -> vector<24x64xf32>
    %129 = arith.addf %126, %128 : vector<24x64xf32>
    %130 = vector.extract_strided_slice %129 {offsets = [0, 0], sizes = [24, 48], strides = [1, 1]} : vector<24x64xf32> to vector<24x48xf32>
    %131 = arith.negf %130 : vector<24x48xf32>
    %132 = math.exp %131 : vector<24x48xf32>
    %cst_35 = arith.constant 1.000000e+00 : f32
    %133 = vector.broadcast %cst_35 : f32 to vector<24x48xf32>
    %134 = arith.addf %133, %132 : vector<24x48xf32>
    %135 = arith.divf %133, %134 : vector<24x48xf32>
    %136 = vector.extract_strided_slice %129 {offsets = [0, 48], sizes = [24, 16], strides = [1, 1]} : vector<24x64xf32> to vector<24x16xf32>
    %137 = math.tanh %136 : vector<24x16xf32>
    %138 = vector.extract_strided_slice %135 {offsets = [0, 16], sizes = [24, 16], strides = [1, 1]} : vector<24x48xf32> to vector<24x16xf32>
    %139 = arith.mulf %138, %120 : vector<24x16xf32>
    %140 = vector.extract_strided_slice %135 {offsets = [0, 0], sizes = [24, 16], strides = [1, 1]} : vector<24x48xf32> to vector<24x16xf32>
    %141 = arith.mulf %140, %137 : vector<24x16xf32>
    %142 = arith.addf %139, %141 : vector<24x16xf32>
    %143 = vector.extract_strided_slice %135 {offsets = [0, 32], sizes = [24, 16], strides = [1, 1]} : vector<24x48xf32> to vector<24x16xf32>
    %144 = math.tanh %142 : vector<24x16xf32>
    %145 = arith.mulf %143, %144 : vector<24x16xf32>
    %c6_i32 = arith.constant 6 : i32
    %146 = arith.index_cast %c6_i32 : i32 to index
    %c0_36 = arith.constant 0 : index
    %c0_37 = arith.constant 0 : index
    %147 = vector.load %arg34[%146, %c0_36, %c0_37] : memref<8x24x64xf32, #tpu.memory_space<vmem>>, vector<1x24x64xf32>
    %148 = vector.shape_cast %147 : vector<1x24x64xf32> to vector<24x64xf32>
    %149 = arith.truncf %145 : vector<24x16xf32> to vector<24x16xbf16>
    %cst_38 = arith.constant dense<0.000000e+00> : vector<24x64xf32>
    %150 = tpu.matmul %149, %12, %cst_38 {dimension_numbers = #tpu.dot_dimension_numbers<[1], [0], [0], [1], [0, 0, 1, 1], [], []>} : vector<24x16xbf16>, vector<16x64xbf16>, vector<24x64xf32> -> vector<24x64xf32>
    %151 = arith.addf %148, %150 : vector<24x64xf32>
    %152 = vector.extract_strided_slice %151 {offsets = [0, 0], sizes = [24, 48], strides = [1, 1]} : vector<24x64xf32> to vector<24x48xf32>
    %153 = arith.negf %152 : vector<24x48xf32>
    %154 = math.exp %153 : vector<24x48xf32>
    %cst_39 = arith.constant 1.000000e+00 : f32
    %155 = vector.broadcast %cst_39 : f32 to vector<24x48xf32>
    %156 = arith.addf %155, %154 : vector<24x48xf32>
    %157 = arith.divf %155, %156 : vector<24x48xf32>
    %158 = vector.extract_strided_slice %151 {offsets = [0, 48], sizes = [24, 16], strides = [1, 1]} : vector<24x64xf32> to vector<24x16xf32>
    %159 = math.tanh %158 : vector<24x16xf32>
    %160 = vector.extract_strided_slice %157 {offsets = [0, 16], sizes = [24, 16], strides = [1, 1]} : vector<24x48xf32> to vector<24x16xf32>
    %161 = arith.mulf %160, %142 : vector<24x16xf32>
    %162 = vector.extract_strided_slice %157 {offsets = [0, 0], sizes = [24, 16], strides = [1, 1]} : vector<24x48xf32> to vector<24x16xf32>
    %163 = arith.mulf %162, %159 : vector<24x16xf32>
    %164 = arith.addf %161, %163 : vector<24x16xf32>
    %165 = vector.extract_strided_slice %157 {offsets = [0, 32], sizes = [24, 16], strides = [1, 1]} : vector<24x48xf32> to vector<24x16xf32>
    %166 = math.tanh %164 : vector<24x16xf32>
    %167 = arith.mulf %165, %166 : vector<24x16xf32>
    %c7_i32 = arith.constant 7 : i32
    %168 = arith.index_cast %c7_i32 : i32 to index
    %c0_40 = arith.constant 0 : index
    %c0_41 = arith.constant 0 : index
    %169 = vector.load %arg34[%168, %c0_40, %c0_41] : memref<8x24x64xf32, #tpu.memory_space<vmem>>, vector<1x24x64xf32>
    %170 = vector.shape_cast %169 : vector<1x24x64xf32> to vector<24x64xf32>
    %171 = arith.truncf %167 : vector<24x16xf32> to vector<24x16xbf16>
    %cst_42 = arith.constant dense<0.000000e+00> : vector<24x64xf32>
    %172 = tpu.matmul %171, %12, %cst_42 {dimension_numbers = #tpu.dot_dimension_numbers<[1], [0], [0], [1], [0, 0, 1, 1], [], []>} : vector<24x16xbf16>, vector<16x64xbf16>, vector<24x64xf32> -> vector<24x64xf32>
    %173 = arith.addf %170, %172 : vector<24x64xf32>
    %174 = vector.extract_strided_slice %173 {offsets = [0, 0], sizes = [24, 48], strides = [1, 1]} : vector<24x64xf32> to vector<24x48xf32>
    %175 = arith.negf %174 : vector<24x48xf32>
    %176 = math.exp %175 : vector<24x48xf32>
    %cst_43 = arith.constant 1.000000e+00 : f32
    %177 = vector.broadcast %cst_43 : f32 to vector<24x48xf32>
    %178 = arith.addf %177, %176 : vector<24x48xf32>
    %179 = arith.divf %177, %178 : vector<24x48xf32>
    %180 = vector.extract_strided_slice %173 {offsets = [0, 48], sizes = [24, 16], strides = [1, 1]} : vector<24x64xf32> to vector<24x16xf32>
    %181 = math.tanh %180 : vector<24x16xf32>
    %182 = vector.extract_strided_slice %179 {offsets = [0, 16], sizes = [24, 16], strides = [1, 1]} : vector<24x48xf32> to vector<24x16xf32>
    %183 = arith.mulf %182, %164 : vector<24x16xf32>
    %184 = vector.extract_strided_slice %179 {offsets = [0, 0], sizes = [24, 16], strides = [1, 1]} : vector<24x48xf32> to vector<24x16xf32>
    %185 = arith.mulf %184, %181 : vector<24x16xf32>
    %186 = arith.addf %183, %185 : vector<24x16xf32>
    %187 = vector.extract_strided_slice %179 {offsets = [0, 32], sizes = [24, 16], strides = [1, 1]} : vector<24x48xf32> to vector<24x16xf32>
    %188 = math.tanh %186 : vector<24x16xf32>
    %189 = arith.mulf %187, %188 : vector<24x16xf32>
    %c8_i32 = arith.constant 8 : i32
    %c7 = arith.constant 7 : index
    %c0_44 = arith.constant 0 : index
    %c0_45 = arith.constant 0 : index
    %190 = vector.load %arg1[%c7, %c0_44, %c0_45] : memref<8x24x8xf32, #tpu.memory_space<vmem>>, vector<1x24x8xf32>
    %191 = vector.shape_cast %190 : vector<1x24x8xf32> to vector<24x8xf32>
    %192 = arith.truncf %191 : vector<24x8xf32> to vector<24x8xbf16>
    %c0_46 = arith.constant 0 : index
    %c0_47 = arith.constant 0 : index
    %193 = vector.load %arg8[%c0_46, %c0_47] : memref<8x64xf32, #tpu.memory_space<vmem>>, vector<8x64xf32>
    %194 = arith.truncf %193 : vector<8x64xf32> to vector<8x64xbf16>
    %cst_48 = arith.constant dense<0.000000e+00> : vector<24x64xf32>
    %195 = tpu.matmul %192, %194, %cst_48 {dimension_numbers = #tpu.dot_dimension_numbers<[1], [0], [0], [1], [0, 0, 1, 1], [], []>} : vector<24x8xbf16>, vector<8x64xbf16>, vector<24x64xf32> -> vector<24x64xf32>
    %c0_49 = arith.constant 0 : index
    %c0_50 = arith.constant 0 : index
    %196 = vector.load %arg10[%c0_49, %c0_50] : memref<1x64xf32, #tpu.memory_space<vmem>>, vector<1x64xf32>
    %197 = vector.broadcast %196 : vector<1x64xf32> to vector<24x64xf32>
    %198 = arith.addf %195, %197 : vector<24x64xf32>
    %199 = vector.extract_strided_slice %198 {offsets = [0, 0], sizes = [24, 48], strides = [1, 1]} : vector<24x64xf32> to vector<24x48xf32>
    %200 = arith.negf %199 : vector<24x48xf32>
    %201 = math.exp %200 : vector<24x48xf32>
    %cst_51 = arith.constant 1.000000e+00 : f32
    %202 = vector.broadcast %cst_51 : f32 to vector<24x48xf32>
    %203 = arith.addf %202, %201 : vector<24x48xf32>
    %204 = arith.divf %202, %203 : vector<24x48xf32>
    %205 = vector.extract_strided_slice %198 {offsets = [0, 48], sizes = [24, 16], strides = [1, 1]} : vector<24x64xf32> to vector<24x16xf32>
    %206 = math.tanh %205 : vector<24x16xf32>
    %207 = vector.extract_strided_slice %204 {offsets = [0, 0], sizes = [24, 16], strides = [1, 1]} : vector<24x48xf32> to vector<24x16xf32>
    %208 = arith.mulf %207, %206 : vector<24x16xf32>
    %209 = vector.extract_strided_slice %204 {offsets = [0, 32], sizes = [24, 16], strides = [1, 1]} : vector<24x48xf32> to vector<24x16xf32>
    %210 = math.tanh %208 : vector<24x16xf32>
    %211 = arith.mulf %209, %210 : vector<24x16xf32>
    %c0_52 = arith.constant 0 : index
    %c0_53 = arith.constant 0 : index
    %212 = vector.load %arg2[%c0_52, %c0_53] : memref<24x104xf32, #tpu.memory_space<vmem>>, vector<24x104xf32>
    %213 = arith.truncf %212 : vector<24x104xf32> to vector<24x104xbf16>
    %c0_54 = arith.constant 0 : index
    %c0_55 = arith.constant 0 : index
    %214 = vector.load %arg11[%c0_54, %c0_55] : memref<104x8xf32, #tpu.memory_space<vmem>>, vector<104x8xf32>
    %215 = arith.truncf %214 : vector<104x8xf32> to vector<104x8xbf16>
    %cst_56 = arith.constant dense<0.000000e+00> : vector<24x8xf32>
    %216 = tpu.matmul %213, %215, %cst_56 {dimension_numbers = #tpu.dot_dimension_numbers<[1], [0], [0], [1], [0, 0, 1, 1], [], []>} : vector<24x104xbf16>, vector<104x8xbf16>, vector<24x8xf32> -> vector<24x8xf32>
    %c0_57 = arith.constant 0 : index
    %c0_58 = arith.constant 0 : index
    %217 = vector.load %arg12[%c0_57, %c0_58] : memref<1x8xf32, #tpu.memory_space<vmem>>, vector<1x8xf32>
    %218 = vector.broadcast %217 : vector<1x8xf32> to vector<24x8xf32>
    %219 = arith.addf %216, %218 : vector<24x8xf32>
    %cst_59 = arith.constant 0.000000e+00 : f32
    %220 = vector.broadcast %cst_59 : f32 to vector<24x8xf32>
    %221 = arith.maximumf %219, %220 : vector<24x8xf32>
    %222 = arith.truncf %189 : vector<24x16xf32> to vector<24x16xbf16>
    %c0_60 = arith.constant 0 : index
    %c0_61 = arith.constant 0 : index
    %223 = vector.load %arg13[%c0_60, %c0_61] : memref<16x32xf32, #tpu.memory_space<vmem>>, vector<16x32xf32>
    %224 = arith.truncf %223 : vector<16x32xf32> to vector<16x32xbf16>
    %cst_62 = arith.constant dense<0.000000e+00> : vector<24x32xf32>
    %225 = tpu.matmul %222, %224, %cst_62 {dimension_numbers = #tpu.dot_dimension_numbers<[1], [0], [0], [1], [0, 0, 1, 1], [], []>} : vector<24x16xbf16>, vector<16x32xbf16>, vector<24x32xf32> -> vector<24x32xf32>
    %226 = arith.truncf %211 : vector<24x16xf32> to vector<24x16xbf16>
    %c0_63 = arith.constant 0 : index
    %c0_64 = arith.constant 0 : index
    %227 = vector.load %arg14[%c0_63, %c0_64] : memref<16x32xf32, #tpu.memory_space<vmem>>, vector<16x32xf32>
    %228 = arith.truncf %227 : vector<16x32xf32> to vector<16x32xbf16>
    %cst_65 = arith.constant dense<0.000000e+00> : vector<24x32xf32>
    %229 = tpu.matmul %226, %228, %cst_65 {dimension_numbers = #tpu.dot_dimension_numbers<[1], [0], [0], [1], [0, 0, 1, 1], [], []>} : vector<24x16xbf16>, vector<16x32xbf16>, vector<24x32xf32> -> vector<24x32xf32>
    %230 = arith.addf %225, %229 : vector<24x32xf32>
    %231 = arith.truncf %221 : vector<24x8xf32> to vector<24x8xbf16>
    %c0_66 = arith.constant 0 : index
    %c0_67 = arith.constant 0 : index
    %232 = vector.load %arg15[%c0_66, %c0_67] : memref<8x32xf32, #tpu.memory_space<vmem>>, vector<8x32xf32>
    %233 = arith.truncf %232 : vector<8x32xf32> to vector<8x32xbf16>
    %cst_68 = arith.constant dense<0.000000e+00> : vector<24x32xf32>
    %234 = tpu.matmul %231, %233, %cst_68 {dimension_numbers = #tpu.dot_dimension_numbers<[1], [0], [0], [1], [0, 0, 1, 1], [], []>} : vector<24x8xbf16>, vector<8x32xbf16>, vector<24x32xf32> -> vector<24x32xf32>
    %235 = arith.addf %230, %234 : vector<24x32xf32>
    %c0_69 = arith.constant 0 : index
    %c0_70 = arith.constant 0 : index
    %236 = vector.load %arg16[%c0_69, %c0_70] : memref<1x32xf32, #tpu.memory_space<vmem>>, vector<1x32xf32>
    %237 = vector.broadcast %236 : vector<1x32xf32> to vector<24x32xf32>
    %238 = arith.addf %235, %237 : vector<24x32xf32>
    %cst_71 = arith.constant 0.000000e+00 : f32
    %239 = vector.broadcast %cst_71 : f32 to vector<24x32xf32>
    %240 = arith.maximumf %238, %239 : vector<24x32xf32>
    %241 = arith.truncf %240 : vector<24x32xf32> to vector<24x32xbf16>
    %c0_72 = arith.constant 0 : index
    %c0_73 = arith.constant 0 : index
    %242 = vector.load %arg17[%c0_72, %c0_73] : memref<32x128xf32, #tpu.memory_space<vmem>>, vector<32x128xf32>
    %243 = arith.truncf %242 : vector<32x128xf32> to vector<32x128xbf16>
    %cst_74 = arith.constant dense<0.000000e+00> : vector<24x128xf32>
    %244 = tpu.matmul %241, %243, %cst_74 {dimension_numbers = #tpu.dot_dimension_numbers<[1], [0], [0], [1], [0, 0, 1, 1], [], []>} : vector<24x32xbf16>, vector<32x128xbf16>, vector<24x128xf32> -> vector<24x128xf32>
    %c0_75 = arith.constant 0 : index
    %c0_76 = arith.constant 0 : index
    %245 = vector.load %arg19[%c0_75, %c0_76] : memref<1x128xf32, #tpu.memory_space<vmem>>, vector<1x128xf32>
    %246 = vector.broadcast %245 : vector<1x128xf32> to vector<24x128xf32>
    %247 = arith.addf %244, %246 : vector<24x128xf32>
    %248 = vector.shape_cast %247 : vector<24x128xf32> to vector<3x8x128xf32>
    %c0_77 = arith.constant 0 : index
    %c0_78 = arith.constant 0 : index
    %c0_79 = arith.constant 0 : index
    %249 = vector.load %arg35[%c0_77, %c0_78, %c0_79] : memref<3x8x128xf32, #tpu.memory_space<vmem>>, vector<3x8x128xf32>
    tpu.vector_store %arg35[%c0_77, %c0_78, %c0_79], %248 {strides = array<i32>} : memref<3x8x128xf32, #tpu.memory_space<vmem>>, vector<3x8x128xf32>,
    %c0_80 = arith.constant 0 : index
    %c0_81 = arith.constant 0 : index
    %250 = vector.load %arg18[%c0_80, %c0_81] : memref<32x128xf32, #tpu.memory_space<vmem>>, vector<32x128xf32>
    %251 = arith.truncf %250 : vector<32x128xf32> to vector<32x128xbf16>
    %cst_82 = arith.constant 0.000000e+00 : f32
    %252 = vector.broadcast %cst_82 : f32 to vector<8x32xf32>
    %c0_i32_83 = arith.constant 0 : i32
    %253 = arith.index_cast %c0_i32_83 : i32 to index
    %c0_84 = arith.constant 0 : index
    %c0_85 = arith.constant 0 : index
    %254 = vector.load %arg35[%253, %c0_84, %c0_85] : memref<3x8x128xf32, #tpu.memory_space<vmem>>, vector<1x8x128xf32>
    %255 = vector.shape_cast %254 : vector<1x8x128xf32> to vector<8x128xf32>
    %256 = arith.truncf %252 : vector<8x32xf32> to vector<8x32xbf16>
    %cst_86 = arith.constant dense<0.000000e+00> : vector<8x128xf32>
    %257 = tpu.matmul %256, %251, %cst_86 {dimension_numbers = #tpu.dot_dimension_numbers<[1], [0], [0], [1], [0, 0, 1, 1], [], []>} : vector<8x32xbf16>, vector<32x128xbf16>, vector<8x128xf32> -> vector<8x128xf32>
    %258 = arith.addf %255, %257 : vector<8x128xf32>
    %259 = vector.extract_strided_slice %258 {offsets = [0, 0], sizes = [8, 96], strides = [1, 1]} : vector<8x128xf32> to vector<8x96xf32>
    %260 = arith.negf %259 : vector<8x96xf32>
    %261 = math.exp %260 : vector<8x96xf32>
    %cst_87 = arith.constant 1.000000e+00 : f32
    %262 = vector.broadcast %cst_87 : f32 to vector<8x96xf32>
    %263 = arith.addf %262, %261 : vector<8x96xf32>
    %264 = arith.divf %262, %263 : vector<8x96xf32>
    %265 = vector.extract_strided_slice %258 {offsets = [0, 96], sizes = [8, 32], strides = [1, 1]} : vector<8x128xf32> to vector<8x32xf32>
    %266 = math.tanh %265 : vector<8x32xf32>
    %267 = vector.extract_strided_slice %264 {offsets = [0, 32], sizes = [8, 32], strides = [1, 1]} : vector<8x96xf32> to vector<8x32xf32>
    %268 = arith.mulf %267, %252 : vector<8x32xf32>
    %269 = vector.extract_strided_slice %264 {offsets = [0, 0], sizes = [8, 32], strides = [1, 1]} : vector<8x96xf32> to vector<8x32xf32>
    %270 = arith.mulf %269, %266 : vector<8x32xf32>
    %271 = arith.addf %268, %270 : vector<8x32xf32>
    %272 = vector.extract_strided_slice %264 {offsets = [0, 64], sizes = [8, 32], strides = [1, 1]} : vector<8x96xf32> to vector<8x32xf32>
    %273 = math.tanh %271 : vector<8x32xf32>
    %274 = arith.mulf %272, %273 : vector<8x32xf32>
    %275 = arith.index_cast %c0_i32_83 : i32 to index
    %c0_88 = arith.constant 0 : index
    %c0_89 = arith.constant 0 : index
    %276 = vector.load %arg36[%275, %c0_88, %c0_89] : memref<3x8x32xf32, #tpu.memory_space<vmem>>, vector<1x8x32xf32>
    %277 = vector.shape_cast %276 : vector<1x8x32xf32> to vector<8x32xf32>
    %278 = vector.shape_cast %274 : vector<8x32xf32> to vector<1x8x32xf32>
    tpu.vector_store %arg36[%275, %c0_88, %c0_89], %278 {strides = array<i32>} : memref<3x8x32xf32, #tpu.memory_space<vmem>>, vector<1x8x32xf32>,
    %c1_i32_90 = arith.constant 1 : i32
    %279 = arith.index_cast %c1_i32_90 : i32 to index
    %c0_91 = arith.constant 0 : index
    %c0_92 = arith.constant 0 : index
    %280 = vector.load %arg35[%279, %c0_91, %c0_92] : memref<3x8x128xf32, #tpu.memory_space<vmem>>, vector<1x8x128xf32>
    %281 = vector.shape_cast %280 : vector<1x8x128xf32> to vector<8x128xf32>
    %282 = arith.truncf %274 : vector<8x32xf32> to vector<8x32xbf16>
    %cst_93 = arith.constant dense<0.000000e+00> : vector<8x128xf32>
    %283 = tpu.matmul %282, %251, %cst_93 {dimension_numbers = #tpu.dot_dimension_numbers<[1], [0], [0], [1], [0, 0, 1, 1], [], []>} : vector<8x32xbf16>, vector<32x128xbf16>, vector<8x128xf32> -> vector<8x128xf32>
    %284 = arith.addf %281, %283 : vector<8x128xf32>
    %285 = vector.extract_strided_slice %284 {offsets = [0, 0], sizes = [8, 96], strides = [1, 1]} : vector<8x128xf32> to vector<8x96xf32>
    %286 = arith.negf %285 : vector<8x96xf32>
    %287 = math.exp %286 : vector<8x96xf32>
    %cst_94 = arith.constant 1.000000e+00 : f32
    %288 = vector.broadcast %cst_94 : f32 to vector<8x96xf32>
    %289 = arith.addf %288, %287 : vector<8x96xf32>
    %290 = arith.divf %288, %289 : vector<8x96xf32>
    %291 = vector.extract_strided_slice %284 {offsets = [0, 96], sizes = [8, 32], strides = [1, 1]} : vector<8x128xf32> to vector<8x32xf32>
    %292 = math.tanh %291 : vector<8x32xf32>
    %293 = vector.extract_strided_slice %290 {offsets = [0, 32], sizes = [8, 32], strides = [1, 1]} : vector<8x96xf32> to vector<8x32xf32>
    %294 = arith.mulf %293, %271 : vector<8x32xf32>
    %295 = vector.extract_strided_slice %290 {offsets = [0, 0], sizes = [8, 32], strides = [1, 1]} : vector<8x96xf32> to vector<8x32xf32>
    %296 = arith.mulf %295, %292 : vector<8x32xf32>
    %297 = arith.addf %294, %296 : vector<8x32xf32>
    %298 = vector.extract_strided_slice %290 {offsets = [0, 64], sizes = [8, 32], strides = [1, 1]} : vector<8x96xf32> to vector<8x32xf32>
    %299 = math.tanh %297 : vector<8x32xf32>
    %300 = arith.mulf %298, %299 : vector<8x32xf32>
    %301 = arith.index_cast %c1_i32_90 : i32 to index
    %c0_95 = arith.constant 0 : index
    %c0_96 = arith.constant 0 : index
    %302 = vector.load %arg36[%301, %c0_95, %c0_96] : memref<3x8x32xf32, #tpu.memory_space<vmem>>, vector<1x8x32xf32>
    %303 = vector.shape_cast %302 : vector<1x8x32xf32> to vector<8x32xf32>
    %304 = vector.shape_cast %300 : vector<8x32xf32> to vector<1x8x32xf32>
    tpu.vector_store %arg36[%301, %c0_95, %c0_96], %304 {strides = array<i32>} : memref<3x8x32xf32, #tpu.memory_space<vmem>>, vector<1x8x32xf32>,
    %c2_i32_97 = arith.constant 2 : i32
    %305 = arith.index_cast %c2_i32_97 : i32 to index
    %c0_98 = arith.constant 0 : index
    %c0_99 = arith.constant 0 : index
    %306 = vector.load %arg35[%305, %c0_98, %c0_99] : memref<3x8x128xf32, #tpu.memory_space<vmem>>, vector<1x8x128xf32>
    %307 = vector.shape_cast %306 : vector<1x8x128xf32> to vector<8x128xf32>
    %308 = arith.truncf %300 : vector<8x32xf32> to vector<8x32xbf16>
    %cst_100 = arith.constant dense<0.000000e+00> : vector<8x128xf32>
    %309 = tpu.matmul %308, %251, %cst_100 {dimension_numbers = #tpu.dot_dimension_numbers<[1], [0], [0], [1], [0, 0, 1, 1], [], []>} : vector<8x32xbf16>, vector<32x128xbf16>, vector<8x128xf32> -> vector<8x128xf32>
    %310 = arith.addf %307, %309 : vector<8x128xf32>
    %311 = vector.extract_strided_slice %310 {offsets = [0, 0], sizes = [8, 96], strides = [1, 1]} : vector<8x128xf32> to vector<8x96xf32>
    %312 = arith.negf %311 : vector<8x96xf32>
    %313 = math.exp %312 : vector<8x96xf32>
    %cst_101 = arith.constant 1.000000e+00 : f32
    %314 = vector.broadcast %cst_101 : f32 to vector<8x96xf32>
    %315 = arith.addf %314, %313 : vector<8x96xf32>
    %316 = arith.divf %314, %315 : vector<8x96xf32>
    %317 = vector.extract_strided_slice %310 {offsets = [0, 96], sizes = [8, 32], strides = [1, 1]} : vector<8x128xf32> to vector<8x32xf32>
    %318 = math.tanh %317 : vector<8x32xf32>
    %319 = vector.extract_strided_slice %316 {offsets = [0, 32], sizes = [8, 32], strides = [1, 1]} : vector<8x96xf32> to vector<8x32xf32>
    %320 = arith.mulf %319, %297 : vector<8x32xf32>
    %321 = vector.extract_strided_slice %316 {offsets = [0, 0], sizes = [8, 32], strides = [1, 1]} : vector<8x96xf32> to vector<8x32xf32>
    %322 = arith.mulf %321, %318 : vector<8x32xf32>
    %323 = arith.addf %320, %322 : vector<8x32xf32>
    %324 = vector.extract_strided_slice %316 {offsets = [0, 64], sizes = [8, 32], strides = [1, 1]} : vector<8x96xf32> to vector<8x32xf32>
    %325 = math.tanh %323 : vector<8x32xf32>
    %326 = arith.mulf %324, %325 : vector<8x32xf32>
    %327 = arith.index_cast %c2_i32_97 : i32 to index
    %c0_102 = arith.constant 0 : index
    %c0_103 = arith.constant 0 : index
    %328 = vector.load %arg36[%327, %c0_102, %c0_103] : memref<3x8x32xf32, #tpu.memory_space<vmem>>, vector<1x8x32xf32>
    %329 = vector.shape_cast %328 : vector<1x8x32xf32> to vector<8x32xf32>
    %330 = vector.shape_cast %326 : vector<8x32xf32> to vector<1x8x32xf32>
    tpu.vector_store %arg36[%327, %c0_102, %c0_103], %330 {strides = array<i32>} : memref<3x8x32xf32, #tpu.memory_space<vmem>>, vector<1x8x32xf32>,
    %c3_i32_104 = arith.constant 3 : i32
    %c0_105 = arith.constant 0 : index
    %c0_106 = arith.constant 0 : index
    %c0_107 = arith.constant 0 : index
    %331 = vector.load %arg36[%c0_105, %c0_106, %c0_107] : memref<3x8x32xf32, #tpu.memory_space<vmem>>, vector<3x8x32xf32>
    %332 = vector.shape_cast %331 : vector<3x8x32xf32> to vector<24x32xf32>
    %333 = arith.truncf %332 : vector<24x32xf32> to vector<24x32xbf16>
    %c0_108 = arith.constant 0 : index
    %c0_109 = arith.constant 0 : index
    %334 = vector.load %arg20[%c0_108, %c0_109] : memref<32x128xf32, #tpu.memory_space<vmem>>, vector<32x128xf32>
    %335 = arith.truncf %334 : vector<32x128xf32> to vector<32x128xbf16>
    %cst_110 = arith.constant dense<0.000000e+00> : vector<24x128xf32>
    %336 = tpu.matmul %333, %335, %cst_110 {dimension_numbers = #tpu.dot_dimension_numbers<[1], [0], [0], [1], [0, 0, 1, 1], [], []>} : vector<24x32xbf16>, vector<32x128xbf16>, vector<24x128xf32> -> vector<24x128xf32>
    %c0_111 = arith.constant 0 : index
    %c0_112 = arith.constant 0 : index
    %337 = vector.load %arg22[%c0_111, %c0_112] : memref<1x128xf32, #tpu.memory_space<vmem>>, vector<1x128xf32>
    %338 = vector.broadcast %337 : vector<1x128xf32> to vector<24x128xf32>
    %339 = arith.addf %336, %338 : vector<24x128xf32>
    %340 = vector.shape_cast %339 : vector<24x128xf32> to vector<3x8x128xf32>
    %c0_113 = arith.constant 0 : index
    %c0_114 = arith.constant 0 : index
    %c0_115 = arith.constant 0 : index
    %341 = vector.load %arg37[%c0_113, %c0_114, %c0_115] : memref<3x8x128xf32, #tpu.memory_space<vmem>>, vector<3x8x128xf32>
    tpu.vector_store %arg37[%c0_113, %c0_114, %c0_115], %340 {strides = array<i32>} : memref<3x8x128xf32, #tpu.memory_space<vmem>>, vector<3x8x128xf32>,
    %c0_116 = arith.constant 0 : index
    %c0_117 = arith.constant 0 : index
    %342 = vector.load %arg21[%c0_116, %c0_117] : memref<32x128xf32, #tpu.memory_space<vmem>>, vector<32x128xf32>
    %343 = arith.truncf %342 : vector<32x128xf32> to vector<32x128xbf16>
    %cst_118 = arith.constant 0.000000e+00 : f32
    %344 = vector.broadcast %cst_118 : f32 to vector<8x32xf32>
    %c0_i32_119 = arith.constant 0 : i32
    %345 = arith.index_cast %c0_i32_119 : i32 to index
    %c0_120 = arith.constant 0 : index
    %c0_121 = arith.constant 0 : index
    %346 = vector.load %arg37[%345, %c0_120, %c0_121] : memref<3x8x128xf32, #tpu.memory_space<vmem>>, vector<1x8x128xf32>
    %347 = vector.shape_cast %346 : vector<1x8x128xf32> to vector<8x128xf32>
    %348 = arith.truncf %344 : vector<8x32xf32> to vector<8x32xbf16>
    %cst_122 = arith.constant dense<0.000000e+00> : vector<8x128xf32>
    %349 = tpu.matmul %348, %343, %cst_122 {dimension_numbers = #tpu.dot_dimension_numbers<[1], [0], [0], [1], [0, 0, 1, 1], [], []>} : vector<8x32xbf16>, vector<32x128xbf16>, vector<8x128xf32> -> vector<8x128xf32>
    %350 = arith.addf %347, %349 : vector<8x128xf32>
    %351 = vector.extract_strided_slice %350 {offsets = [0, 0], sizes = [8, 96], strides = [1, 1]} : vector<8x128xf32> to vector<8x96xf32>
    %352 = arith.negf %351 : vector<8x96xf32>
    %353 = math.exp %352 : vector<8x96xf32>
    %cst_123 = arith.constant 1.000000e+00 : f32
    %354 = vector.broadcast %cst_123 : f32 to vector<8x96xf32>
    %355 = arith.addf %354, %353 : vector<8x96xf32>
    %356 = arith.divf %354, %355 : vector<8x96xf32>
    %357 = vector.extract_strided_slice %350 {offsets = [0, 96], sizes = [8, 32], strides = [1, 1]} : vector<8x128xf32> to vector<8x32xf32>
    %358 = math.tanh %357 : vector<8x32xf32>
    %359 = vector.extract_strided_slice %356 {offsets = [0, 32], sizes = [8, 32], strides = [1, 1]} : vector<8x96xf32> to vector<8x32xf32>
    %360 = arith.mulf %359, %344 : vector<8x32xf32>
    %361 = vector.extract_strided_slice %356 {offsets = [0, 0], sizes = [8, 32], strides = [1, 1]} : vector<8x96xf32> to vector<8x32xf32>
    %362 = arith.mulf %361, %358 : vector<8x32xf32>
    %363 = arith.addf %360, %362 : vector<8x32xf32>
    %364 = vector.extract_strided_slice %356 {offsets = [0, 64], sizes = [8, 32], strides = [1, 1]} : vector<8x96xf32> to vector<8x32xf32>
    %365 = math.tanh %363 : vector<8x32xf32>
    %366 = arith.mulf %364, %365 : vector<8x32xf32>
    %c1_i32_124 = arith.constant 1 : i32
    %367 = arith.index_cast %c1_i32_124 : i32 to index
    %c0_125 = arith.constant 0 : index
    %c0_126 = arith.constant 0 : index
    %368 = vector.load %arg37[%367, %c0_125, %c0_126] : memref<3x8x128xf32, #tpu.memory_space<vmem>>, vector<1x8x128xf32>
    %369 = vector.shape_cast %368 : vector<1x8x128xf32> to vector<8x128xf32>
    %370 = arith.truncf %366 : vector<8x32xf32> to vector<8x32xbf16>
    %cst_127 = arith.constant dense<0.000000e+00> : vector<8x128xf32>
    %371 = tpu.matmul %370, %343, %cst_127 {dimension_numbers = #tpu.dot_dimension_numbers<[1], [0], [0], [1], [0, 0, 1, 1], [], []>} : vector<8x32xbf16>, vector<32x128xbf16>, vector<8x128xf32> -> vector<8x128xf32>
    %372 = arith.addf %369, %371 : vector<8x128xf32>
    %373 = vector.extract_strided_slice %372 {offsets = [0, 0], sizes = [8, 96], strides = [1, 1]} : vector<8x128xf32> to vector<8x96xf32>
    %374 = arith.negf %373 : vector<8x96xf32>
    %375 = math.exp %374 : vector<8x96xf32>
    %cst_128 = arith.constant 1.000000e+00 : f32
    %376 = vector.broadcast %cst_128 : f32 to vector<8x96xf32>
    %377 = arith.addf %376, %375 : vector<8x96xf32>
    %378 = arith.divf %376, %377 : vector<8x96xf32>
    %379 = vector.extract_strided_slice %372 {offsets = [0, 96], sizes = [8, 32], strides = [1, 1]} : vector<8x128xf32> to vector<8x32xf32>
    %380 = math.tanh %379 : vector<8x32xf32>
    %381 = vector.extract_strided_slice %378 {offsets = [0, 32], sizes = [8, 32], strides = [1, 1]} : vector<8x96xf32> to vector<8x32xf32>
    %382 = arith.mulf %381, %363 : vector<8x32xf32>
    %383 = vector.extract_strided_slice %378 {offsets = [0, 0], sizes = [8, 32], strides = [1, 1]} : vector<8x96xf32> to vector<8x32xf32>
    %384 = arith.mulf %383, %380 : vector<8x32xf32>
    %385 = arith.addf %382, %384 : vector<8x32xf32>
    %386 = vector.extract_strided_slice %378 {offsets = [0, 64], sizes = [8, 32], strides = [1, 1]} : vector<8x96xf32> to vector<8x32xf32>
    %387 = math.tanh %385 : vector<8x32xf32>
    %388 = arith.mulf %386, %387 : vector<8x32xf32>
    %c2_i32_129 = arith.constant 2 : i32
    %389 = arith.index_cast %c2_i32_129 : i32 to index
    %c0_130 = arith.constant 0 : index
    %c0_131 = arith.constant 0 : index
    %390 = vector.load %arg37[%389, %c0_130, %c0_131] : memref<3x8x128xf32, #tpu.memory_space<vmem>>, vector<1x8x128xf32>
    %391 = vector.shape_cast %390 : vector<1x8x128xf32> to vector<8x128xf32>
    %392 = arith.truncf %388 : vector<8x32xf32> to vector<8x32xbf16>
    %cst_132 = arith.constant dense<0.000000e+00> : vector<8x128xf32>
    %393 = tpu.matmul %392, %343, %cst_132 {dimension_numbers = #tpu.dot_dimension_numbers<[1], [0], [0], [1], [0, 0, 1, 1], [], []>} : vector<8x32xbf16>, vector<32x128xbf16>, vector<8x128xf32> -> vector<8x128xf32>
    %394 = arith.addf %391, %393 : vector<8x128xf32>
    %395 = vector.extract_strided_slice %394 {offsets = [0, 0], sizes = [8, 96], strides = [1, 1]} : vector<8x128xf32> to vector<8x96xf32>
    %396 = arith.negf %395 : vector<8x96xf32>
    %397 = math.exp %396 : vector<8x96xf32>
    %cst_133 = arith.constant 1.000000e+00 : f32
    %398 = vector.broadcast %cst_133 : f32 to vector<8x96xf32>
    %399 = arith.addf %398, %397 : vector<8x96xf32>
    %400 = arith.divf %398, %399 : vector<8x96xf32>
    %401 = vector.extract_strided_slice %394 {offsets = [0, 96], sizes = [8, 32], strides = [1, 1]} : vector<8x128xf32> to vector<8x32xf32>
    %402 = math.tanh %401 : vector<8x32xf32>
    %403 = vector.extract_strided_slice %400 {offsets = [0, 32], sizes = [8, 32], strides = [1, 1]} : vector<8x96xf32> to vector<8x32xf32>
    %404 = arith.mulf %403, %385 : vector<8x32xf32>
    %405 = vector.extract_strided_slice %400 {offsets = [0, 0], sizes = [8, 32], strides = [1, 1]} : vector<8x96xf32> to vector<8x32xf32>
    %406 = arith.mulf %405, %402 : vector<8x32xf32>
    %407 = arith.addf %404, %406 : vector<8x32xf32>
    %408 = vector.extract_strided_slice %400 {offsets = [0, 64], sizes = [8, 32], strides = [1, 1]} : vector<8x96xf32> to vector<8x32xf32>
    %409 = math.tanh %407 : vector<8x32xf32>
    %410 = arith.mulf %408, %409 : vector<8x32xf32>
    %c3_i32_134 = arith.constant 3 : i32
    %411 = arith.truncf %410 : vector<8x32xf32> to vector<8x32xbf16>
    %c0_135 = arith.constant 0 : index
    %c0_136 = arith.constant 0 : index
    %412 = vector.load %arg23[%c0_135, %c0_136] : memref<32x128xf32, #tpu.memory_space<vmem>>, vector<32x128xf32>
    %413 = arith.truncf %412 : vector<32x128xf32> to vector<32x128xbf16>
    %cst_137 = arith.constant dense<0.000000e+00> : vector<8x128xf32>
    %414 = tpu.matmul %411, %413, %cst_137 {dimension_numbers = #tpu.dot_dimension_numbers<[1], [0], [0], [1], [0, 0, 1, 1], [], []>} : vector<8x32xbf16>, vector<32x128xbf16>, vector<8x128xf32> -> vector<8x128xf32>
    %c0_138 = arith.constant 0 : index
    %c0_139 = arith.constant 0 : index
    %415 = vector.load %arg3[%c0_138, %c0_139] : memref<8x104xf32, #tpu.memory_space<vmem>>, vector<8x104xf32>
    %416 = arith.truncf %415 : vector<8x104xf32> to vector<8x104xbf16>
    %c0_140 = arith.constant 0 : index
    %c0_141 = arith.constant 0 : index
    %417 = vector.load %arg24[%c0_140, %c0_141] : memref<104x128xf32, #tpu.memory_space<vmem>>, vector<104x128xf32>
    %418 = arith.truncf %417 : vector<104x128xf32> to vector<104x128xbf16>
    %cst_142 = arith.constant dense<0.000000e+00> : vector<8x128xf32>
    %419 = tpu.matmul %416, %418, %cst_142 {dimension_numbers = #tpu.dot_dimension_numbers<[1], [0], [0], [1], [0, 0, 1, 1], [], []>} : vector<8x104xbf16>, vector<104x128xbf16>, vector<8x128xf32> -> vector<8x128xf32>
    %420 = arith.addf %414, %419 : vector<8x128xf32>
    %c0_143 = arith.constant 0 : index
    %c0_144 = arith.constant 0 : index
    %421 = vector.load %arg27[%c0_143, %c0_144] : memref<1x128xf32, #tpu.memory_space<vmem>>, vector<1x128xf32>
    %422 = vector.broadcast %421 : vector<1x128xf32> to vector<8x128xf32>
    %423 = arith.addf %420, %422 : vector<8x128xf32>
    %c0_145 = arith.constant 0 : index
    %c0_146 = arith.constant 0 : index
    %c0_147 = arith.constant 0 : index
    %424 = vector.load %arg4[%c0_145, %c0_146, %c0_147] : memref<6x8x32xf32, #tpu.memory_space<vmem>>, vector<6x8x32xf32>
    %425 = vector.shape_cast %424 : vector<6x8x32xf32> to vector<48x32xf32>
    %426 = arith.truncf %425 : vector<48x32xf32> to vector<48x32xbf16>
    %c0_148 = arith.constant 0 : index
    %c0_149 = arith.constant 0 : index
    %427 = vector.load %arg25[%c0_148, %c0_149] : memref<32x128xf32, #tpu.memory_space<vmem>>, vector<32x128xf32>
    %428 = arith.truncf %427 : vector<32x128xf32> to vector<32x128xbf16>
    %cst_150 = arith.constant dense<0.000000e+00> : vector<48x128xf32>
    %429 = tpu.matmul %426, %428, %cst_150 {dimension_numbers = #tpu.dot_dimension_numbers<[1], [0], [0], [1], [0, 0, 1, 1], [], []>} : vector<48x32xbf16>, vector<32x128xbf16>, vector<48x128xf32> -> vector<48x128xf32>
    %430 = vector.shape_cast %429 : vector<48x128xf32> to vector<6x8x128xf32>
    %431 = vector.shape_cast %423 : vector<8x128xf32> to vector<1x8x128xf32>
    %432 = vector.shape_cast %431 : vector<1x8x128xf32> to vector<1x8x128xf32>
    %433 = vector.broadcast %432 : vector<1x8x128xf32> to vector<6x8x128xf32>
    %434 = arith.addf %430, %433 : vector<6x8x128xf32>
    %c0_151 = arith.constant 0 : index
    %c0_152 = arith.constant 0 : index
    %c0_153 = arith.constant 0 : index
    %435 = vector.load %arg38[%c0_151, %c0_152, %c0_153] : memref<6x8x128xf32, #tpu.memory_space<vmem>>, vector<6x8x128xf32>
    tpu.vector_store %arg38[%c0_151, %c0_152, %c0_153], %434 {strides = array<i32>} : memref<6x8x128xf32, #tpu.memory_space<vmem>>, vector<6x8x128xf32>,
    %c0_154 = arith.constant 0 : index
    %c0_155 = arith.constant 0 : index
    %436 = vector.load %arg26[%c0_154, %c0_155] : memref<32x128xf32, #tpu.memory_space<vmem>>, vector<32x128xf32>
    %437 = arith.truncf %436 : vector<32x128xf32> to vector<32x128xbf16>
    %cst_156 = arith.constant 0.000000e+00 : f32
    %438 = vector.broadcast %cst_156 : f32 to vector<8x32xf32>
    %c0_i32_157 = arith.constant 0 : i32
    %439 = arith.index_cast %c0_i32_157 : i32 to index
    %c0_158 = arith.constant 0 : index
    %c0_159 = arith.constant 0 : index
    %440 = vector.load %arg38[%439, %c0_158, %c0_159] : memref<6x8x128xf32, #tpu.memory_space<vmem>>, vector<1x8x128xf32>
    %441 = vector.shape_cast %440 : vector<1x8x128xf32> to vector<8x128xf32>
    %442 = arith.truncf %438 : vector<8x32xf32> to vector<8x32xbf16>
    %cst_160 = arith.constant dense<0.000000e+00> : vector<8x128xf32>
    %443 = tpu.matmul %442, %437, %cst_160 {dimension_numbers = #tpu.dot_dimension_numbers<[1], [0], [0], [1], [0, 0, 1, 1], [], []>} : vector<8x32xbf16>, vector<32x128xbf16>, vector<8x128xf32> -> vector<8x128xf32>
    %444 = arith.addf %441, %443 : vector<8x128xf32>
    %445 = vector.extract_strided_slice %444 {offsets = [0, 0], sizes = [8, 96], strides = [1, 1]} : vector<8x128xf32> to vector<8x96xf32>
    %446 = arith.negf %445 : vector<8x96xf32>
    %447 = math.exp %446 : vector<8x96xf32>
    %cst_161 = arith.constant 1.000000e+00 : f32
    %448 = vector.broadcast %cst_161 : f32 to vector<8x96xf32>
    %449 = arith.addf %448, %447 : vector<8x96xf32>
    %450 = arith.divf %448, %449 : vector<8x96xf32>
    %451 = vector.extract_strided_slice %444 {offsets = [0, 96], sizes = [8, 32], strides = [1, 1]} : vector<8x128xf32> to vector<8x32xf32>
    %452 = math.tanh %451 : vector<8x32xf32>
    %453 = vector.extract_strided_slice %450 {offsets = [0, 32], sizes = [8, 32], strides = [1, 1]} : vector<8x96xf32> to vector<8x32xf32>
    %454 = arith.mulf %453, %438 : vector<8x32xf32>
    %455 = vector.extract_strided_slice %450 {offsets = [0, 0], sizes = [8, 32], strides = [1, 1]} : vector<8x96xf32> to vector<8x32xf32>
    %456 = arith.mulf %455, %452 : vector<8x32xf32>
    %457 = arith.addf %454, %456 : vector<8x32xf32>
    %458 = vector.extract_strided_slice %450 {offsets = [0, 64], sizes = [8, 32], strides = [1, 1]} : vector<8x96xf32> to vector<8x32xf32>
    %459 = math.tanh %457 : vector<8x32xf32>
    %460 = arith.mulf %458, %459 : vector<8x32xf32>
    %461 = arith.index_cast %c0_i32_157 : i32 to index
    %c0_162 = arith.constant 0 : index
    %c0_163 = arith.constant 0 : index
    %462 = vector.load %arg39[%461, %c0_162, %c0_163] : memref<6x8x32xf32, #tpu.memory_space<vmem>>, vector<1x8x32xf32>
    %463 = vector.shape_cast %462 : vector<1x8x32xf32> to vector<8x32xf32>
    %464 = vector.shape_cast %460 : vector<8x32xf32> to vector<1x8x32xf32>
    tpu.vector_store %arg39[%461, %c0_162, %c0_163], %464 {strides = array<i32>} : memref<6x8x32xf32, #tpu.memory_space<vmem>>, vector<1x8x32xf32>,
    %c1_i32_164 = arith.constant 1 : i32
    %465 = arith.index_cast %c1_i32_164 : i32 to index
    %c0_165 = arith.constant 0 : index
    %c0_166 = arith.constant 0 : index
    %466 = vector.load %arg38[%465, %c0_165, %c0_166] : memref<6x8x128xf32, #tpu.memory_space<vmem>>, vector<1x8x128xf32>
    %467 = vector.shape_cast %466 : vector<1x8x128xf32> to vector<8x128xf32>
    %468 = arith.truncf %460 : vector<8x32xf32> to vector<8x32xbf16>
    %cst_167 = arith.constant dense<0.000000e+00> : vector<8x128xf32>
    %469 = tpu.matmul %468, %437, %cst_167 {dimension_numbers = #tpu.dot_dimension_numbers<[1], [0], [0], [1], [0, 0, 1, 1], [], []>} : vector<8x32xbf16>, vector<32x128xbf16>, vector<8x128xf32> -> vector<8x128xf32>
    %470 = arith.addf %467, %469 : vector<8x128xf32>
    %471 = vector.extract_strided_slice %470 {offsets = [0, 0], sizes = [8, 96], strides = [1, 1]} : vector<8x128xf32> to vector<8x96xf32>
    %472 = arith.negf %471 : vector<8x96xf32>
    %473 = math.exp %472 : vector<8x96xf32>
    %cst_168 = arith.constant 1.000000e+00 : f32
    %474 = vector.broadcast %cst_168 : f32 to vector<8x96xf32>
    %475 = arith.addf %474, %473 : vector<8x96xf32>
    %476 = arith.divf %474, %475 : vector<8x96xf32>
    %477 = vector.extract_strided_slice %470 {offsets = [0, 96], sizes = [8, 32], strides = [1, 1]} : vector<8x128xf32> to vector<8x32xf32>
    %478 = math.tanh %477 : vector<8x32xf32>
    %479 = vector.extract_strided_slice %476 {offsets = [0, 32], sizes = [8, 32], strides = [1, 1]} : vector<8x96xf32> to vector<8x32xf32>
    %480 = arith.mulf %479, %457 : vector<8x32xf32>
    %481 = vector.extract_strided_slice %476 {offsets = [0, 0], sizes = [8, 32], strides = [1, 1]} : vector<8x96xf32> to vector<8x32xf32>
    %482 = arith.mulf %481, %478 : vector<8x32xf32>
    %483 = arith.addf %480, %482 : vector<8x32xf32>
    %484 = vector.extract_strided_slice %476 {offsets = [0, 64], sizes = [8, 32], strides = [1, 1]} : vector<8x96xf32> to vector<8x32xf32>
    %485 = math.tanh %483 : vector<8x32xf32>
    %486 = arith.mulf %484, %485 : vector<8x32xf32>
    %487 = arith.index_cast %c1_i32_164 : i32 to index
    %c0_169 = arith.constant 0 : index
    %c0_170 = arith.constant 0 : index
    %488 = vector.load %arg39[%487, %c0_169, %c0_170] : memref<6x8x32xf32, #tpu.memory_space<vmem>>, vector<1x8x32xf32>
    %489 = vector.shape_cast %488 : vector<1x8x32xf32> to vector<8x32xf32>
    %490 = vector.shape_cast %486 : vector<8x32xf32> to vector<1x8x32xf32>
    tpu.vector_store %arg39[%487, %c0_169, %c0_170], %490 {strides = array<i32>} : memref<6x8x32xf32, #tpu.memory_space<vmem>>, vector<1x8x32xf32>,
    %c2_i32_171 = arith.constant 2 : i32
    %491 = arith.index_cast %c2_i32_171 : i32 to index
    %c0_172 = arith.constant 0 : index
    %c0_173 = arith.constant 0 : index
    %492 = vector.load %arg38[%491, %c0_172, %c0_173] : memref<6x8x128xf32, #tpu.memory_space<vmem>>, vector<1x8x128xf32>
    %493 = vector.shape_cast %492 : vector<1x8x128xf32> to vector<8x128xf32>
    %494 = arith.truncf %486 : vector<8x32xf32> to vector<8x32xbf16>
    %cst_174 = arith.constant dense<0.000000e+00> : vector<8x128xf32>
    %495 = tpu.matmul %494, %437, %cst_174 {dimension_numbers = #tpu.dot_dimension_numbers<[1], [0], [0], [1], [0, 0, 1, 1], [], []>} : vector<8x32xbf16>, vector<32x128xbf16>, vector<8x128xf32> -> vector<8x128xf32>
    %496 = arith.addf %493, %495 : vector<8x128xf32>
    %497 = vector.extract_strided_slice %496 {offsets = [0, 0], sizes = [8, 96], strides = [1, 1]} : vector<8x128xf32> to vector<8x96xf32>
    %498 = arith.negf %497 : vector<8x96xf32>
    %499 = math.exp %498 : vector<8x96xf32>
    %cst_175 = arith.constant 1.000000e+00 : f32
    %500 = vector.broadcast %cst_175 : f32 to vector<8x96xf32>
    %501 = arith.addf %500, %499 : vector<8x96xf32>
    %502 = arith.divf %500, %501 : vector<8x96xf32>
    %503 = vector.extract_strided_slice %496 {offsets = [0, 96], sizes = [8, 32], strides = [1, 1]} : vector<8x128xf32> to vector<8x32xf32>
    %504 = math.tanh %503 : vector<8x32xf32>
    %505 = vector.extract_strided_slice %502 {offsets = [0, 32], sizes = [8, 32], strides = [1, 1]} : vector<8x96xf32> to vector<8x32xf32>
    %506 = arith.mulf %505, %483 : vector<8x32xf32>
    %507 = vector.extract_strided_slice %502 {offsets = [0, 0], sizes = [8, 32], strides = [1, 1]} : vector<8x96xf32> to vector<8x32xf32>
    %508 = arith.mulf %507, %504 : vector<8x32xf32>
    %509 = arith.addf %506, %508 : vector<8x32xf32>
    %510 = vector.extract_strided_slice %502 {offsets = [0, 64], sizes = [8, 32], strides = [1, 1]} : vector<8x96xf32> to vector<8x32xf32>
    %511 = math.tanh %509 : vector<8x32xf32>
    %512 = arith.mulf %510, %511 : vector<8x32xf32>
    %513 = arith.index_cast %c2_i32_171 : i32 to index
    %c0_176 = arith.constant 0 : index
    %c0_177 = arith.constant 0 : index
    %514 = vector.load %arg39[%513, %c0_176, %c0_177] : memref<6x8x32xf32, #tpu.memory_space<vmem>>, vector<1x8x32xf32>
    %515 = vector.shape_cast %514 : vector<1x8x32xf32> to vector<8x32xf32>
    %516 = vector.shape_cast %512 : vector<8x32xf32> to vector<1x8x32xf32>
    tpu.vector_store %arg39[%513, %c0_176, %c0_177], %516 {strides = array<i32>} : memref<6x8x32xf32, #tpu.memory_space<vmem>>, vector<1x8x32xf32>,
    %c3_i32_178 = arith.constant 3 : i32
    %517 = arith.index_cast %c3_i32_178 : i32 to index
    %c0_179 = arith.constant 0 : index
    %c0_180 = arith.constant 0 : index
    %518 = vector.load %arg38[%517, %c0_179, %c0_180] : memref<6x8x128xf32, #tpu.memory_space<vmem>>, vector<1x8x128xf32>
    %519 = vector.shape_cast %518 : vector<1x8x128xf32> to vector<8x128xf32>
    %520 = arith.truncf %512 : vector<8x32xf32> to vector<8x32xbf16>
    %cst_181 = arith.constant dense<0.000000e+00> : vector<8x128xf32>
    %521 = tpu.matmul %520, %437, %cst_181 {dimension_numbers = #tpu.dot_dimension_numbers<[1], [0], [0], [1], [0, 0, 1, 1], [], []>} : vector<8x32xbf16>, vector<32x128xbf16>, vector<8x128xf32> -> vector<8x128xf32>
    %522 = arith.addf %519, %521 : vector<8x128xf32>
    %523 = vector.extract_strided_slice %522 {offsets = [0, 0], sizes = [8, 96], strides = [1, 1]} : vector<8x128xf32> to vector<8x96xf32>
    %524 = arith.negf %523 : vector<8x96xf32>
    %525 = math.exp %524 : vector<8x96xf32>
    %cst_182 = arith.constant 1.000000e+00 : f32
    %526 = vector.broadcast %cst_182 : f32 to vector<8x96xf32>
    %527 = arith.addf %526, %525 : vector<8x96xf32>
    %528 = arith.divf %526, %527 : vector<8x96xf32>
    %529 = vector.extract_strided_slice %522 {offsets = [0, 96], sizes = [8, 32], strides = [1, 1]} : vector<8x128xf32> to vector<8x32xf32>
    %530 = math.tanh %529 : vector<8x32xf32>
    %531 = vector.extract_strided_slice %528 {offsets = [0, 32], sizes = [8, 32], strides = [1, 1]} : vector<8x96xf32> to vector<8x32xf32>
    %532 = arith.mulf %531, %509 : vector<8x32xf32>
    %533 = vector.extract_strided_slice %528 {offsets = [0, 0], sizes = [8, 32], strides = [1, 1]} : vector<8x96xf32> to vector<8x32xf32>
    %534 = arith.mulf %533, %530 : vector<8x32xf32>
    %535 = arith.addf %532, %534 : vector<8x32xf32>
    %536 = vector.extract_strided_slice %528 {offsets = [0, 64], sizes = [8, 32], strides = [1, 1]} : vector<8x96xf32> to vector<8x32xf32>
    %537 = math.tanh %535 : vector<8x32xf32>
    %538 = arith.mulf %536, %537 : vector<8x32xf32>
    %539 = arith.index_cast %c3_i32_178 : i32 to index
    %c0_183 = arith.constant 0 : index
    %c0_184 = arith.constant 0 : index
    %540 = vector.load %arg39[%539, %c0_183, %c0_184] : memref<6x8x32xf32, #tpu.memory_space<vmem>>, vector<1x8x32xf32>
    %541 = vector.shape_cast %540 : vector<1x8x32xf32> to vector<8x32xf32>
    %542 = vector.shape_cast %538 : vector<8x32xf32> to vector<1x8x32xf32>
    tpu.vector_store %arg39[%539, %c0_183, %c0_184], %542 {strides = array<i32>} : memref<6x8x32xf32, #tpu.memory_space<vmem>>, vector<1x8x32xf32>,
    %c4_i32_185 = arith.constant 4 : i32
    %543 = arith.index_cast %c4_i32_185 : i32 to index
    %c0_186 = arith.constant 0 : index
    %c0_187 = arith.constant 0 : index
    %544 = vector.load %arg38[%543, %c0_186, %c0_187] : memref<6x8x128xf32, #tpu.memory_space<vmem>>, vector<1x8x128xf32>
    %545 = vector.shape_cast %544 : vector<1x8x128xf32> to vector<8x128xf32>
    %546 = arith.truncf %538 : vector<8x32xf32> to vector<8x32xbf16>
    %cst_188 = arith.constant dense<0.000000e+00> : vector<8x128xf32>
    %547 = tpu.matmul %546, %437, %cst_188 {dimension_numbers = #tpu.dot_dimension_numbers<[1], [0], [0], [1], [0, 0, 1, 1], [], []>} : vector<8x32xbf16>, vector<32x128xbf16>, vector<8x128xf32> -> vector<8x128xf32>
    %548 = arith.addf %545, %547 : vector<8x128xf32>
    %549 = vector.extract_strided_slice %548 {offsets = [0, 0], sizes = [8, 96], strides = [1, 1]} : vector<8x128xf32> to vector<8x96xf32>
    %550 = arith.negf %549 : vector<8x96xf32>
    %551 = math.exp %550 : vector<8x96xf32>
    %cst_189 = arith.constant 1.000000e+00 : f32
    %552 = vector.broadcast %cst_189 : f32 to vector<8x96xf32>
    %553 = arith.addf %552, %551 : vector<8x96xf32>
    %554 = arith.divf %552, %553 : vector<8x96xf32>
    %555 = vector.extract_strided_slice %548 {offsets = [0, 96], sizes = [8, 32], strides = [1, 1]} : vector<8x128xf32> to vector<8x32xf32>
    %556 = math.tanh %555 : vector<8x32xf32>
    %557 = vector.extract_strided_slice %554 {offsets = [0, 32], sizes = [8, 32], strides = [1, 1]} : vector<8x96xf32> to vector<8x32xf32>
    %558 = arith.mulf %557, %535 : vector<8x32xf32>
    %559 = vector.extract_strided_slice %554 {offsets = [0, 0], sizes = [8, 32], strides = [1, 1]} : vector<8x96xf32> to vector<8x32xf32>
    %560 = arith.mulf %559, %556 : vector<8x32xf32>
    %561 = arith.addf %558, %560 : vector<8x32xf32>
    %562 = vector.extract_strided_slice %554 {offsets = [0, 64], sizes = [8, 32], strides = [1, 1]} : vector<8x96xf32> to vector<8x32xf32>
    %563 = math.tanh %561 : vector<8x32xf32>
    %564 = arith.mulf %562, %563 : vector<8x32xf32>
    %565 = arith.index_cast %c4_i32_185 : i32 to index
    %c0_190 = arith.constant 0 : index
    %c0_191 = arith.constant 0 : index
    %566 = vector.load %arg39[%565, %c0_190, %c0_191] : memref<6x8x32xf32, #tpu.memory_space<vmem>>, vector<1x8x32xf32>
    %567 = vector.shape_cast %566 : vector<1x8x32xf32> to vector<8x32xf32>
    %568 = vector.shape_cast %564 : vector<8x32xf32> to vector<1x8x32xf32>
    tpu.vector_store %arg39[%565, %c0_190, %c0_191], %568 {strides = array<i32>} : memref<6x8x32xf32, #tpu.memory_space<vmem>>, vector<1x8x32xf32>,
    %c5_i32_192 = arith.constant 5 : i32
    %569 = arith.index_cast %c5_i32_192 : i32 to index
    %c0_193 = arith.constant 0 : index
    %c0_194 = arith.constant 0 : index
    %570 = vector.load %arg38[%569, %c0_193, %c0_194] : memref<6x8x128xf32, #tpu.memory_space<vmem>>, vector<1x8x128xf32>
    %571 = vector.shape_cast %570 : vector<1x8x128xf32> to vector<8x128xf32>
    %572 = arith.truncf %564 : vector<8x32xf32> to vector<8x32xbf16>
    %cst_195 = arith.constant dense<0.000000e+00> : vector<8x128xf32>
    %573 = tpu.matmul %572, %437, %cst_195 {dimension_numbers = #tpu.dot_dimension_numbers<[1], [0], [0], [1], [0, 0, 1, 1], [], []>} : vector<8x32xbf16>, vector<32x128xbf16>, vector<8x128xf32> -> vector<8x128xf32>
    %574 = arith.addf %571, %573 : vector<8x128xf32>
    %575 = vector.extract_strided_slice %574 {offsets = [0, 0], sizes = [8, 96], strides = [1, 1]} : vector<8x128xf32> to vector<8x96xf32>
    %576 = arith.negf %575 : vector<8x96xf32>
    %577 = math.exp %576 : vector<8x96xf32>
    %cst_196 = arith.constant 1.000000e+00 : f32
    %578 = vector.broadcast %cst_196 : f32 to vector<8x96xf32>
    %579 = arith.addf %578, %577 : vector<8x96xf32>
    %580 = arith.divf %578, %579 : vector<8x96xf32>
    %581 = vector.extract_strided_slice %574 {offsets = [0, 96], sizes = [8, 32], strides = [1, 1]} : vector<8x128xf32> to vector<8x32xf32>
    %582 = math.tanh %581 : vector<8x32xf32>
    %583 = vector.extract_strided_slice %580 {offsets = [0, 32], sizes = [8, 32], strides = [1, 1]} : vector<8x96xf32> to vector<8x32xf32>
    %584 = arith.mulf %583, %561 : vector<8x32xf32>
    %585 = vector.extract_strided_slice %580 {offsets = [0, 0], sizes = [8, 32], strides = [1, 1]} : vector<8x96xf32> to vector<8x32xf32>
    %586 = arith.mulf %585, %582 : vector<8x32xf32>
    %587 = arith.addf %584, %586 : vector<8x32xf32>
    %588 = vector.extract_strided_slice %580 {offsets = [0, 64], sizes = [8, 32], strides = [1, 1]} : vector<8x96xf32> to vector<8x32xf32>
    %589 = math.tanh %587 : vector<8x32xf32>
    %590 = arith.mulf %588, %589 : vector<8x32xf32>
    %591 = arith.index_cast %c5_i32_192 : i32 to index
    %c0_197 = arith.constant 0 : index
    %c0_198 = arith.constant 0 : index
    %592 = vector.load %arg39[%591, %c0_197, %c0_198] : memref<6x8x32xf32, #tpu.memory_space<vmem>>, vector<1x8x32xf32>
    %593 = vector.shape_cast %592 : vector<1x8x32xf32> to vector<8x32xf32>
    %594 = vector.shape_cast %590 : vector<8x32xf32> to vector<1x8x32xf32>
    tpu.vector_store %arg39[%591, %c0_197, %c0_198], %594 {strides = array<i32>} : memref<6x8x32xf32, #tpu.memory_space<vmem>>, vector<1x8x32xf32>,
    %c6_i32_199 = arith.constant 6 : i32
    %c0_200 = arith.constant 0 : index
    %c0_201 = arith.constant 0 : index
    %c0_202 = arith.constant 0 : index
    %595 = vector.load %arg39[%c0_200, %c0_201, %c0_202] : memref<6x8x32xf32, #tpu.memory_space<vmem>>, vector<6x8x32xf32>
    %596 = vector.shape_cast %595 : vector<6x8x32xf32> to vector<48x32xf32>
    %597 = arith.truncf %596 : vector<48x32xf32> to vector<48x32xbf16>
    %c0_203 = arith.constant 0 : index
    %c0_204 = arith.constant 0 : index
    %598 = vector.load %arg28[%c0_203, %c0_204] : memref<32x128xf32, #tpu.memory_space<vmem>>, vector<32x128xf32>
    %599 = arith.truncf %598 : vector<32x128xf32> to vector<32x128xbf16>
    %cst_205 = arith.constant dense<0.000000e+00> : vector<48x128xf32>
    %600 = tpu.matmul %597, %599, %cst_205 {dimension_numbers = #tpu.dot_dimension_numbers<[1], [0], [0], [1], [0, 0, 1, 1], [], []>} : vector<48x32xbf16>, vector<32x128xbf16>, vector<48x128xf32> -> vector<48x128xf32>
    %c0_206 = arith.constant 0 : index
    %c0_207 = arith.constant 0 : index
    %601 = vector.load %arg30[%c0_206, %c0_207] : memref<1x128xf32, #tpu.memory_space<vmem>>, vector<1x128xf32>
    %602 = vector.broadcast %601 : vector<1x128xf32> to vector<48x128xf32>
    %603 = arith.addf %600, %602 : vector<48x128xf32>
    %604 = vector.shape_cast %603 : vector<48x128xf32> to vector<6x8x128xf32>
    %c0_208 = arith.constant 0 : index
    %c0_209 = arith.constant 0 : index
    %c0_210 = arith.constant 0 : index
    %605 = vector.load %arg40[%c0_208, %c0_209, %c0_210] : memref<6x8x128xf32, #tpu.memory_space<vmem>>, vector<6x8x128xf32>
    tpu.vector_store %arg40[%c0_208, %c0_209, %c0_210], %604 {strides = array<i32>} : memref<6x8x128xf32, #tpu.memory_space<vmem>>, vector<6x8x128xf32>,
    %c0_211 = arith.constant 0 : index
    %c0_212 = arith.constant 0 : index
    %606 = vector.load %arg29[%c0_211, %c0_212] : memref<32x128xf32, #tpu.memory_space<vmem>>, vector<32x128xf32>
    %607 = arith.truncf %606 : vector<32x128xf32> to vector<32x128xbf16>
    %cst_213 = arith.constant 0.000000e+00 : f32
    %608 = vector.broadcast %cst_213 : f32 to vector<8x32xf32>
    %c0_i32_214 = arith.constant 0 : i32
    %609 = arith.index_cast %c0_i32_214 : i32 to index
    %c0_215 = arith.constant 0 : index
    %c0_216 = arith.constant 0 : index
    %610 = vector.load %arg40[%609, %c0_215, %c0_216] : memref<6x8x128xf32, #tpu.memory_space<vmem>>, vector<1x8x128xf32>
    %611 = vector.shape_cast %610 : vector<1x8x128xf32> to vector<8x128xf32>
    %612 = arith.truncf %608 : vector<8x32xf32> to vector<8x32xbf16>
    %cst_217 = arith.constant dense<0.000000e+00> : vector<8x128xf32>
    %613 = tpu.matmul %612, %607, %cst_217 {dimension_numbers = #tpu.dot_dimension_numbers<[1], [0], [0], [1], [0, 0, 1, 1], [], []>} : vector<8x32xbf16>, vector<32x128xbf16>, vector<8x128xf32> -> vector<8x128xf32>
    %614 = arith.addf %611, %613 : vector<8x128xf32>
    %615 = vector.extract_strided_slice %614 {offsets = [0, 0], sizes = [8, 96], strides = [1, 1]} : vector<8x128xf32> to vector<8x96xf32>
    %616 = arith.negf %615 : vector<8x96xf32>
    %617 = math.exp %616 : vector<8x96xf32>
    %cst_218 = arith.constant 1.000000e+00 : f32
    %618 = vector.broadcast %cst_218 : f32 to vector<8x96xf32>
    %619 = arith.addf %618, %617 : vector<8x96xf32>
    %620 = arith.divf %618, %619 : vector<8x96xf32>
    %621 = vector.extract_strided_slice %614 {offsets = [0, 96], sizes = [8, 32], strides = [1, 1]} : vector<8x128xf32> to vector<8x32xf32>
    %622 = math.tanh %621 : vector<8x32xf32>
    %623 = vector.extract_strided_slice %620 {offsets = [0, 32], sizes = [8, 32], strides = [1, 1]} : vector<8x96xf32> to vector<8x32xf32>
    %624 = arith.mulf %623, %608 : vector<8x32xf32>
    %625 = vector.extract_strided_slice %620 {offsets = [0, 0], sizes = [8, 32], strides = [1, 1]} : vector<8x96xf32> to vector<8x32xf32>
    %626 = arith.mulf %625, %622 : vector<8x32xf32>
    %627 = arith.addf %624, %626 : vector<8x32xf32>
    %628 = vector.extract_strided_slice %620 {offsets = [0, 64], sizes = [8, 32], strides = [1, 1]} : vector<8x96xf32> to vector<8x32xf32>
    %629 = math.tanh %627 : vector<8x32xf32>
    %630 = arith.mulf %628, %629 : vector<8x32xf32>
    %631 = arith.index_cast %c0_i32_214 : i32 to index
    %c0_219 = arith.constant 0 : index
    %c0_220 = arith.constant 0 : index
    %632 = vector.load %arg41[%631, %c0_219, %c0_220] : memref<6x8x32xf32, #tpu.memory_space<vmem>>, vector<1x8x32xf32>
    %633 = vector.shape_cast %632 : vector<1x8x32xf32> to vector<8x32xf32>
    %634 = vector.shape_cast %630 : vector<8x32xf32> to vector<1x8x32xf32>
    tpu.vector_store %arg41[%631, %c0_219, %c0_220], %634 {strides = array<i32>} : memref<6x8x32xf32, #tpu.memory_space<vmem>>, vector<1x8x32xf32>,
    %c1_i32_221 = arith.constant 1 : i32
    %635 = arith.index_cast %c1_i32_221 : i32 to index
    %c0_222 = arith.constant 0 : index
    %c0_223 = arith.constant 0 : index
    %636 = vector.load %arg40[%635, %c0_222, %c0_223] : memref<6x8x128xf32, #tpu.memory_space<vmem>>, vector<1x8x128xf32>
    %637 = vector.shape_cast %636 : vector<1x8x128xf32> to vector<8x128xf32>
    %638 = arith.truncf %630 : vector<8x32xf32> to vector<8x32xbf16>
    %cst_224 = arith.constant dense<0.000000e+00> : vector<8x128xf32>
    %639 = tpu.matmul %638, %607, %cst_224 {dimension_numbers = #tpu.dot_dimension_numbers<[1], [0], [0], [1], [0, 0, 1, 1], [], []>} : vector<8x32xbf16>, vector<32x128xbf16>, vector<8x128xf32> -> vector<8x128xf32>
    %640 = arith.addf %637, %639 : vector<8x128xf32>
    %641 = vector.extract_strided_slice %640 {offsets = [0, 0], sizes = [8, 96], strides = [1, 1]} : vector<8x128xf32> to vector<8x96xf32>
    %642 = arith.negf %641 : vector<8x96xf32>
    %643 = math.exp %642 : vector<8x96xf32>
    %cst_225 = arith.constant 1.000000e+00 : f32
    %644 = vector.broadcast %cst_225 : f32 to vector<8x96xf32>
    %645 = arith.addf %644, %643 : vector<8x96xf32>
    %646 = arith.divf %644, %645 : vector<8x96xf32>
    %647 = vector.extract_strided_slice %640 {offsets = [0, 96], sizes = [8, 32], strides = [1, 1]} : vector<8x128xf32> to vector<8x32xf32>
    %648 = math.tanh %647 : vector<8x32xf32>
    %649 = vector.extract_strided_slice %646 {offsets = [0, 32], sizes = [8, 32], strides = [1, 1]} : vector<8x96xf32> to vector<8x32xf32>
    %650 = arith.mulf %649, %627 : vector<8x32xf32>
    %651 = vector.extract_strided_slice %646 {offsets = [0, 0], sizes = [8, 32], strides = [1, 1]} : vector<8x96xf32> to vector<8x32xf32>
    %652 = arith.mulf %651, %648 : vector<8x32xf32>
    %653 = arith.addf %650, %652 : vector<8x32xf32>
    %654 = vector.extract_strided_slice %646 {offsets = [0, 64], sizes = [8, 32], strides = [1, 1]} : vector<8x96xf32> to vector<8x32xf32>
    %655 = math.tanh %653 : vector<8x32xf32>
    %656 = arith.mulf %654, %655 : vector<8x32xf32>
    %657 = arith.index_cast %c1_i32_221 : i32 to index
    %c0_226 = arith.constant 0 : index
    %c0_227 = arith.constant 0 : index
    %658 = vector.load %arg41[%657, %c0_226, %c0_227] : memref<6x8x32xf32, #tpu.memory_space<vmem>>, vector<1x8x32xf32>
    %659 = vector.shape_cast %658 : vector<1x8x32xf32> to vector<8x32xf32>
    %660 = vector.shape_cast %656 : vector<8x32xf32> to vector<1x8x32xf32>
    tpu.vector_store %arg41[%657, %c0_226, %c0_227], %660 {strides = array<i32>} : memref<6x8x32xf32, #tpu.memory_space<vmem>>, vector<1x8x32xf32>,
    %c2_i32_228 = arith.constant 2 : i32
    %661 = arith.index_cast %c2_i32_228 : i32 to index
    %c0_229 = arith.constant 0 : index
    %c0_230 = arith.constant 0 : index
    %662 = vector.load %arg40[%661, %c0_229, %c0_230] : memref<6x8x128xf32, #tpu.memory_space<vmem>>, vector<1x8x128xf32>
    %663 = vector.shape_cast %662 : vector<1x8x128xf32> to vector<8x128xf32>
    %664 = arith.truncf %656 : vector<8x32xf32> to vector<8x32xbf16>
    %cst_231 = arith.constant dense<0.000000e+00> : vector<8x128xf32>
    %665 = tpu.matmul %664, %607, %cst_231 {dimension_numbers = #tpu.dot_dimension_numbers<[1], [0], [0], [1], [0, 0, 1, 1], [], []>} : vector<8x32xbf16>, vector<32x128xbf16>, vector<8x128xf32> -> vector<8x128xf32>
    %666 = arith.addf %663, %665 : vector<8x128xf32>
    %667 = vector.extract_strided_slice %666 {offsets = [0, 0], sizes = [8, 96], strides = [1, 1]} : vector<8x128xf32> to vector<8x96xf32>
    %668 = arith.negf %667 : vector<8x96xf32>
    %669 = math.exp %668 : vector<8x96xf32>
    %cst_232 = arith.constant 1.000000e+00 : f32
    %670 = vector.broadcast %cst_232 : f32 to vector<8x96xf32>
    %671 = arith.addf %670, %669 : vector<8x96xf32>
    %672 = arith.divf %670, %671 : vector<8x96xf32>
    %673 = vector.extract_strided_slice %666 {offsets = [0, 96], sizes = [8, 32], strides = [1, 1]} : vector<8x128xf32> to vector<8x32xf32>
    %674 = math.tanh %673 : vector<8x32xf32>
    %675 = vector.extract_strided_slice %672 {offsets = [0, 32], sizes = [8, 32], strides = [1, 1]} : vector<8x96xf32> to vector<8x32xf32>
    %676 = arith.mulf %675, %653 : vector<8x32xf32>
    %677 = vector.extract_strided_slice %672 {offsets = [0, 0], sizes = [8, 32], strides = [1, 1]} : vector<8x96xf32> to vector<8x32xf32>
    %678 = arith.mulf %677, %674 : vector<8x32xf32>
    %679 = arith.addf %676, %678 : vector<8x32xf32>
    %680 = vector.extract_strided_slice %672 {offsets = [0, 64], sizes = [8, 32], strides = [1, 1]} : vector<8x96xf32> to vector<8x32xf32>
    %681 = math.tanh %679 : vector<8x32xf32>
    %682 = arith.mulf %680, %681 : vector<8x32xf32>
    %683 = arith.index_cast %c2_i32_228 : i32 to index
    %c0_233 = arith.constant 0 : index
    %c0_234 = arith.constant 0 : index
    %684 = vector.load %arg41[%683, %c0_233, %c0_234] : memref<6x8x32xf32, #tpu.memory_space<vmem>>, vector<1x8x32xf32>
    %685 = vector.shape_cast %684 : vector<1x8x32xf32> to vector<8x32xf32>
    %686 = vector.shape_cast %682 : vector<8x32xf32> to vector<1x8x32xf32>
    tpu.vector_store %arg41[%683, %c0_233, %c0_234], %686 {strides = array<i32>} : memref<6x8x32xf32, #tpu.memory_space<vmem>>, vector<1x8x32xf32>,
    %c3_i32_235 = arith.constant 3 : i32
    %687 = arith.index_cast %c3_i32_235 : i32 to index
    %c0_236 = arith.constant 0 : index
    %c0_237 = arith.constant 0 : index
    %688 = vector.load %arg40[%687, %c0_236, %c0_237] : memref<6x8x128xf32, #tpu.memory_space<vmem>>, vector<1x8x128xf32>
    %689 = vector.shape_cast %688 : vector<1x8x128xf32> to vector<8x128xf32>
    %690 = arith.truncf %682 : vector<8x32xf32> to vector<8x32xbf16>
    %cst_238 = arith.constant dense<0.000000e+00> : vector<8x128xf32>
    %691 = tpu.matmul %690, %607, %cst_238 {dimension_numbers = #tpu.dot_dimension_numbers<[1], [0], [0], [1], [0, 0, 1, 1], [], []>} : vector<8x32xbf16>, vector<32x128xbf16>, vector<8x128xf32> -> vector<8x128xf32>
    %692 = arith.addf %689, %691 : vector<8x128xf32>
    %693 = vector.extract_strided_slice %692 {offsets = [0, 0], sizes = [8, 96], strides = [1, 1]} : vector<8x128xf32> to vector<8x96xf32>
    %694 = arith.negf %693 : vector<8x96xf32>
    %695 = math.exp %694 : vector<8x96xf32>
    %cst_239 = arith.constant 1.000000e+00 : f32
    %696 = vector.broadcast %cst_239 : f32 to vector<8x96xf32>
    %697 = arith.addf %696, %695 : vector<8x96xf32>
    %698 = arith.divf %696, %697 : vector<8x96xf32>
    %699 = vector.extract_strided_slice %692 {offsets = [0, 96], sizes = [8, 32], strides = [1, 1]} : vector<8x128xf32> to vector<8x32xf32>
    %700 = math.tanh %699 : vector<8x32xf32>
    %701 = vector.extract_strided_slice %698 {offsets = [0, 32], sizes = [8, 32], strides = [1, 1]} : vector<8x96xf32> to vector<8x32xf32>
    %702 = arith.mulf %701, %679 : vector<8x32xf32>
    %703 = vector.extract_strided_slice %698 {offsets = [0, 0], sizes = [8, 32], strides = [1, 1]} : vector<8x96xf32> to vector<8x32xf32>
    %704 = arith.mulf %703, %700 : vector<8x32xf32>
    %705 = arith.addf %702, %704 : vector<8x32xf32>
    %706 = vector.extract_strided_slice %698 {offsets = [0, 64], sizes = [8, 32], strides = [1, 1]} : vector<8x96xf32> to vector<8x32xf32>
    %707 = math.tanh %705 : vector<8x32xf32>
    %708 = arith.mulf %706, %707 : vector<8x32xf32>
    %709 = arith.index_cast %c3_i32_235 : i32 to index
    %c0_240 = arith.constant 0 : index
    %c0_241 = arith.constant 0 : index
    %710 = vector.load %arg41[%709, %c0_240, %c0_241] : memref<6x8x32xf32, #tpu.memory_space<vmem>>, vector<1x8x32xf32>
    %711 = vector.shape_cast %710 : vector<1x8x32xf32> to vector<8x32xf32>
    %712 = vector.shape_cast %708 : vector<8x32xf32> to vector<1x8x32xf32>
    tpu.vector_store %arg41[%709, %c0_240, %c0_241], %712 {strides = array<i32>} : memref<6x8x32xf32, #tpu.memory_space<vmem>>, vector<1x8x32xf32>,
    %c4_i32_242 = arith.constant 4 : i32
    %713 = arith.index_cast %c4_i32_242 : i32 to index
    %c0_243 = arith.constant 0 : index
    %c0_244 = arith.constant 0 : index
    %714 = vector.load %arg40[%713, %c0_243, %c0_244] : memref<6x8x128xf32, #tpu.memory_space<vmem>>, vector<1x8x128xf32>
    %715 = vector.shape_cast %714 : vector<1x8x128xf32> to vector<8x128xf32>
    %716 = arith.truncf %708 : vector<8x32xf32> to vector<8x32xbf16>
    %cst_245 = arith.constant dense<0.000000e+00> : vector<8x128xf32>
    %717 = tpu.matmul %716, %607, %cst_245 {dimension_numbers = #tpu.dot_dimension_numbers<[1], [0], [0], [1], [0, 0, 1, 1], [], []>} : vector<8x32xbf16>, vector<32x128xbf16>, vector<8x128xf32> -> vector<8x128xf32>
    %718 = arith.addf %715, %717 : vector<8x128xf32>
    %719 = vector.extract_strided_slice %718 {offsets = [0, 0], sizes = [8, 96], strides = [1, 1]} : vector<8x128xf32> to vector<8x96xf32>
    %720 = arith.negf %719 : vector<8x96xf32>
    %721 = math.exp %720 : vector<8x96xf32>
    %cst_246 = arith.constant 1.000000e+00 : f32
    %722 = vector.broadcast %cst_246 : f32 to vector<8x96xf32>
    %723 = arith.addf %722, %721 : vector<8x96xf32>
    %724 = arith.divf %722, %723 : vector<8x96xf32>
    %725 = vector.extract_strided_slice %718 {offsets = [0, 96], sizes = [8, 32], strides = [1, 1]} : vector<8x128xf32> to vector<8x32xf32>
    %726 = math.tanh %725 : vector<8x32xf32>
    %727 = vector.extract_strided_slice %724 {offsets = [0, 32], sizes = [8, 32], strides = [1, 1]} : vector<8x96xf32> to vector<8x32xf32>
    %728 = arith.mulf %727, %705 : vector<8x32xf32>
    %729 = vector.extract_strided_slice %724 {offsets = [0, 0], sizes = [8, 32], strides = [1, 1]} : vector<8x96xf32> to vector<8x32xf32>
    %730 = arith.mulf %729, %726 : vector<8x32xf32>
    %731 = arith.addf %728, %730 : vector<8x32xf32>
    %732 = vector.extract_strided_slice %724 {offsets = [0, 64], sizes = [8, 32], strides = [1, 1]} : vector<8x96xf32> to vector<8x32xf32>
    %733 = math.tanh %731 : vector<8x32xf32>
    %734 = arith.mulf %732, %733 : vector<8x32xf32>
    %735 = arith.index_cast %c4_i32_242 : i32 to index
    %c0_247 = arith.constant 0 : index
    %c0_248 = arith.constant 0 : index
    %736 = vector.load %arg41[%735, %c0_247, %c0_248] : memref<6x8x32xf32, #tpu.memory_space<vmem>>, vector<1x8x32xf32>
    %737 = vector.shape_cast %736 : vector<1x8x32xf32> to vector<8x32xf32>
    %738 = vector.shape_cast %734 : vector<8x32xf32> to vector<1x8x32xf32>
    tpu.vector_store %arg41[%735, %c0_247, %c0_248], %738 {strides = array<i32>} : memref<6x8x32xf32, #tpu.memory_space<vmem>>, vector<1x8x32xf32>,
    %c5_i32_249 = arith.constant 5 : i32
    %739 = arith.index_cast %c5_i32_249 : i32 to index
    %c0_250 = arith.constant 0 : index
    %c0_251 = arith.constant 0 : index
    %740 = vector.load %arg40[%739, %c0_250, %c0_251] : memref<6x8x128xf32, #tpu.memory_space<vmem>>, vector<1x8x128xf32>
    %741 = vector.shape_cast %740 : vector<1x8x128xf32> to vector<8x128xf32>
    %742 = arith.truncf %734 : vector<8x32xf32> to vector<8x32xbf16>
    %cst_252 = arith.constant dense<0.000000e+00> : vector<8x128xf32>
    %743 = tpu.matmul %742, %607, %cst_252 {dimension_numbers = #tpu.dot_dimension_numbers<[1], [0], [0], [1], [0, 0, 1, 1], [], []>} : vector<8x32xbf16>, vector<32x128xbf16>, vector<8x128xf32> -> vector<8x128xf32>
    %744 = arith.addf %741, %743 : vector<8x128xf32>
    %745 = vector.extract_strided_slice %744 {offsets = [0, 0], sizes = [8, 96], strides = [1, 1]} : vector<8x128xf32> to vector<8x96xf32>
    %746 = arith.negf %745 : vector<8x96xf32>
    %747 = math.exp %746 : vector<8x96xf32>
    %cst_253 = arith.constant 1.000000e+00 : f32
    %748 = vector.broadcast %cst_253 : f32 to vector<8x96xf32>
    %749 = arith.addf %748, %747 : vector<8x96xf32>
    %750 = arith.divf %748, %749 : vector<8x96xf32>
    %751 = vector.extract_strided_slice %744 {offsets = [0, 96], sizes = [8, 32], strides = [1, 1]} : vector<8x128xf32> to vector<8x32xf32>
    %752 = math.tanh %751 : vector<8x32xf32>
    %753 = vector.extract_strided_slice %750 {offsets = [0, 32], sizes = [8, 32], strides = [1, 1]} : vector<8x96xf32> to vector<8x32xf32>
    %754 = arith.mulf %753, %731 : vector<8x32xf32>
    %755 = vector.extract_strided_slice %750 {offsets = [0, 0], sizes = [8, 32], strides = [1, 1]} : vector<8x96xf32> to vector<8x32xf32>
    %756 = arith.mulf %755, %752 : vector<8x32xf32>
    %757 = arith.addf %754, %756 : vector<8x32xf32>
    %758 = vector.extract_strided_slice %750 {offsets = [0, 64], sizes = [8, 32], strides = [1, 1]} : vector<8x96xf32> to vector<8x32xf32>
    %759 = math.tanh %757 : vector<8x32xf32>
    %760 = arith.mulf %758, %759 : vector<8x32xf32>
    %761 = arith.index_cast %c5_i32_249 : i32 to index
    %c0_254 = arith.constant 0 : index
    %c0_255 = arith.constant 0 : index
    %762 = vector.load %arg41[%761, %c0_254, %c0_255] : memref<6x8x32xf32, #tpu.memory_space<vmem>>, vector<1x8x32xf32>
    %763 = vector.shape_cast %762 : vector<1x8x32xf32> to vector<8x32xf32>
    %764 = vector.shape_cast %760 : vector<8x32xf32> to vector<1x8x32xf32>
    tpu.vector_store %arg41[%761, %c0_254, %c0_255], %764 {strides = array<i32>} : memref<6x8x32xf32, #tpu.memory_space<vmem>>, vector<1x8x32xf32>,
    %c6_i32_256 = arith.constant 6 : i32
    %c0_257 = arith.constant 0 : index
    %c0_258 = arith.constant 0 : index
    %c0_259 = arith.constant 0 : index
    %765 = vector.load %arg41[%c0_257, %c0_258, %c0_259] : memref<6x8x32xf32, #tpu.memory_space<vmem>>, vector<6x8x32xf32>
    %766 = vector.shape_cast %765 : vector<6x8x32xf32> to vector<48x32xf32>
    %767 = arith.truncf %766 : vector<48x32xf32> to vector<48x32xbf16>
    %c0_260 = arith.constant 0 : index
    %c0_261 = arith.constant 0 : index
    %768 = vector.load %arg31[%c0_260, %c0_261] : memref<32x256xf32, #tpu.memory_space<vmem>>, vector<32x256xf32>
    %769 = arith.truncf %768 : vector<32x256xf32> to vector<32x256xbf16>
    %cst_262 = arith.constant dense<0.000000e+00> : vector<48x256xf32>
    %770 = tpu.matmul %767, %769, %cst_262 {dimension_numbers = #tpu.dot_dimension_numbers<[1], [0], [0], [1], [0, 0, 1, 1], [], []>} : vector<48x32xbf16>, vector<32x256xbf16>, vector<48x256xf32> -> vector<48x256xf32>
    %c0_263 = arith.constant 0 : index
    %c0_264 = arith.constant 0 : index
    %771 = vector.load %arg32[%c0_263, %c0_264] : memref<1x256xf32, #tpu.memory_space<vmem>>, vector<1x256xf32>
    %772 = vector.broadcast %771 : vector<1x256xf32> to vector<48x256xf32>
    %773 = arith.addf %770, %772 : vector<48x256xf32>
    %774 = vector.shape_cast %773 : vector<48x256xf32> to vector<6x8x256xf32>
    %c0_265 = arith.constant 0 : index
    %c0_266 = arith.constant 0 : index
    %c0_267 = arith.constant 0 : index
    %775 = vector.load %arg33[%c0_265, %c0_266, %c0_267] : memref<6x8x256xf32, #tpu.memory_space<vmem>>, vector<6x8x256xf32>
    tpu.vector_store %arg33[%c0_265, %c0_266, %c0_267], %774 {strides = array<i32>} : memref<6x8x256xf32, #tpu.memory_space<vmem>>, vector<6x8x256xf32>,
    return
  }
  func.func @transform_0(%arg0: i32) -> (i32, i32, i32) {
    %c0_i32 = arith.constant 0 : i32
    %c0_i32_0 = arith.constant 0 : i32
    %c0_i32_1 = arith.constant 0 : i32
    %c0_i32_2 = arith.constant 0 : i32
    return %c0_i32, %c0_i32_0, %c0_i32_1 : i32, i32, i32
  }
  func.func @transform_1(%arg0: i32) -> (i32, i32) {
    %c0_i32 = arith.constant 0 : i32
    %c0_i32_0 = arith.constant 0 : i32
    %c0_i32_1 = arith.constant 0 : i32
    return %c0_i32, %c0_i32_0 : i32, i32
  }
  func.func @transform_2(%arg0: i32) -> (i32, i32) {
    %c0_i32 = arith.constant 0 : i32
    %c0_i32_0 = arith.constant 0 : i32
    %c0_i32_1 = arith.constant 0 : i32
    return %c0_i32, %c0_i32_0 : i32, i32
  }
  func.func @transform_3(%arg0: i32) -> (i32, i32, i32) {
    %c0_i32 = arith.constant 0 : i32
    %c0_i32_0 = arith.constant 0 : i32
    %c0_i32_1 = arith.constant 0 : i32
    %c0_i32_2 = arith.constant 0 : i32
    return %c0_i32, %c0_i32_0, %c0_i32_1 : i32, i32, i32
  }
  func.func @transform_4(%arg0: i32) -> (i32, i32) {
    %c0_i32 = arith.constant 0 : i32
    %c0_i32_0 = arith.constant 0 : i32
    %c0_i32_1 = arith.constant 0 : i32
    return %c0_i32, %c0_i32_0 : i32, i32
  }
  func.func @transform_5(%arg0: i32) -> (i32, i32) {
    %c0_i32 = arith.constant 0 : i32
    %c0_i32_0 = arith.constant 0 : i32
    %c0_i32_1 = arith.constant 0 : i32
    return %c0_i32, %c0_i32_0 : i32, i32
  }
  func.func @transform_6(%arg0: i32) -> (i32, i32) {
    %c0_i32 = arith.constant 0 : i32
    %c0_i32_0 = arith.constant 0 : i32
    %c0_i32_1 = arith.constant 0 : i32
    return %c0_i32, %c0_i32_0 : i32, i32
  }
  func.func @transform_7(%arg0: i32) -> (i32, i32) {
    %c0_i32 = arith.constant 0 : i32
    %c0_i32_0 = arith.constant 0 : i32
    %c0_i32_1 = arith.constant 0 : i32
    return %c0_i32, %c0_i32_0 : i32, i32
  }
  func.func @transform_8(%arg0: i32) -> (i32, i32) {
    %c0_i32 = arith.constant 0 : i32
    %c0_i32_0 = arith.constant 0 : i32
    %c0_i32_1 = arith.constant 0 : i32
    return %c0_i32, %c0_i32_0 : i32, i32
  }
  func.func @transform_9(%arg0: i32) -> (i32, i32) {
    %c0_i32 = arith.constant 0 : i32
    %c0_i32_0 = arith.constant 0 : i32
    %c0_i32_1 = arith.constant 0 : i32
    return %c0_i32, %c0_i32_0 : i32, i32
  }
  func.func @transform_10(%arg0: i32) -> (i32, i32) {
    %c0_i32 = arith.constant 0 : i32
    %c0_i32_0 = arith.constant 0 : i32
    %c0_i32_1 = arith.constant 0 : i32
    return %c0_i32, %c0_i32_0 : i32, i32
  }
  func.func @transform_11(%arg0: i32) -> (i32, i32) {
    %c0_i32 = arith.constant 0 : i32
    %c0_i32_0 = arith.constant 0 : i32
    %c0_i32_1 = arith.constant 0 : i32
    return %c0_i32, %c0_i32_0 : i32, i32
  }
  func.func @transform_12(%arg0: i32) -> (i32, i32) {
    %c0_i32 = arith.constant 0 : i32
    %c0_i32_0 = arith.constant 0 : i32
    %c0_i32_1 = arith.constant 0 : i32
    return %c0_i32, %c0_i32_0 : i32, i32
  }
  func.func @transform_13(%arg0: i32) -> (i32, i32) {
    %c0_i32 = arith.constant 0 : i32
    %c0_i32_0 = arith.constant 0 : i32
    %c0_i32_1 = arith.constant 0 : i32
    return %c0_i32, %c0_i32_0 : i32, i32
  }
  func.func @transform_14(%arg0: i32) -> (i32, i32) {
    %c0_i32 = arith.constant 0 : i32
    %c0_i32_0 = arith.constant 0 : i32
    %c0_i32_1 = arith.constant 0 : i32
    return %c0_i32, %c0_i32_0 : i32, i32
  }
  func.func @transform_15(%arg0: i32) -> (i32, i32) {
    %c0_i32 = arith.constant 0 : i32
    %c0_i32_0 = arith.constant 0 : i32
    %c0_i32_1 = arith.constant 0 : i32
    return %c0_i32, %c0_i32_0 : i32, i32
  }
  func.func @transform_16(%arg0: i32) -> (i32, i32) {
    %c0_i32 = arith.constant 0 : i32
    %c0_i32_0 = arith.constant 0 : i32
    %c0_i32_1 = arith.constant 0 : i32
    return %c0_i32, %c0_i32_0 : i32, i32
  }
  func.func @transform_17(%arg0: i32) -> (i32, i32) {
    %c0_i32 = arith.constant 0 : i32
    %c0_i32_0 = arith.constant 0 : i32
    %c0_i32_1 = arith.constant 0 : i32
    return %c0_i32, %c0_i32_0 : i32, i32
  }
  func.func @transform_18(%arg0: i32) -> (i32, i32) {
    %c0_i32 = arith.constant 0 : i32
    %c0_i32_0 = arith.constant 0 : i32
    %c0_i32_1 = arith.constant 0 : i32
    return %c0_i32, %c0_i32_0 : i32, i32
  }
  func.func @transform_19(%arg0: i32) -> (i32, i32) {
    %c0_i32 = arith.constant 0 : i32
    %c0_i32_0 = arith.constant 0 : i32
    %c0_i32_1 = arith.constant 0 : i32
    return %c0_i32, %c0_i32_0 : i32, i32
  }
  func.func @transform_20(%arg0: i32) -> (i32, i32) {
    %c0_i32 = arith.constant 0 : i32
    %c0_i32_0 = arith.constant 0 : i32
    %c0_i32_1 = arith.constant 0 : i32
    return %c0_i32, %c0_i32_0 : i32, i32
  }
  func.func @transform_21(%arg0: i32) -> (i32, i32) {
    %c0_i32 = arith.constant 0 : i32
    %c0_i32_0 = arith.constant 0 : i32
    %c0_i32_1 = arith.constant 0 : i32
    return %c0_i32, %c0_i32_0 : i32, i32
  }
  func.func @transform_22(%arg0: i32) -> (i32, i32) {
    %c0_i32 = arith.constant 0 : i32
    %c0_i32_0 = arith.constant 0 : i32
    %c0_i32_1 = arith.constant 0 : i32
    return %c0_i32, %c0_i32_0 : i32, i32
  }
  func.func @transform_23(%arg0: i32) -> (i32, i32) {
    %c0_i32 = arith.constant 0 : i32
    %c0_i32_0 = arith.constant 0 : i32
    %c0_i32_1 = arith.constant 0 : i32
    return %c0_i32, %c0_i32_0 : i32, i32
  }
  func.func @transform_24(%arg0: i32) -> (i32, i32) {
    %c0_i32 = arith.constant 0 : i32
    %c0_i32_0 = arith.constant 0 : i32
    %c0_i32_1 = arith.constant 0 : i32
    return %c0_i32, %c0_i32_0 : i32, i32
  }
  func.func @transform_25(%arg0: i32) -> (i32, i32) {
    %c0_i32 = arith.constant 0 : i32
    %c0_i32_0 = arith.constant 0 : i32
    %c0_i32_1 = arith.constant 0 : i32
    return %c0_i32, %c0_i32_0 : i32, i32
  }
  func.func @transform_26(%arg0: i32) -> (i32, i32) {
    %c0_i32 = arith.constant 0 : i32
    %c0_i32_0 = arith.constant 0 : i32
    %c0_i32_1 = arith.constant 0 : i32
    return %c0_i32, %c0_i32_0 : i32, i32
  }
  func.func @transform_27(%arg0: i32) -> (i32, i32) {
    %c0_i32 = arith.constant 0 : i32
    %c0_i32_0 = arith.constant 0 : i32
    %c0_i32_1 = arith.constant 0 : i32
    return %c0_i32, %c0_i32_0 : i32, i32
  }
  func.func @transform_28(%arg0: i32) -> (i32, i32) {
    %c0_i32 = arith.constant 0 : i32
    %c0_i32_0 = arith.constant 0 : i32
    %c0_i32_1 = arith.constant 0 : i32
    return %c0_i32, %c0_i32_0 : i32, i32
  }
  func.func @transform_29(%arg0: i32) -> (i32, i32) {
    %c0_i32 = arith.constant 0 : i32
    %c0_i32_0 = arith.constant 0 : i32
    %c0_i32_1 = arith.constant 0 : i32
    return %c0_i32, %c0_i32_0 : i32, i32
  }
  func.func @transform_30(%arg0: i32) -> (i32, i32) {
    %c0_i32 = arith.constant 0 : i32
    %c0_i32_0 = arith.constant 0 : i32
    %c0_i32_1 = arith.constant 0 : i32
    return %c0_i32, %c0_i32_0 : i32, i32
  }
  func.func @transform_31(%arg0: i32) -> (i32, i32) {
    %c0_i32 = arith.constant 0 : i32
    %c0_i32_0 = arith.constant 0 : i32
    %c0_i32_1 = arith.constant 0 : i32
    return %c0_i32, %c0_i32_0 : i32, i32
  }
  func.func @transform_32(%arg0: i32) -> (i32, i32, i32) {
    %c0_i32 = arith.constant 0 : i32
    %c0_i32_0 = arith.constant 0 : i32
    %c0_i32_1 = arith.constant 0 : i32
    %c0_i32_2 = arith.constant 0 : i32
    return %c0_i32, %c0_i32_0, %c0_i32_1 : i32, i32, i32
  }
}

</mosaic_0001>

<bundles_post_ra>
// kernel: hierarchical_forward.1
= control target key start
LH: loop header
LB: loop body
LE: loop exit
PB: predicated region body
PF: predicated region fallthrough
CT: control target
= control target key end

     0   :  { %s3895_s3 = smov 5   ;;  %s3896_s7 = smov 4   ;;  %vm214_vm0 = vcmask 1043456   ;;  %vm177_vm1 = vcmask 64512   ;;  %v3898_v9 = vmov 0   ;;  %vm287_vm2 = vcmask 523264   ;;  %s4727_s0 = inlined_call_operand.smem [shape: u32[33], index: -1, kind: input, shape index: {}] }
   0x1   :  { %s3347_s6 = sld [smem:[%s4727_s0 + %s3895_s3]]   ;;  %s3897_s14 = smov 6   ;;  %vm318_vm15 = vcmask 130048  }
   0x2   :  { %s3346_s10 = sld [smem:[%s4727_s0 + %s3896_s7]]   ;;  %s3899_s18 = smov 80  }
   0x3   :  { %s3944_s13 = sld [smem:[%s4727_s0]]   ;;  %s3900_s19 = smov 16  }
   0x4   :  { %s3949_s17 = sld [smem:[%s4727_s0 + %s3897_s14]]   ;;  %s3901_s20 = smov 96  }
   0x5   :  { %s3902_s21 = smov 7   ;;  %s3903_s25 = smov 9  }
   0x6   :  { %s3349_s24 = sld [smem:[%s4727_s0 + %s3902_s21]]   ;;  %s3904_s29 = smov 32  }
   0x7   :  { %v312_v0 = vld [vmem:[%s3347_s6] sm:$0xff]  ;;  %v313_v1 = vld [vmem:[%s3347_s6 + $0x8] sm:$0xff]  ;;  %s3350_s28 = sld [smem:[%s4727_s0 + %s3903_s25]]   ;;  %s3905_s30 = smov 10  }
   0x8   :  { %v3951_v2 = vpack.c.bf16 %v313_v1, %v312_v0  ;;  %v171_v3 = vld [vmem:[%s3346_s10] sm:$0xff]  ;;  %s4290_s3 = sld [smem:[%s4727_s0 + %s3905_s30]]   ;;  %s3906_s4 = smov 1  }
   0x9   :  { %v172_v4 = vpack.c.bf16 %v171_v3, %v171_v3  ;;  %v135_v5 = vld [vmem:[%s3944_s13] sm:$0xff]  ;;  %v136_v6 = vld [vmem:[%s3944_s13 + $0x8] sm:$0xff]  ;;  %v137_v10 = vld [vmem:[%s3944_s13 + $0x10] sm:$0xff]  ;;  %s4310_s7 = sld [smem:[%s4727_s0 + %s3906_s4]]   ;;  %s3907_s8 = smov 13  }
   0xa   :  { %329 = vmatpush.bf16.msra.mxu3 %v3951_v2  ;;  %779 = vmatpush.bf16.msra.mxu1 %v3951_v2  ;;  %v159_v8 = vpack.c.bf16 %v136_v6, %v135_v5  ;;  %v138_v11 = vld [vmem:[%s3944_s13 + $0x18] sm:$0xff]  ;;  %v3969_v13 = vld [vmem:[%s3949_s17] ss:$0 sm:$0xff]  ;;  %s3354_s11 = sld [smem:[%s4727_s0 + %s3907_s8]]   ;;  %s3908_s12 = smov 11  }
   0xb   :  { %v216_v7 = vsel %vm214_vm0, %v172_v4, 0  ;;  %v160_v12 = vpack.c.bf16 %v138_v11, %v137_v10  ;;  %s4328_s15 = sld [smem:[%s4727_s0 + %s3908_s12]]   ;;  %s3909_s16 = smov 12  }
   0xc   :  { %225 = vmatpush.bf16.msra.mxu0 %v216_v7  ;;  %3490 = vmatpush.bf16.msra.mxu2 %v216_v7  ;;  %s3353_s21 = sld [smem:[%s4727_s0 + %s3909_s16]]   ;;  %s3910_s22 = smov 14  }
   0xd   :  { %330 = vmatmul.bf16.vlgmr.msra.gmra.mxu3 %v3898_v9  ;;  %s3355_s25 = sld [smem:[%s4727_s0 + %s3910_s22]]   ;;  %s3911_s26 = smov 15  }
   0xe   :  { %629 = vmatpush.bf16.msrb.mxu3 %v3951_v2  ;;  %1229 = vmatpush.bf16.msrb.mxu1 %v3951_v2  ;;  %s4356_s30 = sld [smem:[%s4727_s0 + %s3911_s26]]   ;;  %s3912_s4 = smov 17  }
   0xf   :  { %3374 = vmatmul.msk.bf16.vlgmr.msra.gmra.mxu0 %vm177_vm1, %v159_v8  ;;  %s3914_s10 = smov 64  }
  0x10   :  { %479 = vmatpush.bf16.msrb.mxu2 %v3951_v2 }
  0x12   :  { %1079 = vmatpush.bf16.msra.mxu3 %v3951_v2 }
  0x1d   :  { %335 = vmatmul.bf16.gmra.mxu3 %v3898_v9 }
  0x1f   :  { %3375 = vmatmul.msk.bf16.gmra.mxu0 %vm177_vm1, %v160_v12 }
  0x8c   :  { %v227_v14 = vpop.f32.mrf.mxu0 }
  0x8d   :  { %v228_v15 = vadd.f32 %v3969_v13, %v227_v14 }
  0x8f   :  { %288 = vst.msk [vmem:[#allocation2] sm:$0xff] %vm287_vm2, %v228_v15 }
  0x90   :  { %v331_v16 = vpop.f32.mrf.mxu3 }
  0x94   :  { %v229_v17 = vpop.f32.mrf.mxu0 }
  0x95   :  { %v230_v18 = vadd.f32 %v3969_v13, %v229_v17 }
  0x96   :  { %v315_v19 = vld [vmem:[#allocation2] sm:$0xff] }
  0x97   :  { %v340_v20 = vadd.f32 %v331_v16, %v315_v19  ;;  %289 = vst.msk [vmem:[#allocation2 + $0x8] sm:$0xff] %vm287_vm2, %v230_v18 }
  0x98   :  { %v333_v22 = vpop.f32.mrf.mxu3 }
  0x99   :  { %3534 = vtanh.f32 %v340_v20  ;;  %v3386_v26 = vmul.f32 -1.442695, %v340_v20 }
  0x9c   :  { %v232_v31 = vpop.f32.mrf.mxu0 }
  0x9d   :  { %v233_v32 = vadd.f32 %v3969_v13, %v232_v31 }
  0x9e   :  { %v316_v21 = vld [vmem:[#allocation2 + $0x8] sm:$0xff] }
  0x9f   :  { %v3535_v23 = vpop.eup %3534  ;;  %v341_v24 = vadd.f32 %v333_v22, %v316_v21  ;;  %290 = vst.msk [vmem:[#allocation2 + $0x10] sm:$0xff] %vm287_vm2, %v233_v32 }
  0xa0   :  { %409 = vrot.lane.b32.xlu0 %v3535_v23, %s3899_s18  ;;  %v336_v35 = vpop.f32.mrf.mxu3 }
  0xa1   :  { %3536 = vtanh.f32 %v341_v24  ;;  %v3387_v27 = vmul.f32 -1.442695, %v341_v24 }
  0xa2   :  { %3538 = vpow2.f32 %v3386_v26 }
  0xa3   :  { %3540 = vpow2.f32 %v3387_v27  ;;  %v157_v27 = vld [vmem:[%s3944_s13 + $0xb0] sm:$0xff] }
  0xa4   :  { %v234_v3 = vpop.f32.mrf.mxu0 }
  0xa5   :  { %v235_v4 = vadd.f32 %v3969_v13, %v234_v3 }
  0xa6   :  { %v317_v55 = vld [vmem:[#allocation2 + $0x10] sm:$0xff] }
  0xa7   :  { %v3537_v25 = vpop.eup %3536  ;;  %v342_v58 = vadd.f32 %v336_v35, %v317_v55  ;;  %291 = vst.msk [vmem:[#allocation2 + $0x18] sm:$0xff] %vm287_vm2, %v235_v4 }
  0xa8   :  { %411 = vrot.lane.b32.xlu0 %v3537_v25, %s3899_s18  ;;  %v3539_v28 = vpop.eup %3538  ;;  %v338_v39 = vpop.f32.mrf.mxu3 }
  0xa9   :  { %v352_v29 = vadd.f32 1.0, %v3539_v28  ;;  %v3541_v30 = vpop.eup %3540  ;;  %v3388_v63 = vmul.f32 -1.442695, %v342_v58  ;;  %v158_v28 = vld [vmem:[%s3944_s13 + $0xb8] sm:$0xff]  ;;  %v139_v39 = vld [vmem:[%s3944_s13 + $0x20] sm:$0xff] }
  0xaa   :  { %v353_v33 = vadd.f32 1.0, %v3541_v30 }
  0xab   :  { %3542 = vrcp.f32 %v352_v29  ;;  %v366_v44 = vand.u32 2147483648, %v352_v29  ;;  %vm360_vm4 = vweird.f32 %v352_v29  ;;  %v364_v45 = vand.u32 2147483647, %v352_v29 }
  0xac   :  { %3544 = vrcp.f32 %v353_v33  ;;  %v381_v53 = vand.u32 2147483648, %v353_v33  ;;  %vm375_vm8 = vweird.f32 %v353_v33  ;;  %v379_v54 = vand.u32 2147483647, %v353_v33 }
  0xad   :  { %v367_v48 = vor.u32 1.1754944e-38, %v366_v44  ;;  %vm365_vm6 = vcmp.eq.f32.partialorder %v364_v45, 8.507059e+37  ;;  %3546 = vtanh.f32 %v342_v58 }
  0xae   :  { %v382_v57 = vor.u32 1.1754944e-38, %v381_v53  ;;  %vm380_vm10 = vcmp.eq.f32.partialorder %v379_v54, 8.507059e+37  ;;  %3548 = vpow2.f32 %v3388_v63  ;;  %v455_v53 = vld [vmem:[#allocation2 + $0x18] sm:$0xff] }
  0xb1   :  { %v3543_v34 = vpop.eup %3542 }
  0xb2   :  { %v356_v36 = vmul.f32 %v3543_v34, %v352_v29  ;;  %v3545_v38 = vpop.eup %3544  ;;  %vm361_vm3 = vweird.f32 %v3543_v34  ;;  %v170_v29 = vpack.c.bf16 %v158_v28, %v157_v27 }
  0xb3   :  { %v371_v41 = vmul.f32 %v3545_v38, %v353_v33  ;;  %vm362_vm5 = vmor %vm360_vm4, %vm361_vm3  ;;  %vm376_vm7 = vweird.f32 %v3545_v38  ;;  %v3547_v62 = vpop.eup %3546 }
  0xb4   :  { %v357_v37 = vsub.f32 1.0, %v356_v36  ;;  %vm377_vm9 = vmor %vm375_vm8, %vm376_vm7  ;;  %v3549_v0 = vpop.eup %3548  ;;  %3385 = vmatmul.msk.bf16.vlgmr.msra.gmra.mxu2 %vm177_vm1, %v170_v29 }
  0xb5   :  { %v372_v43 = vsub.f32 1.0, %v371_v41  ;;  %v354_v1 = vadd.f32 1.0, %v3549_v0  ;;  %929 = vmatpush.bf16.msra.mxu2 %v3951_v2 }
  0xb6   :  { %v358_v40 = vmul.f32 %v3543_v34, %v357_v37 }
  0xb7   :  { %v373_v47 = vmul.f32 %v3545_v38, %v372_v43  ;;  %3550 = vrcp.f32 %v354_v1  ;;  %vm390_vm11 = vweird.f32 %v354_v1  ;;  %v396_v18 = vand.u32 2147483648, %v354_v1 }
  0xb8   :  { %v359_v42 = vadd.f32 %v3543_v34, %v358_v40  ;;  %v394_v20 = vand.u32 2147483647, %v354_v1  ;;  %v140_v40 = vld [vmem:[%s3944_s13 + $0x28] sm:$0xff] }
  0xb9   :  { %v374_v52 = vadd.f32 %v3545_v38, %v373_v47  ;;  %v397_v21 = vor.u32 1.1754944e-38, %v396_v18  ;;  %v161_v41 = vpack.c.bf16 %v140_v40, %v139_v39 }
  0xba   :  { %v363_v46 = vsel %vm362_vm5, %v3543_v34, %v359_v42  ;;  %vm395_vm14 = vcmp.eq.f32.partialorder %v394_v20, 8.507059e+37 }
  0xbb   :  { %v3979_v50 = vsel %vm365_vm6, %v367_v48, %v363_v46  ;;  %v378_v56 = vsel %vm377_vm9, %v3545_v38, %v374_v52  ;;  %3376 = vmatmul.msk.bf16.gmra.mxu0 %vm177_vm1, %v161_v41 }
  0xbc   :  { %v383_v59 = vsel %vm380_vm10, %v382_v57, %v378_v56  ;;  %v403_v6 = vmul.f32 0.0, %v3979_v50 }
  0xbd   :  { %v3551_v5 = vpop.eup %3550  ;;  %v404_v12 = vmul.f32 0.0, %v383_v59 }
  0xbe   :  { %v386_v8 = vmul.f32 %v3551_v5, %v354_v1  ;;  %vm391_vm12 = vweird.f32 %v3551_v5 }
  0xbf   :  { %vm392_vm13 = vmor %vm390_vm11, %vm391_vm12 }
  0xc0   :  { %v387_v11 = vsub.f32 1.0, %v386_v8 }
  0xc2   :  { %v388_v15 = vmul.f32 %v3551_v5, %v387_v11 }
  0xc4   :  { %v389_v19 = vadd.f32 %v3551_v5, %v388_v15 }
  0xc6   :  { %v393_v22 = vsel %vm392_vm13, %v3551_v5, %v389_v19 }
  0xc7   :  { %v398_v24 = vsel %vm395_vm14, %v397_v21, %v393_v22 }
  0xc8   :  { %v405_v35 = vmul.f32 0.0, %v398_v24 }
 0x112   :  { %v410_v49 = vpop.permute.xlu0 %409 }
 0x113   :  { %v418_v51 = vmul.f32 %v410_v49, %v3979_v50 }
 0x115   :  { %424 = vrot.lane.b32.xlu1 %v418_v51, %s3900_s19 }
 0x11a   :  { %v412_v60 = vpop.permute.xlu0 %411 }
 0x11b   :  { %v419_v61 = vmul.f32 %v412_v60, %v383_v59 }
 0x11d   :  { %426 = vrot.lane.b32.xlu1 %v419_v61, %s3900_s19 }
 0x125   :  { %413 = vrot.lane.b32.xlu1 %v3547_v62, %s3899_s18 }
 0x137   :  { %v282_v43 = vpop.f32.mrf.mxu2 }
 0x138   :  { %v283_v44 = vadd.f32 %v3969_v13, %v282_v43 }
 0x13a   :  { %310 = vst.msk [vmem:[#allocation2 + $0xb0] sm:$0xff] %vm287_vm2, %v283_v44 }
 0x13f   :  { %v284_v45 = vpop.f32.mrf.mxu2 }
 0x140   :  { %v285_v46 = vadd.f32 %v3969_v13, %v284_v45 }
 0x142   :  { %311 = vst.msk [vmem:[#allocation2 + $0xb8] sm:$0xff] %vm287_vm2, %v285_v46 }
 0x187   :  { %v425_v7 = vpop.permute.xlu1 %424 }
 0x188   :  { %v3988_v10 = vadd.f32 %v425_v7, %v403_v6 }
 0x18a   :  { %3552 = vtanh.f32 %v3988_v10 }
 0x18f   :  { %v427_v14 = vpop.permute.xlu1 %426 }
 0x190   :  { %v3553_v16 = vpop.eup %3552  ;;  %v3991_v17 = vadd.f32 %v427_v14, %v404_v12 }
 0x191   :  { %442 = vrot.lane.b32.xlu2 %v3553_v16, %s3900_s19 }
 0x192   :  { %3554 = vtanh.f32 %v3991_v17 }
 0x197   :  { %v414_v25 = vpop.permute.xlu1 %413 }
 0x198   :  { %v3555_v23 = vpop.eup %3554  ;;  %v420_v26 = vmul.f32 %v414_v25, %v398_v24 }
 0x199   :  { %444 = vrot.lane.b32.xlu2 %v3555_v23, %s3900_s19 }
 0x1a1   :  { %428 = vrot.lane.b32.xlu2 %v420_v26, %s3900_s19 }
 0x1eb   :  { %v443_v30 = vpop.permute.xlu2 %442 }
 0x1ec   :  { %v451_v32 = vmul.f32 %v443_v30, %v3979_v50  ;;  %v237_v50 = vpop.f32.mrf.mxu0 }
 0x1ed   :  { %v238_v51 = vadd.f32 %v3969_v13, %v237_v50 }
 0x1ef   :  { %292 = vst.msk [vmem:[#allocation2 + $0x20] sm:$0xff] %vm287_vm2, %v238_v51 }
 0x1f3   :  { %v445_v31 = vpop.permute.xlu2 %444 }
 0x1f4   :  { %v452_v33 = vmul.f32 %v445_v31, %v383_v59  ;;  %v239_v52 = vpop.f32.mrf.mxu0 }
 0x1f6   :  { %v458_v34 = vpack.c.bf16 %v452_v33, %v451_v32  ;;  %v456_v57 = vld [vmem:[#allocation2 + $0x20] sm:$0xff] }
 0x1f8   :  { %462 = vrot.lane.b32.xlu0 %v458_v34, %s3901_s20 }
 0x1fb   :  { %v429_v36 = vpop.permute.xlu2 %428 }
 0x1fc   :  { %v4003_v37 = vadd.f32 %v429_v36, %v405_v35 }
 0x1fe   :  { %3556 = vtanh.f32 %v4003_v37 }
 0x204   :  { %v3557_v38 = vpop.eup %3556 }
 0x205   :  { %446 = vrot.lane.b32.xlu0 %v3557_v38, %s3900_s19 }
 0x26a   :  { %v463_v42 = vpop.permute.xlu0 %462 }
 0x26b   :  { %3389 = vmatmul.msk.bf16.vlgmr.msrb.gmra.mxu2 %vm318_vm15, %v463_v42 }
 0x26c   :  { %1379 = vmatpush.bf16.msrb.mxu2 %v3951_v2  ;;  %v240_v2 = vadd.f32 %v3969_v13, %v239_v52 }
 0x26e   :  { %293 = vst.msk [vmem:[#allocation2 + $0x28] sm:$0xff] %vm287_vm2, %v240_v2 }
 0x275   :  { %v457_v43 = vld [vmem:[#allocation2 + $0x28] sm:$0xff] }
 0x277   :  { %v447_v47 = vpop.permute.xlu0 %446 }
 0x278   :  { %v453_v48 = vmul.f32 %v447_v47, %v398_v24 }
 0x27a   :  { %v459_v49 = vpack.c.bf16 %v453_v48, %v453_v48 }
 0x27c   :  { %464 = vrot.lane.b32.xlu0 %v459_v49, %s3901_s20  ;;  %v142_v49 = vld [vmem:[%s3944_s13 + $0x38] sm:$0xff] }
 0x2ee   :  { %v481_v54 = vpop.f32.mrf.mxu2  ;;  %v465_v55 = vpop.permute.xlu0 %464 }
 0x2ef   :  { %v490_v56 = vadd.f32 %v481_v54, %v455_v53  ;;  %3390 = vmatmul.msk.bf16.gmra.mxu2 %vm318_vm15, %v465_v55 }
 0x2f1   :  { %3558 = vtanh.f32 %v490_v56  ;;  %v3391_v1 = vmul.f32 -1.442695, %v490_v56 }
 0x2f6   :  { %v483_v58 = vpop.f32.mrf.mxu2 }
 0x2f7   :  { %v3559_v59 = vpop.eup %3558  ;;  %v491_v60 = vadd.f32 %v483_v58, %v456_v57 }
 0x2f8   :  { %559 = vrot.lane.b32.xlu1 %v3559_v59, %s3899_s18 }
 0x2f9   :  { %3560 = vtanh.f32 %v491_v60  ;;  %v3392_v62 = vmul.f32 -1.442695, %v491_v60 }
 0x2fb   :  { %3562 = vpow2.f32 %v3392_v62 }
 0x2ff   :  { %v3561_v61 = vpop.eup %3560 }
 0x300   :  { %561 = vrot.lane.b32.xlu2 %v3561_v61, %s3899_s18 }
 0x301   :  { %v3563_v63 = vpop.eup %3562 }
 0x302   :  { %v503_v0 = vadd.f32 1.0, %v3563_v63 }
 0x304   :  { %3564 = vrcp.f32 %v503_v0  ;;  %v531_v14 = vand.u32 2147483648, %v503_v0  ;;  %vm525_vm4 = vweird.f32 %v503_v0  ;;  %v529_v15 = vand.u32 2147483647, %v503_v0 }
 0x305   :  { %3566 = vpow2.f32 %v3391_v1 }
 0x306   :  { %v532_v19 = vor.u32 1.1754944e-38, %v531_v14  ;;  %vm530_vm6 = vcmp.eq.f32.partialorder %v529_v15, 8.507059e+37 }
 0x30a   :  { %v3565_v3 = vpop.eup %3564 }
 0x30b   :  { %v3567_v4 = vpop.eup %3566  ;;  %v521_v5 = vmul.f32 %v3565_v3, %v503_v0  ;;  %vm526_vm3 = vweird.f32 %v3565_v3 }
 0x30c   :  { %v502_v6 = vadd.f32 1.0, %v3567_v4  ;;  %vm527_vm5 = vmor %vm525_vm4, %vm526_vm3 }
 0x30d   :  { %v522_v7 = vsub.f32 1.0, %v521_v5 }
 0x30e   :  { %3568 = vrcp.f32 %v502_v6  ;;  %v516_v26 = vand.u32 2147483648, %v502_v6  ;;  %vm510_vm8 = vweird.f32 %v502_v6  ;;  %v514_v27 = vand.u32 2147483647, %v502_v6 }
 0x30f   :  { %v523_v8 = vmul.f32 %v3565_v3, %v522_v7 }
 0x310   :  { %v517_v29 = vor.u32 1.1754944e-38, %v516_v26  ;;  %vm515_vm10 = vcmp.eq.f32.partialorder %v514_v27, 8.507059e+37 }
 0x311   :  { %v524_v11 = vadd.f32 %v3565_v3, %v523_v8 }
 0x313   :  { %v528_v16 = vsel %vm527_vm5, %v3565_v3, %v524_v11 }
 0x314   :  { %v3569_v12 = vpop.eup %3568  ;;  %v533_v20 = vsel %vm530_vm6, %v532_v19, %v528_v16 }
 0x315   :  { %v506_v18 = vmul.f32 %v3569_v12, %v502_v6  ;;  %vm511_vm7 = vweird.f32 %v3569_v12  ;;  %v554_v35 = vmul.f32 %v533_v20, %v3991_v17 }
 0x316   :  { %vm512_vm9 = vmor %vm510_vm8, %vm511_vm7 }
 0x317   :  { %v507_v23 = vsub.f32 1.0, %v506_v18 }
 0x319   :  { %v508_v24 = vmul.f32 %v3569_v12, %v507_v23 }
 0x31b   :  { %v509_v25 = vadd.f32 %v3569_v12, %v508_v24 }
 0x31d   :  { %v513_v28 = vsel %vm512_vm9, %v3569_v12, %v509_v25 }
 0x31e   :  { %v518_v31 = vsel %vm515_vm10, %v517_v29, %v513_v28 }
 0x31f   :  { %v553_v40 = vmul.f32 %v518_v31, %v3988_v10  ;;  %v141_v10 = vld [vmem:[%s3944_s13 + $0x30] sm:$0xff] }
 0x320   :  { %v162_v50 = vpack.c.bf16 %v142_v49, %v141_v10 }
 0x322   :  { %3377 = vmatmul.msk.bf16.gmra.mxu0 %vm177_vm1, %v162_v50 }
 0x35a   :  { %v562_v21 = vpop.permute.xlu2 %561 }
 0x35b   :  { %v569_v22 = vmul.f32 %v562_v21, %v533_v20 }
 0x35d   :  { %576 = vrot.lane.b32.xlu2 %v569_v22, %s3900_s19 }
 0x36a   :  { %v560_v30 = vpop.permute.xlu1 %559 }
 0x36b   :  { %v568_v32 = vmul.f32 %v560_v30, %v518_v31 }
 0x36d   :  { %574 = vrot.lane.b32.xlu1 %v568_v32, %s3900_s19  ;;  %v144_v32 = vld [vmem:[%s3944_s13 + $0x48] sm:$0xff] }
 0x372   :  { %v486_v33 = vpop.f32.mrf.mxu2 }
 0x373   :  { %v492_v44 = vadd.f32 %v486_v33, %v457_v43 }
 0x375   :  { %v3393_v46 = vmul.f32 -1.442695, %v492_v44 }
 0x37a   :  { %v488_v34 = vpop.f32.mrf.mxu2 }
 0x39f   :  { %v242_v5 = vpop.f32.mrf.mxu0 }
 0x3a0   :  { %v243_v6 = vadd.f32 %v3969_v13, %v242_v5 }
 0x3a2   :  { %294 = vst.msk [vmem:[#allocation2 + $0x30] sm:$0xff] %vm287_vm2, %v243_v6 }
 0x3a7   :  { %v244_v7 = vpop.f32.mrf.mxu0 }
 0x3a8   :  { %v245_v8 = vadd.f32 %v3969_v13, %v244_v7 }
 0x3a9   :  { %v605_v18 = vld [vmem:[#allocation2 + $0x30] sm:$0xff] }
 0x3aa   :  { %295 = vst.msk [vmem:[#allocation2 + $0x38] sm:$0xff] %vm287_vm2, %v245_v8 }
 0x3b7   :  { %v577_v36 = vpop.permute.xlu2 %576 }
 0x3b8   :  { %v4027_v38 = vadd.f32 %v577_v36, %v554_v35 }
 0x3ba   :  { %3570 = vtanh.f32 %v4027_v38 }
 0x3c0   :  { %v3571_v39 = vpop.eup %3570 }
 0x3c1   :  { %594 = vrot.lane.b32.xlu1 %v3571_v39, %s3900_s19 }
 0x3df   :  { %v575_v41 = vpop.permute.xlu1 %574 }
 0x3e0   :  { %v4032_v42 = vadd.f32 %v575_v41, %v553_v40 }
 0x3e2   :  { %3572 = vtanh.f32 %v4032_v42 }
 0x3e3   :  { %3574 = vtanh.f32 %v492_v44 }
 0x3e4   :  { %3576 = vpow2.f32 %v3393_v46 }
 0x3e8   :  { %v3573_v17 = vpop.eup %3572 }
 0x3e9   :  { %592 = vrot.lane.b32.xlu0 %v3573_v17, %s3900_s19  ;;  %v3575_v45 = vpop.eup %3574 }
 0x3ea   :  { %v3577_v47 = vpop.eup %3576 }
 0x3eb   :  { %v504_v48 = vadd.f32 1.0, %v3577_v47 }
 0x3ed   :  { %3578 = vrcp.f32 %v504_v48  ;;  %v546_v59 = vand.u32 2147483648, %v504_v48  ;;  %vm540_vm12 = vweird.f32 %v504_v48  ;;  %v544_v61 = vand.u32 2147483647, %v504_v48 }
 0x3ef   :  { %v547_v63 = vor.u32 1.1754944e-38, %v546_v59  ;;  %vm545_vm14 = vcmp.eq.f32.partialorder %v544_v61, 8.507059e+37 }
 0x3f1   :  { %563 = vrot.lane.b32.xlu0 %v3575_v45, %s3899_s18 }
 0x3f3   :  { %v3579_v51 = vpop.eup %3578 }
 0x3f4   :  { %v536_v52 = vmul.f32 %v3579_v51, %v504_v48  ;;  %vm541_vm11 = vweird.f32 %v3579_v51 }
 0x3f5   :  { %vm542_vm13 = vmor %vm540_vm12, %vm541_vm11 }
 0x3f6   :  { %v537_v2 = vsub.f32 1.0, %v536_v52 }
 0x3f8   :  { %v538_v53 = vmul.f32 %v3579_v51, %v537_v2 }
 0x3fa   :  { %v539_v58 = vadd.f32 %v3579_v51, %v538_v53 }
 0x3fc   :  { %v543_v62 = vsel %vm542_vm13, %v3579_v51, %v539_v58 }
 0x3fd   :  { %v548_v0 = vsel %vm545_vm14, %v547_v63, %v543_v62 }
 0x3fe   :  { %v555_v11 = vmul.f32 %v548_v0, %v4003_v37  ;;  %v606_v37 = vld [vmem:[#allocation2 + $0x38] sm:$0xff] }
 0x433   :  { %v595_v54 = vpop.permute.xlu1 %594 }
 0x434   :  { %v602_v56 = vmul.f32 %v595_v54, %v533_v20 }
 0x45b   :  { %v593_v55 = vpop.permute.xlu0 %592 }
 0x45c   :  { %v601_v57 = vmul.f32 %v593_v55, %v518_v31  ;;  %v143_v31 = vld [vmem:[%s3944_s13 + $0x40] sm:$0xff] }
 0x45d   :  { %v163_v33 = vpack.c.bf16 %v144_v32, %v143_v31 }
 0x45e   :  { %v608_v60 = vpack.c.bf16 %v602_v56, %v601_v57 }
 0x45f   :  { %3378 = vmatmul.msk.bf16.gmra.mxu0 %vm177_vm1, %v163_v33 }
 0x460   :  { %612 = vrot.lane.b32.xlu2 %v608_v60, %s3901_s20 }
 0x463   :  { %v564_v1 = vpop.permute.xlu0 %563 }
 0x464   :  { %v570_v3 = vmul.f32 %v564_v1, %v548_v0 }
 0x466   :  { %578 = vrot.lane.b32.xlu1 %v570_v3, %s3900_s19 }
 0x4ba   :  { %v613_v4 = vpop.permute.xlu2 %612 }
 0x4bb   :  { %3394 = vmatmul.msk.bf16.vlgmr.msrb.gmra.mxu3 %vm318_vm15, %v613_v4 }
 0x4d8   :  { %v579_v12 = vpop.permute.xlu1 %578 }
 0x4d9   :  { %v4048_v14 = vadd.f32 %v579_v12, %v555_v11 }
 0x4db   :  { %3580 = vtanh.f32 %v4048_v14 }
 0x4dc   :  { %v247_v61 = vpop.f32.mrf.mxu0 }
 0x4dd   :  { %v248_v62 = vadd.f32 %v3969_v13, %v247_v61 }
 0x4df   :  { %296 = vst.msk [vmem:[#allocation2 + $0x40] sm:$0xff] %vm287_vm2, %v248_v62 }
 0x4e1   :  { %v3581_v15 = vpop.eup %3580 }
 0x4e2   :  { %596 = vrot.lane.b32.xlu2 %v3581_v15, %s3900_s19 }
 0x4e4   :  { %v249_v3 = vpop.f32.mrf.mxu0 }
 0x4e5   :  { %v250_v4 = vadd.f32 %v3969_v13, %v249_v3 }
 0x4e7   :  { %297 = vst.msk [vmem:[#allocation2 + $0x48] sm:$0xff] %vm287_vm2, %v250_v4 }
 0x53c   :  { %v597_v16 = vpop.permute.xlu2 %596 }
 0x53d   :  { %v603_v19 = vmul.f32 %v597_v16, %v548_v0 }
 0x53e   :  { %v631_v20 = vpop.f32.mrf.mxu3 }
 0x53f   :  { %v609_v21 = vpack.c.bf16 %v603_v19, %v603_v19  ;;  %v640_v22 = vadd.f32 %v631_v20, %v605_v18 }
 0x541   :  { %3582 = vtanh.f32 %v640_v22  ;;  %614 = vrot.lane.b32.xlu0 %v609_v21, %s3901_s20  ;;  %v3396_v30 = vmul.f32 -1.442695, %v640_v22  ;;  %v145_v21 = vld [vmem:[%s3944_s13 + $0x50] sm:$0xff]  ;;  %v146_v22 = vld [vmem:[%s3944_s13 + $0x58] sm:$0xff] }
 0x546   :  { %v633_v23 = vpop.f32.mrf.mxu3 }
 0x547   :  { %v3583_v24 = vpop.eup %3582  ;;  %v641_v25 = vadd.f32 %v633_v23, %v606_v37  ;;  %v164_v37 = vpack.c.bf16 %v146_v22, %v145_v21 }
 0x548   :  { %709 = vrot.lane.b32.xlu1 %v3583_v24, %s3899_s18 }
 0x549   :  { %3584 = vtanh.f32 %v641_v25  ;;  %v3397_v27 = vmul.f32 -1.442695, %v641_v25  ;;  %3379 = vmatmul.msk.bf16.gmra.mxu0 %vm177_vm1, %v164_v37 }
 0x54b   :  { %3586 = vpow2.f32 %v3397_v27 }
 0x54f   :  { %v3585_v26 = vpop.eup %3584 }
 0x550   :  { %711 = vrot.lane.b32.xlu2 %v3585_v26, %s3899_s18 }
 0x551   :  { %v3587_v28 = vpop.eup %3586 }
 0x552   :  { %v653_v29 = vadd.f32 1.0, %v3587_v28 }
 0x554   :  { %3588 = vrcp.f32 %v653_v29  ;;  %v681_v17 = vand.u32 2147483648, %v653_v29  ;;  %vm675_vm4 = vweird.f32 %v653_v29  ;;  %v679_v45 = vand.u32 2147483647, %v653_v29 }
 0x555   :  { %3590 = vpow2.f32 %v3396_v30 }
 0x556   :  { %v682_v48 = vor.u32 1.1754944e-38, %v681_v17  ;;  %vm680_vm6 = vcmp.eq.f32.partialorder %v679_v45, 8.507059e+37 }
 0x55a   :  { %v3589_v34 = vpop.eup %3588 }
 0x55b   :  { %v3591_v35 = vpop.eup %3590  ;;  %v671_v36 = vmul.f32 %v3589_v34, %v653_v29  ;;  %vm676_vm3 = vweird.f32 %v3589_v34 }
 0x55c   :  { %v652_v39 = vadd.f32 1.0, %v3591_v35  ;;  %vm677_vm5 = vmor %vm675_vm4, %vm676_vm3 }
 0x55d   :  { %v672_v40 = vsub.f32 1.0, %v671_v36 }
 0x55e   :  { %3592 = vrcp.f32 %v652_v39  ;;  %v666_v54 = vand.u32 2147483648, %v652_v39  ;;  %vm660_vm8 = vweird.f32 %v652_v39  ;;  %v664_v55 = vand.u32 2147483647, %v652_v39 }
 0x55f   :  { %v673_v41 = vmul.f32 %v3589_v34, %v672_v40 }
 0x560   :  { %v667_v57 = vor.u32 1.1754944e-38, %v666_v54  ;;  %vm665_vm10 = vcmp.eq.f32.partialorder %v664_v55, 8.507059e+37 }
 0x561   :  { %v674_v43 = vadd.f32 %v3589_v34, %v673_v41 }
 0x563   :  { %v678_v46 = vsel %vm677_vm5, %v3589_v34, %v674_v43 }
 0x564   :  { %v3593_v44 = vpop.eup %3592  ;;  %v4058_v10 = vsel %vm680_vm6, %v682_v48, %v678_v46 }
 0x565   :  { %v656_v47 = vmul.f32 %v3593_v44, %v652_v39  ;;  %vm661_vm7 = vweird.f32 %v3593_v44  ;;  %v704_v63 = vmul.f32 %v4058_v10, %v4027_v38  ;;  %v607_v38 = vld [vmem:[#allocation2 + $0x40] sm:$0xff] }
 0x566   :  { %vm662_vm9 = vmor %vm660_vm8, %vm661_vm7 }
 0x567   :  { %v657_v51 = vsub.f32 1.0, %v656_v47 }
 0x569   :  { %v658_v52 = vmul.f32 %v3593_v44, %v657_v51 }
 0x56b   :  { %v659_v53 = vadd.f32 %v3593_v44, %v658_v52 }
 0x56d   :  { %v663_v56 = vsel %vm662_vm9, %v3593_v44, %v659_v53 }
 0x56e   :  { %v668_v58 = vsel %vm665_vm10, %v667_v57, %v663_v56 }
 0x56f   :  { %v703_v6 = vmul.f32 %v668_v58, %v4032_v42 }
 0x5aa   :  { %v712_v49 = vpop.permute.xlu2 %711 }
 0x5ab   :  { %v719_v50 = vmul.f32 %v712_v49, %v4058_v10 }
 0x5ad   :  { %726 = vrot.lane.b32.xlu1 %v719_v50, %s3900_s19 }
 0x5b3   :  { %v615_v2 = vpop.permute.xlu0 %614 }
 0x5b4   :  { %3395 = vmatmul.msk.bf16.gmra.mxu3 %vm318_vm15, %v615_v2 }
 0x5ba   :  { %v710_v59 = vpop.permute.xlu1 %709 }
 0x5bb   :  { %v718_v60 = vmul.f32 %v710_v59, %v668_v58 }
 0x5bd   :  { %724 = vrot.lane.b32.xlu0 %v718_v60, %s3900_s19 }
 0x5c6   :  { %v252_v43 = vpop.f32.mrf.mxu0 }
 0x5c7   :  { %v253_v44 = vadd.f32 %v3969_v13, %v252_v43 }
 0x5c9   :  { %298 = vst.msk [vmem:[#allocation2 + $0x50] sm:$0xff] %vm287_vm2, %v253_v44 }
 0x5d0   :  { %v756_v54 = vld [vmem:[#allocation2 + $0x50] sm:$0xff] }
 0x61f   :  { %v727_v0 = vpop.permute.xlu1 %726 }
 0x620   :  { %v4068_v1 = vadd.f32 %v727_v0, %v704_v63 }
 0x622   :  { %3594 = vtanh.f32 %v4068_v1 }
 0x628   :  { %v3595_v5 = vpop.eup %3594 }
 0x629   :  { %744 = vrot.lane.b32.xlu0 %v3595_v5, %s3900_s19 }
 0x62f   :  { %v725_v7 = vpop.permute.xlu0 %724 }
 0x630   :  { %v4075_v8 = vadd.f32 %v725_v7, %v703_v6 }
 0x632   :  { %3596 = vtanh.f32 %v4075_v8 }
 0x637   :  { %v636_v11 = vpop.f32.mrf.mxu3 }
 0x638   :  { %v3597_v12 = vpop.eup %3596  ;;  %v642_v15 = vadd.f32 %v636_v11, %v607_v38 }
 0x639   :  { %742 = vrot.lane.b32.xlu2 %v3597_v12, %s3900_s19 }
 0x63a   :  { %3598 = vtanh.f32 %v642_v15  ;;  %v3398_v19 = vmul.f32 -1.442695, %v642_v15 }
 0x63c   :  { %3600 = vpow2.f32 %v3398_v19 }
 0x63f   :  { %v638_v16 = vpop.f32.mrf.mxu3 }
 0x640   :  { %v3599_v18 = vpop.eup %3598 }
 0x641   :  { %713 = vrot.lane.b32.xlu2 %v3599_v18, %s3899_s18 }
 0x642   :  { %v3601_v42 = vpop.eup %3600 }
 0x643   :  { %v654_v20 = vadd.f32 1.0, %v3601_v42 }
 0x645   :  { %3602 = vrcp.f32 %v654_v20  ;;  %v696_v29 = vand.u32 2147483648, %v654_v20  ;;  %vm690_vm12 = vweird.f32 %v654_v20  ;;  %v694_v30 = vand.u32 2147483647, %v654_v20 }
 0x647   :  { %v697_v32 = vor.u32 1.1754944e-38, %v696_v29  ;;  %vm695_vm14 = vcmp.eq.f32.partialorder %v694_v30, 8.507059e+37 }
 0x64b   :  { %v3603_v23 = vpop.eup %3602 }
 0x64c   :  { %v686_v24 = vmul.f32 %v3603_v23, %v654_v20  ;;  %vm691_vm11 = vweird.f32 %v3603_v23 }
 0x64d   :  { %vm692_vm13 = vmor %vm690_vm12, %vm691_vm11 }
 0x64e   :  { %v687_v25 = vsub.f32 1.0, %v686_v24 }
 0x650   :  { %v688_v26 = vmul.f32 %v3603_v23, %v687_v25 }
 0x652   :  { %v689_v28 = vadd.f32 %v3603_v23, %v688_v26 }
 0x654   :  { %v693_v31 = vsel %vm692_vm13, %v3603_v23, %v689_v28 }
 0x655   :  { %v698_v33 = vsel %vm695_vm14, %v697_v32, %v693_v31 }
 0x656   :  { %v705_v17 = vmul.f32 %v698_v33, %v4048_v14  ;;  %v755_v14 = vld [vmem:[#allocation2 + $0x48] sm:$0xff] }
 0x693   :  { %v743_v27 = vpop.permute.xlu2 %742 }
 0x694   :  { %v751_v36 = vmul.f32 %v743_v27, %v668_v58 }
 0x69b   :  { %v714_v34 = vpop.permute.xlu2 %713  ;;  %v745_v35 = vpop.permute.xlu0 %744 }
 0x69c   :  { %v720_v39 = vmul.f32 %v714_v34, %v698_v33  ;;  %v752_v40 = vmul.f32 %v745_v35, %v4058_v10  ;;  %v254_v10 = vpop.f32.mrf.mxu0 }
 0x69d   :  { %v255_v49 = vadd.f32 %v3969_v13, %v254_v10 }
 0x69e   :  { %v758_v41 = vpack.c.bf16 %v752_v40, %v751_v36  ;;  %728 = vrot.lane.b32.xlu0 %v720_v39, %s3900_s19 }
 0x69f   :  { %299 = vst.msk [vmem:[#allocation2 + $0x58] sm:$0xff] %vm287_vm2, %v255_v49 }
 0x6a0   :  { %762 = vrot.lane.b32.xlu1 %v758_v41, %s3901_s20 }
 0x6a6   :  { %v757_v34 = vld [vmem:[#allocation2 + $0x58] sm:$0xff] }
 0x710   :  { %v729_v45 = vpop.permute.xlu0 %728 }
 0x711   :  { %v4089_v46 = vadd.f32 %v729_v45, %v705_v17 }
 0x712   :  { %v763_v47 = vpop.permute.xlu1 %762 }
 0x713   :  { %3604 = vtanh.f32 %v4089_v46  ;;  %3399 = vmatmul.msk.bf16.vlgmr.msra.gmra.mxu1 %vm318_vm15, %v763_v47 }
 0x719   :  { %v3605_v48 = vpop.eup %3604 }
 0x71a   :  { %746 = vrot.lane.b32.xlu1 %v3605_v48, %s3900_s19 }
 0x78c   :  { %v747_v50 = vpop.permute.xlu1 %746 }
 0x78d   :  { %v753_v51 = vmul.f32 %v747_v50, %v698_v33 }
 0x78f   :  { %v759_v52 = vpack.c.bf16 %v753_v51, %v753_v51 }
 0x790   :  { %v781_v2 = vpop.f32.mrf.mxu1 }
 0x791   :  { %v790_v53 = vadd.f32 %v781_v2, %v755_v14  ;;  %764 = vrot.lane.b32.xlu2 %v759_v52, %s3901_s20 }
 0x793   :  { %3606 = vtanh.f32 %v790_v53  ;;  %v3401_v13 = vmul.f32 -1.442695, %v790_v53 }
 0x798   :  { %v783_v55 = vpop.f32.mrf.mxu1 }
 0x799   :  { %v3607_v56 = vpop.eup %3606  ;;  %v791_v57 = vadd.f32 %v783_v55, %v756_v54 }
 0x79a   :  { %859 = vrot.lane.b32.xlu0 %v3607_v56, %s3899_s18 }
 0x79b   :  { %3608 = vtanh.f32 %v791_v57  ;;  %v3402_v59 = vmul.f32 -1.442695, %v791_v57 }
 0x79c   :  { %3610 = vpow2.f32 %v3401_v13 }
 0x79d   :  { %3612 = vpow2.f32 %v3402_v59 }
 0x7a1   :  { %v3609_v58 = vpop.eup %3608 }
 0x7a2   :  { %861 = vrot.lane.b32.xlu1 %v3609_v58, %s3899_s18  ;;  %v3611_v60 = vpop.eup %3610 }
 0x7a3   :  { %v802_v62 = vadd.f32 1.0, %v3611_v60  ;;  %v3613_v63 = vpop.eup %3612  ;;  %v147_v60 = vld [vmem:[%s3944_s13 + $0x60] sm:$0xff] }
 0x7a4   :  { %v803_v0 = vadd.f32 1.0, %v3613_v63 }
 0x7a5   :  { %3614 = vrcp.f32 %v802_v62  ;;  %v816_v15 = vand.u32 2147483648, %v802_v62  ;;  %vm810_vm4 = vweird.f32 %v802_v62  ;;  %v814_v16 = vand.u32 2147483647, %v802_v62 }
 0x7a6   :  { %3616 = vrcp.f32 %v803_v0  ;;  %v831_v23 = vand.u32 2147483648, %v803_v0  ;;  %vm825_vm8 = vweird.f32 %v803_v0  ;;  %v829_v24 = vand.u32 2147483647, %v803_v0 }
 0x7a7   :  { %v817_v42 = vor.u32 1.1754944e-38, %v816_v15  ;;  %vm815_vm6 = vcmp.eq.f32.partialorder %v814_v16, 8.507059e+37 }
 0x7a8   :  { %v832_v26 = vor.u32 1.1754944e-38, %v831_v23  ;;  %vm830_vm10 = vcmp.eq.f32.partialorder %v829_v24, 8.507059e+37 }
 0x7ab   :  { %v3615_v3 = vpop.eup %3614 }
 0x7ac   :  { %v806_v4 = vmul.f32 %v3615_v3, %v802_v62  ;;  %v3617_v6 = vpop.eup %3616  ;;  %vm811_vm3 = vweird.f32 %v3615_v3 }
 0x7ad   :  { %v821_v38 = vmul.f32 %v3617_v6, %v803_v0  ;;  %vm812_vm5 = vmor %vm810_vm4, %vm811_vm3  ;;  %vm826_vm7 = vweird.f32 %v3617_v6 }
 0x7ae   :  { %v807_v5 = vsub.f32 1.0, %v806_v4  ;;  %vm827_vm9 = vmor %vm825_vm8, %vm826_vm7 }
 0x7af   :  { %v822_v12 = vsub.f32 1.0, %v821_v38 }
 0x7b0   :  { %v808_v7 = vmul.f32 %v3615_v3, %v807_v5 }
 0x7b1   :  { %v823_v19 = vmul.f32 %v3617_v6, %v822_v12 }
 0x7b2   :  { %v809_v11 = vadd.f32 %v3615_v3, %v808_v7  ;;  %v4125_v7 = vld [vmem:[%s3949_s17] ss:$0 sm:$0xff] }
 0x7b3   :  { %v824_v37 = vadd.f32 %v3617_v6, %v823_v19  ;;  %v150_v19 = vld [vmem:[%s3944_s13 + $0x78] sm:$0xff] }
 0x7b4   :  { %v813_v18 = vsel %vm812_vm5, %v3615_v3, %v809_v11 }
 0x7b5   :  { %v818_v20 = vsel %vm815_vm6, %v817_v42, %v813_v18  ;;  %v828_v25 = vsel %vm827_vm9, %v3617_v6, %v824_v37  ;;  %v149_v18 = vld [vmem:[%s3944_s13 + $0x70] sm:$0xff] }
 0x7b6   :  { %v833_v27 = vsel %vm830_vm10, %v832_v26, %v828_v25  ;;  %v853_v30 = vmul.f32 %v818_v20, %v4075_v8  ;;  %v166_v42 = vpack.c.bf16 %v150_v19, %v149_v18  ;;  %v151_v19 = vld [vmem:[%s3944_s13 + $0x80] sm:$0xff] }
 0x7b7   :  { %v854_v41 = vmul.f32 %v833_v27, %v4068_v1 }
 0x7eb   :  { %v765_v61 = vpop.permute.xlu2 %764 }
 0x7ec   :  { %3400 = vmatmul.msk.bf16.gmra.mxu1 %vm318_vm15, %v765_v61  ;;  %v148_v61 = vld [vmem:[%s3944_s13 + $0x68] sm:$0xff] }
 0x7ed   :  { %v165_v62 = vpack.c.bf16 %v148_v61, %v147_v60 }
 0x7ef   :  { %3380 = vmatmul.msk.bf16.gmra.mxu0 %vm177_vm1, %v165_v62 }
 0x7ff   :  { %3381 = vmatmul.msk.bf16.gmra.mxu0 %vm177_vm1, %v166_v42  ;;  %v152_v42 = vld [vmem:[%s3944_s13 + $0x88] sm:$0xff] }
 0x80c   :  { %v860_v21 = vpop.permute.xlu0 %859 }
 0x80d   :  { %v868_v22 = vmul.f32 %v860_v21, %v818_v20 }
 0x80f   :  { %874 = vrot.lane.b32.xlu2 %v868_v22, %s3900_s19 }
 0x814   :  { %v862_v28 = vpop.permute.xlu1 %861 }
 0x815   :  { %v869_v29 = vmul.f32 %v862_v28, %v833_v27 }
 0x817   :  { %876 = vrot.lane.b32.xlu0 %v869_v29, %s3900_s19 }
 0x869   :  { %v786_v31 = vpop.f32.mrf.mxu1  ;;  %v875_v32 = vpop.permute.xlu2 %874 }
 0x86a   :  { %v4103_v33 = vadd.f32 %v875_v32, %v853_v30  ;;  %v792_v35 = vadd.f32 %v786_v31, %v757_v34 }
 0x86c   :  { %3618 = vtanh.f32 %v4103_v33  ;;  %v3403_v17 = vmul.f32 -1.442695, %v792_v35  ;;  %v257_v6 = vpop.f32.mrf.mxu0 }
 0x86d   :  { %3620 = vtanh.f32 %v792_v35  ;;  %v258_v38 = vadd.f32 %v4125_v7, %v257_v6 }
 0x86f   :  { %300 = vst.msk [vmem:[#allocation2 + $0x60] sm:$0xff] %vm287_vm2, %v258_v38 }
 0x871   :  { %v788_v36 = vpop.f32.mrf.mxu1 }
 0x872   :  { %v3619_v39 = vpop.eup %3618 }
 0x873   :  { %892 = vrot.lane.b32.xlu1 %v3619_v39, %s3900_s19  ;;  %v3621_v40 = vpop.eup %3620 }
 0x87b   :  { %863 = vrot.lane.b32.xlu1 %v3621_v40, %s3899_s18 }
 0x889   :  { %v877_v43 = vpop.permute.xlu0 %876 }
 0x88a   :  { %v4109_v8 = vadd.f32 %v877_v43, %v854_v41 }
 0x88c   :  { %3622 = vtanh.f32 %v4109_v8 }
 0x88d   :  { %3624 = vpow2.f32 %v3403_v17 }
 0x892   :  { %v3623_v44 = vpop.eup %3622 }
 0x893   :  { %894 = vrot.lane.b32.xlu2 %v3623_v44, %s3900_s19  ;;  %v3625_v45 = vpop.eup %3624 }
 0x894   :  { %v804_v47 = vadd.f32 1.0, %v3625_v45 }
 0x896   :  { %3626 = vrcp.f32 %v804_v47  ;;  %v846_v1 = vand.u32 2147483648, %v804_v47  ;;  %vm840_vm12 = vweird.f32 %v804_v47  ;;  %v844_v14 = vand.u32 2147483647, %v804_v47 }
 0x898   :  { %v847_v53 = vor.u32 1.1754944e-38, %v846_v1  ;;  %vm845_vm14 = vcmp.eq.f32.partialorder %v844_v14, 8.507059e+37 }
 0x89c   :  { %v3627_v48 = vpop.eup %3626 }
 0x89d   :  { %v836_v10 = vmul.f32 %v3627_v48, %v804_v47  ;;  %vm841_vm11 = vweird.f32 %v3627_v48 }
 0x89e   :  { %vm842_vm13 = vmor %vm840_vm12, %vm841_vm11 }
 0x89f   :  { %v837_v49 = vsub.f32 1.0, %v836_v10 }
 0x8a1   :  { %v838_v50 = vmul.f32 %v3627_v48, %v837_v49 }
 0x8a3   :  { %v839_v52 = vadd.f32 %v3627_v48, %v838_v50 }
 0x8a5   :  { %v843_v2 = vsel %vm842_vm13, %v3627_v48, %v839_v52 }
 0x8a6   :  { %v848_v56 = vsel %vm845_vm14, %v847_v53, %v843_v2 }
 0x8a7   :  { %v855_v63 = vmul.f32 %v848_v56, %v4089_v46  ;;  %v259_v46 = vpop.f32.mrf.mxu0 }
 0x8a8   :  { %v260_v11 = vadd.f32 %v4125_v7, %v259_v46 }
 0x8aa   :  { %301 = vst.msk [vmem:[#allocation2 + $0x68] sm:$0xff] %vm287_vm2, %v260_v11 }
 0x8af   :  { %v262_v52 = vpop.f32.mrf.mxu0 }
 0x8b0   :  { %v263_v1 = vadd.f32 %v4125_v7, %v262_v52 }
 0x8b1   :  { %v906_v37 = vld [vmem:[#allocation2 + $0x68] sm:$0xff] }
 0x8b2   :  { %302 = vst.msk [vmem:[#allocation2 + $0x70] sm:$0xff] %vm287_vm2, %v263_v1 }
 0x8e5   :  { %v893_v51 = vpop.permute.xlu1 %892 }
 0x8e6   :  { %v901_v55 = vmul.f32 %v893_v51, %v818_v20  ;;  %v905_v20 = vld [vmem:[#allocation2 + $0x60] sm:$0xff] }
 0x8ed   :  { %v895_v54 = vpop.permute.xlu2 %894  ;;  %v864_v57 = vpop.permute.xlu1 %863 }
 0x8ee   :  { %v902_v58 = vmul.f32 %v895_v54, %v833_v27  ;;  %v870_v13 = vmul.f32 %v864_v57, %v848_v56 }
 0x8f0   :  { %v908_v59 = vpack.c.bf16 %v902_v58, %v901_v55  ;;  %878 = vrot.lane.b32.xlu2 %v870_v13, %s3900_s19 }
 0x8f2   :  { %912 = vrot.lane.b32.xlu0 %v908_v59, %s3901_s20  ;;  %v264_v59 = vpop.f32.mrf.mxu0 }
 0x8f3   :  { %v265_v60 = vadd.f32 %v4125_v7, %v264_v59 }
 0x8f5   :  { %303 = vst.msk [vmem:[#allocation2 + $0x78] sm:$0xff] %vm287_vm2, %v265_v60 }
 0x8fc   :  { %v1055_v52 = vld [vmem:[#allocation2 + $0x78] sm:$0xff] }
 0x94a   :  { %v879_v0 = vpop.permute.xlu2 %878 }
 0x94b   :  { %v4119_v3 = vadd.f32 %v879_v0, %v855_v63 }
 0x94d   :  { %3628 = vtanh.f32 %v4119_v3 }
 0x953   :  { %v3629_v4 = vpop.eup %3628 }
 0x954   :  { %896 = vrot.lane.b32.xlu0 %v3629_v4, %s3900_s19  ;;  %v907_v4 = vld [vmem:[#allocation2 + $0x70] sm:$0xff] }
 0x964   :  { %v913_v5 = vpop.permute.xlu0 %912 }
 0x965   :  { %3404 = vmatmul.msk.bf16.vlgmr.msra.gmra.mxu2 %vm318_vm15, %v913_v5 }
 0x9c6   :  { %v897_v12 = vpop.permute.xlu0 %896 }
 0x9c7   :  { %v903_v15 = vmul.f32 %v897_v12, %v848_v56 }
 0x9c9   :  { %v909_v16 = vpack.c.bf16 %v903_v15, %v903_v15 }
 0x9cb   :  { %914 = vrot.lane.b32.xlu1 %v909_v16, %s3901_s20 }
 0x9e8   :  { %v931_v21 = vpop.f32.mrf.mxu2 }
 0x9e9   :  { %v940_v22 = vadd.f32 %v931_v21, %v905_v20  ;;  %v167_v20 = vpack.c.bf16 %v152_v42, %v151_v19 }
 0x9eb   :  { %3630 = vtanh.f32 %v940_v22  ;;  %v3406_v27 = vmul.f32 -1.442695, %v940_v22  ;;  %3382 = vmatmul.msk.bf16.gmra.mxu0 %vm177_vm1, %v167_v20 }
 0x9f0   :  { %v933_v23 = vpop.f32.mrf.mxu2 }
 0x9f1   :  { %v3631_v24 = vpop.eup %3630  ;;  %v941_v25 = vadd.f32 %v933_v23, %v906_v37 }
 0x9f2   :  { %1009 = vrot.lane.b32.xlu2 %v3631_v24, %s3899_s18 }
 0x9f3   :  { %3632 = vtanh.f32 %v941_v25  ;;  %v3407_v35 = vmul.f32 -1.442695, %v941_v25 }
 0x9f4   :  { %3634 = vpow2.f32 %v3406_v27 }
 0x9f9   :  { %v3633_v26 = vpop.eup %3632 }
 0x9fa   :  { %1011 = vrot.lane.b32.xlu0 %v3633_v26, %s3899_s18  ;;  %v3635_v28 = vpop.eup %3634 }
 0x9fb   :  { %v952_v29 = vadd.f32 1.0, %v3635_v28 }
 0x9fd   :  { %3636 = vrcp.f32 %v952_v29  ;;  %v966_v40 = vand.u32 2147483648, %v952_v29  ;;  %vm960_vm4 = vweird.f32 %v952_v29  ;;  %v964_v41 = vand.u32 2147483647, %v952_v29 }
 0x9fe   :  { %3638 = vpow2.f32 %v3407_v35 }
 0x9ff   :  { %v967_v17 = vor.u32 1.1754944e-38, %v966_v40  ;;  %vm965_vm6 = vcmp.eq.f32.partialorder %v964_v41, 8.507059e+37 }
 0xa03   :  { %v3637_v30 = vpop.eup %3636 }
 0xa04   :  { %v956_v31 = vmul.f32 %v3637_v30, %v952_v29  ;;  %vm961_vm3 = vweird.f32 %v3637_v30  ;;  %v3639_v43 = vpop.eup %3638 }
 0xa05   :  { %vm962_vm5 = vmor %vm960_vm4, %vm961_vm3  ;;  %v953_v45 = vadd.f32 1.0, %v3639_v43 }
 0xa06   :  { %v957_v32 = vsub.f32 1.0, %v956_v31 }
 0xa07   :  { %3640 = vrcp.f32 %v953_v45  ;;  %v981_v53 = vand.u32 2147483648, %v953_v45  ;;  %vm975_vm8 = vweird.f32 %v953_v45  ;;  %v979_v54 = vand.u32 2147483647, %v953_v45 }
 0xa08   :  { %v958_v36 = vmul.f32 %v3637_v30, %v957_v32 }
 0xa09   :  { %v982_v56 = vor.u32 1.1754944e-38, %v981_v53  ;;  %vm980_vm10 = vcmp.eq.f32.partialorder %v979_v54, 8.507059e+37 }
 0xa0a   :  { %v959_v39 = vadd.f32 %v3637_v30, %v958_v36 }
 0xa0c   :  { %v963_v44 = vsel %vm962_vm5, %v3637_v30, %v959_v39 }
 0xa0d   :  { %v4138_v47 = vsel %vm965_vm6, %v967_v17, %v963_v44  ;;  %v3641_v49 = vpop.eup %3640 }
 0xa0e   :  { %v971_v50 = vmul.f32 %v3641_v49, %v953_v45  ;;  %vm976_vm7 = vweird.f32 %v3641_v49  ;;  %v1003_v61 = vmul.f32 %v4138_v47, %v4103_v33 }
 0xa0f   :  { %vm977_vm9 = vmor %vm975_vm8, %vm976_vm7 }
 0xa10   :  { %v972_v51 = vsub.f32 1.0, %v971_v50 }
 0xa12   :  { %v973_v14 = vmul.f32 %v3641_v49, %v972_v51 }
 0xa14   :  { %v974_v2 = vadd.f32 %v3641_v49, %v973_v14 }
 0xa16   :  { %v978_v55 = vsel %vm977_vm9, %v3641_v49, %v974_v2 }
 0xa17   :  { %v983_v57 = vsel %vm980_vm10, %v982_v56, %v978_v55 }
 0xa18   :  { %v1004_v6 = vmul.f32 %v983_v57, %v4109_v8 }
 0xa3d   :  { %v915_v34 = vpop.permute.xlu1 %914 }
 0xa3e   :  { %3405 = vmatmul.msk.bf16.gmra.mxu2 %vm318_vm15, %v915_v34 }
 0xa4c   :  { %v1010_v48 = vpop.permute.xlu2 %1009 }
 0xa4d   :  { %v1018_v10 = vmul.f32 %v1010_v48, %v4138_v47 }
 0xa4f   :  { %1024 = vrot.lane.b32.xlu1 %v1018_v10, %s3900_s19 }
 0xa68   :  { %v267_v41 = vpop.f32.mrf.mxu0 }
 0xa69   :  { %v268_v43 = vadd.f32 %v4125_v7, %v267_v41 }
 0xa6b   :  { %304 = vst.msk [vmem:[#allocation2 + $0x80] sm:$0xff] %vm287_vm2, %v268_v43 }
 0xa6c   :  { %v1012_v58 = vpop.permute.xlu0 %1011 }
 0xa6d   :  { %v1019_v13 = vmul.f32 %v1012_v58, %v983_v57 }
 0xa6f   :  { %1026 = vrot.lane.b32.xlu2 %v1019_v13, %s3900_s19 }
 0xa70   :  { %v269_v48 = vpop.f32.mrf.mxu0 }
 0xa71   :  { %v270_v10 = vadd.f32 %v4125_v7, %v269_v48  ;;  %v154_v48 = vld [vmem:[%s3944_s13 + $0x98] sm:$0xff] }
 0xa72   :  { %v1056_v14 = vld [vmem:[#allocation2 + $0x80] sm:$0xff] }
 0xa73   :  { %305 = vst.msk [vmem:[#allocation2 + $0x88] sm:$0xff] %vm287_vm2, %v270_v10 }
 0xac1   :  { %v1025_v62 = vpop.permute.xlu1 %1024  ;;  %v936_v63 = vpop.f32.mrf.mxu2 }
 0xac2   :  { %v4149_v0 = vadd.f32 %v1025_v62, %v1003_v61  ;;  %v942_v5 = vadd.f32 %v936_v63, %v907_v4 }
 0xac4   :  { %3642 = vtanh.f32 %v4149_v0  ;;  %v3408_v16 = vmul.f32 -1.442695, %v942_v5 }
 0xac5   :  { %3644 = vtanh.f32 %v942_v5 }
 0xac9   :  { %v1027_v38 = vpop.permute.xlu2 %1026  ;;  %v938_v11 = vpop.f32.mrf.mxu2 }
 0xaca   :  { %v3643_v46 = vpop.eup %3642  ;;  %v4153_v12 = vadd.f32 %v1027_v38, %v1004_v6 }
 0xacb   :  { %1042 = vrot.lane.b32.xlu0 %v3643_v46, %s3900_s19  ;;  %v3645_v33 = vpop.eup %3644 }
 0xacc   :  { %3646 = vtanh.f32 %v4153_v12 }
 0xacd   :  { %3648 = vpow2.f32 %v3408_v16 }
 0xad2   :  { %v3647_v15 = vpop.eup %3646 }
 0xad3   :  { %1013 = vrot.lane.b32.xlu0 %v3645_v33, %s3899_s18  ;;  %1044 = vrot.lane.b32.xlu1 %v3647_v15, %s3900_s19  ;;  %v3649_v8 = vpop.eup %3648 }
 0xad4   :  { %v954_v18 = vadd.f32 1.0, %v3649_v8 }
 0xad6   :  { %3650 = vrcp.f32 %v954_v18  ;;  %v996_v26 = vand.u32 2147483648, %v954_v18  ;;  %vm990_vm12 = vweird.f32 %v954_v18  ;;  %v994_v27 = vand.u32 2147483647, %v954_v18 }
 0xad8   :  { %v997_v29 = vor.u32 1.1754944e-38, %v996_v26  ;;  %vm995_vm14 = vcmp.eq.f32.partialorder %v994_v27, 8.507059e+37 }
 0xadc   :  { %v3651_v21 = vpop.eup %3650 }
 0xadd   :  { %v986_v22 = vmul.f32 %v3651_v21, %v954_v18  ;;  %vm991_vm11 = vweird.f32 %v3651_v21 }
 0xade   :  { %vm992_vm13 = vmor %vm990_vm12, %vm991_vm11 }
 0xadf   :  { %v987_v37 = vsub.f32 1.0, %v986_v22 }
 0xae1   :  { %v988_v23 = vmul.f32 %v3651_v21, %v987_v37 }
 0xae3   :  { %v989_v25 = vadd.f32 %v3651_v21, %v988_v23 }
 0xae5   :  { %v993_v28 = vsel %vm992_vm13, %v3651_v21, %v989_v25 }
 0xae6   :  { %v998_v30 = vsel %vm995_vm14, %v997_v29, %v993_v28 }
 0xae7   :  { %v1005_v44 = vmul.f32 %v998_v30, %v4119_v3 }
 0xb3d   :  { %v1043_v24 = vpop.permute.xlu0 %1042 }
 0xb3e   :  { %v1051_v34 = vmul.f32 %v1043_v24, %v4138_v47 }
 0xb45   :  { %v1014_v31 = vpop.permute.xlu0 %1013  ;;  %v1045_v32 = vpop.permute.xlu1 %1044 }
 0xb46   :  { %v1020_v35 = vmul.f32 %v1014_v31, %v998_v30  ;;  %v1052_v36 = vmul.f32 %v1045_v32, %v983_v57 }
 0xb48   :  { %v1058_v39 = vpack.c.bf16 %v1052_v36, %v1051_v34  ;;  %1028 = vrot.lane.b32.xlu1 %v1020_v35, %s3900_s19 }
 0xb4a   :  { %1062 = vrot.lane.b32.xlu2 %v1058_v39, %s3901_s20  ;;  %v1057_v39 = vld [vmem:[#allocation2 + $0x88] sm:$0xff] }
 0xba4   :  { %v1063_v40 = vpop.permute.xlu2 %1062 }
 0xba5   :  { %3409 = vmatmul.msk.bf16.vlgmr.msra.gmra.mxu3 %vm318_vm15, %v1063_v40 }
 0xbba   :  { %v1029_v17 = vpop.permute.xlu1 %1028 }
 0xbbb   :  { %v4169_v45 = vadd.f32 %v1029_v17, %v1005_v44 }
 0xbbd   :  { %3652 = vtanh.f32 %v4169_v45 }
 0xbc3   :  { %v3653_v47 = vpop.eup %3652 }
 0xbc4   :  { %1046 = vrot.lane.b32.xlu2 %v3653_v47, %s3900_s19  ;;  %v153_v47 = vld [vmem:[%s3944_s13 + $0x90] sm:$0xff] }
 0xbc5   :  { %v168_v10 = vpack.c.bf16 %v154_v48, %v153_v47 }
 0xbc7   :  { %3383 = vmatmul.msk.bf16.gmra.mxu0 %vm177_vm1, %v168_v10 }
 0xc1e   :  { %v1047_v49 = vpop.permute.xlu2 %1046 }
 0xc1f   :  { %v1053_v50 = vmul.f32 %v1047_v49, %v998_v30 }
 0xc21   :  { %v1059_v51 = vpack.c.bf16 %v1053_v50, %v1053_v50 }
 0xc23   :  { %1064 = vrot.lane.b32.xlu0 %v1059_v51, %s3901_s20 }
 0xc28   :  { %v1081_v3 = vpop.f32.mrf.mxu3 }
 0xc29   :  { %v1090_v1 = vadd.f32 %v1081_v3, %v1055_v52 }
 0xc2b   :  { %3654 = vtanh.f32 %v1090_v1  ;;  %v3411_v13 = vmul.f32 -1.442695, %v1090_v1 }
 0xc30   :  { %v1083_v2 = vpop.f32.mrf.mxu3 }
 0xc31   :  { %v3655_v53 = vpop.eup %3654  ;;  %v1091_v54 = vadd.f32 %v1083_v2, %v1056_v14 }
 0xc32   :  { %1159 = vrot.lane.b32.xlu1 %v3655_v53, %s3899_s18 }
 0xc33   :  { %3656 = vtanh.f32 %v1091_v54  ;;  %v3412_v56 = vmul.f32 -1.442695, %v1091_v54 }
 0xc35   :  { %3658 = vpow2.f32 %v3412_v56 }
 0xc39   :  { %v3657_v55 = vpop.eup %3656 }
 0xc3a   :  { %1161 = vrot.lane.b32.xlu2 %v3657_v55, %s3899_s18 }
 0xc3b   :  { %v3659_v57 = vpop.eup %3658 }
 0xc3c   :  { %v1103_v58 = vadd.f32 1.0, %v3659_v57 }
 0xc3e   :  { %3660 = vrcp.f32 %v1103_v58  ;;  %v1131_v38 = vand.u32 2147483648, %v1103_v58  ;;  %vm1125_vm4 = vweird.f32 %v1103_v58  ;;  %v1129_v46 = vand.u32 2147483647, %v1103_v58 }
 0xc3f   :  { %3662 = vpow2.f32 %v3411_v13 }
 0xc40   :  { %v1132_v15 = vor.u32 1.1754944e-38, %v1131_v38  ;;  %vm1130_vm6 = vcmp.eq.f32.partialorder %v1129_v46, 8.507059e+37 }
 0xc44   :  { %v3661_v59 = vpop.eup %3660 }
 0xc45   :  { %v3663_v60 = vpop.eup %3662  ;;  %v1121_v61 = vmul.f32 %v3661_v59, %v1103_v58  ;;  %vm1126_vm3 = vweird.f32 %v3661_v59 }
 0xc46   :  { %v1102_v62 = vadd.f32 1.0, %v3663_v60  ;;  %vm1127_vm5 = vmor %vm1125_vm4, %vm1126_vm3 }
 0xc47   :  { %v1122_v63 = vsub.f32 1.0, %v1121_v61  ;;  %v272_v61 = vpop.f32.mrf.mxu0 }
 0xc48   :  { %3664 = vrcp.f32 %v1102_v62  ;;  %v1116_v22 = vand.u32 2147483648, %v1102_v62  ;;  %vm1110_vm8 = vweird.f32 %v1102_v62  ;;  %v1114_v37 = vand.u32 2147483647, %v1102_v62 }
 0xc49   :  { %v1123_v4 = vmul.f32 %v3661_v59, %v1122_v63 }
 0xc4a   :  { %v1117_v24 = vor.u32 1.1754944e-38, %v1116_v22  ;;  %vm1115_vm10 = vcmp.eq.f32.partialorder %v1114_v37, 8.507059e+37 }
 0xc4b   :  { %v1124_v5 = vadd.f32 %v3661_v59, %v1123_v4 }
 0xc4d   :  { %v1128_v11 = vsel %vm1127_vm5, %v3661_v59, %v1124_v5 }
 0xc4e   :  { %v3665_v6 = vpop.eup %3664  ;;  %v4178_v16 = vsel %vm1130_vm6, %v1132_v15, %v1128_v11  ;;  %v4214_v15 = vld [vmem:[%s3944_s13 + $0xa8] sm:$0xff] }
 0xc4f   :  { %v1106_v33 = vmul.f32 %v3665_v6, %v1102_v62  ;;  %vm1111_vm7 = vweird.f32 %v3665_v6  ;;  %v1154_v28 = vmul.f32 %v4178_v16, %v4153_v12  ;;  %v273_v62 = vadd.f32 %v4125_v7, %v272_v61  ;;  %v274_v63 = vpop.f32.mrf.mxu0 }
 0xc50   :  { %vm1112_vm9 = vmor %vm1110_vm8, %vm1111_vm7  ;;  %v275_v4 = vadd.f32 %v4125_v7, %v274_v63 }
 0xc51   :  { %v1107_v42 = vsub.f32 1.0, %v1106_v33  ;;  %306 = vst.msk [vmem:[#allocation2 + $0x90] sm:$0xff] %vm287_vm2, %v273_v62  ;;  %v155_v33 = vld [vmem:[%s3944_s13 + $0xa0] sm:$0xff] }
 0xc52   :  { %307 = vst.msk [vmem:[#allocation2 + $0x98] sm:$0xff] %vm287_vm2, %v275_v4 }
 0xc53   :  { %v1108_v20 = vmul.f32 %v3665_v6, %v1107_v42 }
 0xc55   :  { %v1109_v21 = vadd.f32 %v3665_v6, %v1108_v20 }
 0xc57   :  { %v1113_v23 = vsel %vm1112_vm9, %v3665_v6, %v1109_v21 }
 0xc58   :  { %v1118_v25 = vsel %vm1115_vm10, %v1117_v24, %v1113_v23 }
 0xc59   :  { %v1153_v32 = vmul.f32 %v1118_v25, %v4149_v0  ;;  %v1206_v21 = vld [vmem:[#allocation2 + $0x98] sm:$0xff] }
 0xc94   :  { %v1162_v8 = vpop.permute.xlu2 %1161 }
 0xc95   :  { %v1169_v18 = vmul.f32 %v1162_v8, %v4178_v16  ;;  %v1065_v19 = vpop.permute.xlu0 %1064 }
 0xc96   :  { %3410 = vmatmul.msk.bf16.gmra.mxu3 %vm318_vm15, %v1065_v19 }
 0xc97   :  { %1176 = vrot.lane.b32.xlu1 %v1169_v18, %s3900_s19  ;;  %v1205_v18 = vld [vmem:[#allocation2 + $0x90] sm:$0xff] }
 0xca4   :  { %v1160_v26 = vpop.permute.xlu1 %1159 }
 0xca5   :  { %v1168_v27 = vmul.f32 %v1160_v26, %v1118_v25 }
 0xca7   :  { %1174 = vrot.lane.b32.xlu0 %v1168_v27, %s3900_s19 }
 0xd09   :  { %v1177_v29 = vpop.permute.xlu1 %1176 }
 0xd0a   :  { %v4186_v30 = vadd.f32 %v1177_v29, %v1154_v28 }
 0xd0c   :  { %3666 = vtanh.f32 %v4186_v30 }
 0xd12   :  { %v3667_v31 = vpop.eup %3666 }
 0xd13   :  { %1194 = vrot.lane.b32.xlu0 %v3667_v31, %s3900_s19 }
 0xd19   :  { %v1086_v34 = vpop.f32.mrf.mxu3  ;;  %v1175_v35 = vpop.permute.xlu0 %1174 }
 0xd1a   :  { %v4191_v36 = vadd.f32 %v1175_v35, %v1153_v32  ;;  %v1092_v12 = vadd.f32 %v1086_v34, %v1057_v39 }
 0xd1c   :  { %3668 = vtanh.f32 %v4191_v36  ;;  %v3413_v44 = vmul.f32 -1.442695, %v1092_v12 }
 0xd1d   :  { %3670 = vtanh.f32 %v1092_v12 }
 0xd1e   :  { %3672 = vpow2.f32 %v3413_v44 }
 0xd21   :  { %v1088_v40 = vpop.f32.mrf.mxu3 }
 0xd22   :  { %v3669_v41 = vpop.eup %3668 }
 0xd23   :  { %1192 = vrot.lane.b32.xlu2 %v3669_v41, %s3900_s19  ;;  %v3671_v43 = vpop.eup %3670 }
 0xd24   :  { %v3673_v0 = vpop.eup %3672 }
 0xd25   :  { %v1104_v17 = vadd.f32 1.0, %v3673_v0 }
 0xd27   :  { %3674 = vrcp.f32 %v1104_v17  ;;  %v1146_v14 = vand.u32 2147483648, %v1104_v17  ;;  %vm1140_vm12 = vweird.f32 %v1104_v17  ;;  %v1144_v2 = vand.u32 2147483647, %v1104_v17 }
 0xd29   :  { %v1147_v54 = vor.u32 1.1754944e-38, %v1146_v14  ;;  %vm1145_vm14 = vcmp.eq.f32.partialorder %v1144_v2, 8.507059e+37 }
 0xd2b   :  { %1163 = vrot.lane.b32.xlu2 %v3671_v43, %s3899_s18 }
 0xd2d   :  { %v3675_v49 = vpop.eup %3674 }
 0xd2e   :  { %v1136_v50 = vmul.f32 %v3675_v49, %v1104_v17  ;;  %vm1141_vm11 = vweird.f32 %v3675_v49 }
 0xd2f   :  { %vm1142_vm13 = vmor %vm1140_vm12, %vm1141_vm11 }
 0xd30   :  { %v1137_v51 = vsub.f32 1.0, %v1136_v50 }
 0xd32   :  { %v1138_v52 = vmul.f32 %v3675_v49, %v1137_v51 }
 0xd34   :  { %v1139_v1 = vadd.f32 %v3675_v49, %v1138_v52 }
 0xd36   :  { %v1143_v53 = vsel %vm1142_vm13, %v3675_v49, %v1139_v1 }
 0xd37   :  { %v1148_v57 = vsel %vm1145_vm14, %v1147_v54, %v1143_v53 }
 0xd38   :  { %v1155_v5 = vmul.f32 %v1148_v57, %v4169_v45 }
 0xd7d   :  { %v1193_v3 = vpop.permute.xlu2 %1192 }
 0xd7e   :  { %v1201_v56 = vmul.f32 %v1193_v3, %v1118_v25 }
 0xd85   :  { %v1195_v55 = vpop.permute.xlu0 %1194  ;;  %v1164_v58 = vpop.permute.xlu2 %1163 }
 0xd86   :  { %v1202_v13 = vmul.f32 %v1195_v55, %v4178_v16  ;;  %v1170_v59 = vmul.f32 %v1164_v58, %v1148_v57  ;;  %v169_v16 = vpack.c.bf16 %v4214_v15, %v155_v33 }
 0xd88   :  { %v1208_v60 = vpack.c.bf16 %v1202_v13, %v1201_v56  ;;  %1178 = vrot.lane.b32.xlu0 %v1170_v59, %s3900_s19  ;;  %3384 = vmatmul.msk.bf16.gmra.mxu0 %vm177_vm1, %v169_v16 }
 0xd8a   :  { %1212 = vrot.lane.b32.xlu1 %v1208_v60, %s3901_s20 }
 0xdfa   :  { %v1179_v6 = vpop.permute.xlu0 %1178 }
 0xdfb   :  { %v4207_v38 = vadd.f32 %v1179_v6, %v1155_v5 }
 0xdfc   :  { %v1213_v46 = vpop.permute.xlu1 %1212 }
 0xdfd   :  { %3414 = vmatmul.msk.bf16.vlgmr.msrb.gmra.mxu1 %vm318_vm15, %v1213_v46  ;;  %3676 = vtanh.f32 %v4207_v38 }
 0xe03   :  { %v3677_v11 = vpop.eup %3676 }
 0xe04   :  { %1196 = vrot.lane.b32.xlu1 %v3677_v11, %s3900_s19 }
 0xe05   :  { %v277_v17 = vpop.f32.mrf.mxu0 }
 0xe06   :  { %v278_v48 = vadd.f32 %v4125_v7, %v277_v17 }
 0xe08   :  { %308 = vst.msk [vmem:[#allocation2 + $0xa0] sm:$0xff] %vm287_vm2, %v278_v48 }
 0xe0d   :  { %v279_v61 = vpop.f32.mrf.mxu0 }
 0xe0e   :  { %v280_v63 = vadd.f32 %v4125_v7, %v279_v61 }
 0xe0f   :  { %v1207_v62 = vld [vmem:[#allocation2 + $0xa0] sm:$0xff] }
 0xe10   :  { %309 = vst.msk [vmem:[#allocation2 + $0xa8] sm:$0xff] %vm287_vm2, %v280_v63 }
 0xe17   :  { %v1355_v48 = vld [vmem:[#allocation2 + $0xa8] sm:$0xff] }
 0xe76   :  { %v1197_v8 = vpop.permute.xlu1 %1196 }
 0xe77   :  { %v1203_v45 = vmul.f32 %v1197_v8, %v1148_v57 }
 0xe79   :  { %v1209_v19 = vpack.c.bf16 %v1203_v45, %v1203_v45 }
 0xe7a   :  { %v1231_v42 = vpop.f32.mrf.mxu1 }
 0xe7b   :  { %v1240_v20 = vadd.f32 %v1231_v42, %v1205_v18  ;;  %1214 = vrot.lane.b32.xlu2 %v1209_v19, %s3901_s20 }
 0xe7d   :  { %3678 = vtanh.f32 %v1240_v20  ;;  %v3416_v25 = vmul.f32 -1.442695, %v1240_v20 }
 0xe82   :  { %v1233_v22 = vpop.f32.mrf.mxu1 }
 0xe83   :  { %v3679_v37 = vpop.eup %3678  ;;  %v1241_v23 = vadd.f32 %v1233_v22, %v1206_v21 }
 0xe84   :  { %1309 = vrot.lane.b32.xlu0 %v3679_v37, %s3899_s18 }
 0xe85   :  { %3680 = vtanh.f32 %v1241_v23  ;;  %v3417_v26 = vmul.f32 -1.442695, %v1241_v23 }
 0xe86   :  { %3682 = vpow2.f32 %v3416_v25 }
 0xe87   :  { %3684 = vpow2.f32 %v3417_v26 }
 0xe8b   :  { %v3681_v24 = vpop.eup %3680 }
 0xe8c   :  { %1311 = vrot.lane.b32.xlu1 %v3681_v24, %s3899_s18  ;;  %v3683_v27 = vpop.eup %3682 }
 0xe8d   :  { %v1252_v28 = vadd.f32 1.0, %v3683_v27  ;;  %v3685_v31 = vpop.eup %3684 }
 0xe8e   :  { %v1253_v32 = vadd.f32 1.0, %v3685_v31 }
 0xe8f   :  { %3686 = vrcp.f32 %v1252_v28  ;;  %v1266_v0 = vand.u32 2147483648, %v1252_v28  ;;  %vm1260_vm4 = vweird.f32 %v1252_v28  ;;  %v1264_v47 = vand.u32 2147483647, %v1252_v28 }
 0xe90   :  { %3688 = vrcp.f32 %v1253_v32  ;;  %v1281_v14 = vand.u32 2147483648, %v1253_v32  ;;  %vm1275_vm8 = vweird.f32 %v1253_v32  ;;  %v1279_v2 = vand.u32 2147483647, %v1253_v32 }
 0xe91   :  { %v1267_v50 = vor.u32 1.1754944e-38, %v1266_v0  ;;  %vm1265_vm6 = vcmp.eq.f32.partialorder %v1264_v47, 8.507059e+37 }
 0xe92   :  { %v1282_v54 = vor.u32 1.1754944e-38, %v1281_v14  ;;  %vm1280_vm10 = vcmp.eq.f32.partialorder %v1279_v2, 8.507059e+37 }
 0xe95   :  { %v3687_v34 = vpop.eup %3686 }
 0xe96   :  { %v1256_v35 = vmul.f32 %v3687_v34, %v1252_v28  ;;  %v3689_v12 = vpop.eup %3688  ;;  %vm1261_vm3 = vweird.f32 %v3687_v34 }
 0xe97   :  { %v1271_v41 = vmul.f32 %v3689_v12, %v1253_v32  ;;  %vm1262_vm5 = vmor %vm1260_vm4, %vm1261_vm3  ;;  %vm1276_vm7 = vweird.f32 %v3689_v12 }
 0xe98   :  { %v1257_v39 = vsub.f32 1.0, %v1256_v35  ;;  %vm1277_vm9 = vmor %vm1275_vm8, %vm1276_vm7  ;;  %v3425_v35 = vld [vmem:[%s3944_s13 + $0xb0] sm:$0xff] }
 0xe99   :  { %v1272_v44 = vsub.f32 1.0, %v1271_v41 }
 0xe9a   :  { %v1258_v40 = vmul.f32 %v3687_v34, %v1257_v39 }
 0xe9b   :  { %v1273_v49 = vmul.f32 %v3689_v12, %v1272_v44 }
 0xe9c   :  { %v1259_v43 = vadd.f32 %v3687_v34, %v1258_v40  ;;  %v1508_v40 = vpack.c.bf16 %v3425_v35, %v4214_v15 }
 0xe9d   :  { %v1274_v1 = vadd.f32 %v3689_v12, %v1273_v49 }
 0xe9e   :  { %v1263_v10 = vsel %vm1262_vm5, %v3687_v34, %v1259_v43  ;;  %v1510_v34 = vld [vmem:[%s3349_s24] sm:$0xff] }
 0xe9f   :  { %v1268_v51 = vsel %vm1265_vm6, %v1267_v50, %v1263_v10  ;;  %v1278_v53 = vsel %vm1277_vm9, %v3689_v12, %v1274_v1  ;;  %v1511_v39 = vpack.c.bf16 %v1510_v34, %v1510_v34  ;;  %v1356_v50 = vld [vmem:[#allocation2 + $0xb0] sm:$0xff]  ;;  %v4258_v1 = vld [vmem:[%s3350_s28] ss:$0 sm:$0xff] }
 0xea0   :  { %v1283_v55 = vsel %vm1280_vm10, %v1282_v54, %v1278_v53  ;;  %v1303_v58 = vmul.f32 %v1268_v51, %v4191_v36 }
 0xea1   :  { %v1304_v36 = vmul.f32 %v1283_v55, %v4186_v30  ;;  %v1523_v12 = vsel %vm214_vm0, %v1511_v39, 0 }
 0xea2   :  { %1532 = vmatpush.bf16.msrb.mxu3 %v1523_v12 }
 0xea5   :  { %3427 = vmatmul.msk.bf16.vlgmr.msrb.gmra.mxu3 %vm177_vm1, %v1508_v40 }
 0xed5   :  { %v1215_v29 = vpop.permute.xlu2 %1214 }
 0xed6   :  { %3415 = vmatmul.msk.bf16.gmra.mxu1 %vm318_vm15, %v1215_v29 }
 0xef6   :  { %v1310_v52 = vpop.permute.xlu0 %1309 }
 0xef7   :  { %v1318_v3 = vmul.f32 %v1310_v52, %v1268_v51 }
 0xef9   :  { %1324 = vrot.lane.b32.xlu2 %v1318_v3, %s3900_s19 }
 0xefe   :  { %v1312_v56 = vpop.permute.xlu1 %1311 }
 0xeff   :  { %v1319_v57 = vmul.f32 %v1312_v56, %v1283_v55 }
 0xf01   :  { %1326 = vrot.lane.b32.xlu0 %v1319_v57, %s3900_s19 }
 0xf28   :  { %v1534_v14 = vpop.f32.mrf.mxu3 }
 0xf29   :  { %v1535_v2 = vadd.f32 %v4258_v1, %v1534_v14 }
 0xf53   :  { %v1325_v13 = vpop.permute.xlu2 %1324  ;;  %v1236_v59 = vpop.f32.mrf.mxu1 }
 0xf54   :  { %v4227_v60 = vadd.f32 %v1325_v13, %v1303_v58  ;;  %v1242_v4 = vadd.f32 %v1236_v59, %v1207_v62 }
 0xf56   :  { %3690 = vtanh.f32 %v4227_v60  ;;  %v3418_v7 = vmul.f32 -1.442695, %v1242_v4 }
 0xf57   :  { %3692 = vtanh.f32 %v1242_v4 }
 0xf5b   :  { %v1238_v6 = vpop.f32.mrf.mxu1 }
 0xf5c   :  { %v3691_v5 = vpop.eup %3690  ;;  %v3429_v6 = vmul.f32 -1.442695, %v1535_v2 }
 0xf5d   :  { %1342 = vrot.lane.b32.xlu1 %v3691_v5, %s3900_s19  ;;  %v3693_v46 = vpop.eup %3692 }
 0xf65   :  { %1313 = vrot.lane.b32.xlu1 %v3693_v46, %s3899_s18 }
 0xf73   :  { %v1327_v11 = vpop.permute.xlu0 %1326 }
 0xf74   :  { %v4235_v33 = vadd.f32 %v1327_v11, %v1304_v36 }
 0xf76   :  { %3694 = vtanh.f32 %v4235_v33 }
 0xf77   :  { %3696 = vpow2.f32 %v3418_v7 }
 0xf7c   :  { %v3695_v16 = vpop.eup %3694 }
 0xf7d   :  { %1344 = vrot.lane.b32.xlu2 %v3695_v16, %s3900_s19  ;;  %v3697_v8 = vpop.eup %3696 }
 0xf7e   :  { %v1254_v45 = vadd.f32 1.0, %v3697_v8  ;;  %v1536_v8 = vpop.f32.mrf.mxu3 }
 0xf80   :  { %3698 = vrcp.f32 %v1254_v45  ;;  %v1296_v30 = vand.u32 2147483648, %v1254_v45  ;;  %vm1290_vm11 = vweird.f32 %v1254_v45  ;;  %v1294_v37 = vand.u32 2147483647, %v1254_v45 }
 0xf82   :  { %v1297_v24 = vor.u32 1.1754944e-38, %v1296_v30  ;;  %vm1295_vm13 = vcmp.eq.f32.partialorder %v1294_v37, 8.507059e+37 }
 0xf86   :  { %v3699_v18 = vpop.eup %3698 }
 0xf87   :  { %v1286_v19 = vmul.f32 %v3699_v18, %v1254_v45  ;;  %vm1291_vm2 = vweird.f32 %v3699_v18 }
 0xf88   :  { %vm1292_vm12 = vmor %vm1290_vm11, %vm1291_vm2 }
 0xf89   :  { %v1287_v42 = vsub.f32 1.0, %v1286_v19 }
 0xf8b   :  { %v1288_v20 = vmul.f32 %v3699_v18, %v1287_v42  ;;  %v1537_v42 = vadd.f32 %v4258_v1, %v1536_v8  ;;  %v1653_v8 = vld [vmem:[%s4290_s3 + $0x60] sm:$0xff] }
 0xf8d   :  { %v1289_v22 = vadd.f32 %v3699_v18, %v1288_v20 }
 0xf8f   :  { %v1293_v23 = vsel %vm1292_vm12, %v3699_v18, %v1289_v22 }
 0xf90   :  { %v1298_v25 = vsel %vm1295_vm13, %v1297_v24, %v1293_v23 }
 0xf91   :  { %v1305_v41 = vmul.f32 %v1298_v25, %v4207_v38 }
 0xfcf   :  { %v1343_v21 = vpop.permute.xlu1 %1342 }
 0xfd0   :  { %v1351_v28 = vmul.f32 %v1343_v21, %v1268_v51 }
 0xfd7   :  { %v1314_v26 = vpop.permute.xlu1 %1313  ;;  %v1345_v27 = vpop.permute.xlu2 %1344 }
 0xfd8   :  { %v1320_v29 = vmul.f32 %v1314_v26, %v1298_v25  ;;  %v1352_v31 = vmul.f32 %v1345_v27, %v1283_v55 }
 0xfda   :  { %v1358_v32 = vpack.c.bf16 %v1352_v31, %v1351_v28  ;;  %1328 = vrot.lane.b32.xlu2 %v1320_v29, %s3900_s19 }
 0xfdc   :  { %1362 = vrot.lane.b32.xlu0 %v1358_v32, %s3901_s20 }
0x1034   :  { %v1329_v43 = vpop.permute.xlu2 %1328 }
0x1035   :  { %v4248_v44 = vadd.f32 %v1329_v43, %v1305_v41 }
0x1037   :  { %3700 = vtanh.f32 %v4248_v44 }
0x103d   :  { %v3701_v0 = vpop.eup %3700 }
0x103e   :  { %1346 = vrot.lane.b32.xlu0 %v3701_v0, %s3900_s19 }
0x104e   :  { %v1363_v17 = vpop.permute.xlu0 %1362 }
0x104f   :  { %3419 = vmatmul.msk.bf16.vlgmr.msrb.gmra.mxu2 %vm318_vm15, %v1363_v17 }
0x10b0   :  { %v1347_v38 = vpop.permute.xlu0 %1346 }
0x10b1   :  { %v1353_v15 = vmul.f32 %v1347_v38, %v1298_v25  ;;  %v3426_v25 = vld [vmem:[%s3944_s13 + $0xb8] sm:$0xff] }
0x10b2   :  { %v1509_v26 = vpack.c.bf16 %v3426_v25, %v3426_v25 }
0x10b3   :  { %v1359_v47 = vpack.c.bf16 %v1353_v15, %v1353_v15 }
0x10b4   :  { %3428 = vmatmul.msk.bf16.gmra.mxu3 %vm177_vm1, %v1509_v26  ;;  %v1647_v26 = vld [vmem:[%s4290_s3 + $0x30] sm:$0xff] }
0x10b5   :  { %1364 = vrot.lane.b32.xlu1 %v1359_v47, %s3901_s20 }
0x10d2   :  { %v1381_v10 = vpop.f32.mrf.mxu2 }
0x10d3   :  { %v1390_v49 = vadd.f32 %v1381_v10, %v1355_v48 }
0x10d5   :  { %3702 = vtanh.f32 %v1390_v49  ;;  %v3421_v55 = vmul.f32 -1.442695, %v1390_v49 }
0x10da   :  { %v1383_v51 = vpop.f32.mrf.mxu2 }
0x10db   :  { %v3703_v52 = vpop.eup %3702  ;;  %v1391_v3 = vadd.f32 %v1383_v51, %v1356_v50  ;;  %v3430_v51 = vmul.f32 -1.442695, %v1537_v42 }
0x10dc   :  { %1459 = vrot.lane.b32.xlu2 %v3703_v52, %s3899_s18 }
0x10dd   :  { %3704 = vtanh.f32 %v1391_v3  ;;  %v3422_v62 = vmul.f32 -1.442695, %v1391_v3 }
0x10de   :  { %3706 = vtanh.f32 %v1535_v2 }
0x10df   :  { %3708 = vpow2.f32 %v3421_v55 }
0x10e3   :  { %v3705_v53 = vpop.eup %3704 }
0x10e4   :  { %1461 = vrot.lane.b32.xlu0 %v3705_v53, %s3899_s18  ;;  %v3707_v54 = vpop.eup %3706 }
0x10e5   :  { %v3709_v56 = vpop.eup %3708 }
0x10e6   :  { %v1402_v57 = vadd.f32 1.0, %v3709_v56 }
0x10e8   :  { %3710 = vrcp.f32 %v1402_v57  ;;  %v1416_v5 = vand.u32 2147483648, %v1402_v57  ;;  %vm1410_vm3 = vweird.f32 %v1402_v57  ;;  %v1414_v46 = vand.u32 2147483647, %v1402_v57 }
0x10e9   :  { %3712 = vpow2.f32 %v3422_v62 }
0x10ea   :  { %v1417_v16 = vor.u32 1.1754944e-38, %v1416_v5  ;;  %3714 = vpow2.f32 %v3429_v6  ;;  %vm1415_vm5 = vcmp.eq.f32.partialorder %v1414_v46, 8.507059e+37 }
0x10ec   :  { %1606 = vrot.lane.b32.xlu0 %v3707_v54, %s3899_s18 }
0x10ee   :  { %v3711_v58 = vpop.eup %3710 }
0x10ef   :  { %v1406_v13 = vmul.f32 %v3711_v58, %v1402_v57  ;;  %vm1411_vm14 = vweird.f32 %v3711_v58  ;;  %v3713_v36 = vpop.eup %3712 }
0x10f0   :  { %vm1412_vm4 = vmor %vm1410_vm3, %vm1411_vm14  ;;  %v1403_v7 = vadd.f32 1.0, %v3713_v36  ;;  %v3715_v20 = vpop.eup %3714 }
0x10f1   :  { %v1407_v61 = vsub.f32 1.0, %v1406_v13  ;;  %v1552_v21 = vadd.f32 1.0, %v3715_v20  ;;  %v1652_v20 = vld [vmem:[%s4290_s3 + $0x58] sm:$0xff] }
0x10f2   :  { %3716 = vrcp.f32 %v1403_v7  ;;  %v1431_v32 = vand.u32 2147483648, %v1403_v7  ;;  %vm1425_vm7 = vweird.f32 %v1403_v7  ;;  %v1429_v34 = vand.u32 2147483647, %v1403_v7 }
0x10f3   :  { %v1408_v63 = vmul.f32 %v3711_v58, %v1407_v61  ;;  %3718 = vtanh.f32 %v1537_v42  ;;  %vm1560_vm10 = vweird.f32 %v1552_v21  ;;  %v1566_v43 = vand.u32 2147483648, %v1552_v21  ;;  %v1651_v42 = vld [vmem:[%s4290_s3 + $0x50] sm:$0xff] }
0x10f4   :  { %3720 = vrcp.f32 %v1552_v21  ;;  %v1432_v12 = vor.u32 1.1754944e-38, %v1431_v32  ;;  %vm1430_vm9 = vcmp.eq.f32.partialorder %v1429_v34, 8.507059e+37  ;;  %v1564_v38 = vand.u32 2147483647, %v1552_v21  ;;  %v1643_v34 = vld [vmem:[%s4290_s3 + $0x10] sm:$0xff] }
0x10f5   :  { %v1409_v4 = vadd.f32 %v3711_v58, %v1408_v63  ;;  %v1567_v15 = vor.u32 1.1754944e-38, %v1566_v43  ;;  %v1642_v43 = vld [vmem:[%s4290_s3 + $0x8] sm:$0xff] }
0x10f6   :  { %vm1565_vm12 = vcmp.eq.f32.partialorder %v1564_v38, 8.507059e+37  ;;  %v1637_v38 = vld [vmem:[%s4310_s7 + $0x8] sm:$0xff] }
0x10f7   :  { %v1413_v11 = vsel %vm1412_vm4, %v3711_v58, %v1409_v4 }
0x10f8   :  { %v4265_v45 = vsel %vm1415_vm5, %v1417_v16, %v1413_v11  ;;  %v3717_v22 = vpop.eup %3716  ;;  %vm1665_vm5 = vcmask 850944  }
0x10f9   :  { %v3719_v30 = vpop.eup %3718  ;;  %v1421_v37 = vmul.f32 %v3717_v22, %v1403_v7  ;;  %vm1426_vm6 = vweird.f32 %v3717_v22  ;;  %v1453_v55 = vmul.f32 %v4265_v45, %v4227_v60  ;;  %v1357_v7 = vld [vmem:[#allocation2 + $0xb8] sm:$0xff] }
0x10fa   :  { %v3721_v24 = vpop.eup %3720  ;;  %vm1427_vm8 = vmor %vm1425_vm7, %vm1426_vm6 }
0x10fb   :  { %v1422_v23 = vsub.f32 1.0, %v1421_v37  ;;  %v1556_v28 = vmul.f32 %v3721_v24, %v1552_v21  ;;  %vm1561_vm2 = vweird.f32 %v3721_v24 }
0x10fc   :  { %vm1562_vm11 = vmor %vm1560_vm10, %vm1561_vm2 }
0x10fd   :  { %v1423_v27 = vmul.f32 %v3717_v22, %v1422_v23  ;;  %v1557_v31 = vsub.f32 1.0, %v1556_v28  ;;  %v1649_v23 = vld [vmem:[%s4290_s3 + $0x40] sm:$0xff] }
0x10ff   :  { %v1424_v29 = vadd.f32 %v3717_v22, %v1423_v27  ;;  %v1558_v39 = vmul.f32 %v3721_v24, %v1557_v31  ;;  %v1648_v27 = vld [vmem:[%s4290_s3 + $0x38] sm:$0xff]  ;;  %v1646_v31 = vld [vmem:[%s4290_s3 + $0x28] sm:$0xff] }
0x1100   :  { %v1657_v28 = vpack.c.bf16 %v1648_v27, %v1647_v26 }
0x1101   :  { %v1428_v35 = vsel %vm1427_vm8, %v3717_v22, %v1424_v29  ;;  %v1559_v17 = vadd.f32 %v3721_v24, %v1558_v39  ;;  %v1645_v29 = vld [vmem:[%s4290_s3 + $0x20] sm:$0xff] }
0x1102   :  { %v4273_v40 = vsel %vm1430_vm9, %v1432_v12, %v1428_v35  ;;  %v1656_v32 = vpack.c.bf16 %v1646_v31, %v1645_v29  ;;  %v1644_v35 = vld [vmem:[%s4290_s3 + $0x18] sm:$0xff] }
0x1103   :  { %v1563_v47 = vsel %vm1562_vm11, %v3721_v24, %v1559_v17  ;;  %v1454_v60 = vmul.f32 %v4273_v40, %v4235_v33  ;;  %v1650_v24 = vld [vmem:[%s4290_s3 + $0x48] sm:$0xff]  ;;  %v1655_v12 = vpack.c.bf16 %v1644_v35, %v1643_v34  ;;  %v1636_v17 = vld [vmem:[%s4310_s7] sm:$0xff] }
0x1104   :  { %v4277_v48 = vsel %vm1565_vm12, %v1567_v15, %v1563_v47  ;;  %v1658_v25 = vpack.c.bf16 %v1650_v24, %v1649_v23  ;;  %v1639_v15 = vpack.c.bf16 %v1637_v38, %v1636_v17 }
0x1127   :  { %v1365_v59 = vpop.permute.xlu1 %1364 }
0x1128   :  { %3420 = vmatmul.msk.bf16.gmra.mxu2 %vm318_vm15, %v1365_v59 }
0x1136   :  { %v1460_v18 = vpop.permute.xlu2 %1459 }
0x1137   :  { %v1468_v19 = vmul.f32 %v1460_v18, %v4265_v45  ;;  %v1539_v39 = vpop.f32.mrf.mxu3 }
0x1139   :  { %1474 = vrot.lane.b32.xlu1 %v1468_v19, %s3900_s19  ;;  %v1660_v19 = vpack.c.bf16 %v1653_v8, %v1653_v8  ;;  %v1638_v8 = vld [vmem:[%s4310_s7 + $0x10] sm:$0xff]  ;;  %s3358_s7 = sld [smem:[%s4727_s0 + %s3912_s4]]   ;;  %s3920_s4 = smov 3  }
0x113b   :  { %v1673_v22 = vsel %vm214_vm0, %v1660_v19, 0 }
0x113c   :  { %1676 = vmatpush.bf16.msra.mxu1 %v1673_v22  ;;  %v3528_v22 = vld [vmem:[%s4328_s15] ss:$0 sm:$0xff]  ;;  %s3916_s15 = smov 20  }
0x113f   :  { %v1541_v47 = vpop.f32.mrf.mxu3 }
0x1141   :  { %1608 = vrot.lane.b32.xlu1 %v3719_v30, %s3899_s18  ;;  %v1659_v30 = vpack.c.bf16 %v1652_v20, %v1651_v42  ;;  %v1698_v20 = vld [vmem:[%s3353_s21] sm:$0xff] }
0x1143   :  { %1677 = vmatpush.bf16.msra.mxu1 %v1659_v30 }
0x1147   :  { %1678 = vmatpush.bf16.msra.mxu1 %v1658_v25  ;;  %v1768_v25 = vld [vmem:[%s3355_s25] sm:$0xff]  ;;  %s3918_s25 = smov 23  }
0x1148   :  { %v1769_v27 = vpack.c.bf16 %v1768_v25, %v1768_v25  ;;  %s4451_s28 = sld [smem:[%s4727_s0 + %s3918_s25]]   ;;  %s3925_s25 = smov 27  }
0x114a   :  { %v1777_v31 = vsel %vm214_vm0, %v1769_v27, 0 }
0x114b   :  { %1679 = vmatpush.bf16.msra.mxu1 %v1657_v28 }
0x114f   :  { %1680 = vmatpush.bf16.msra.mxu1 %v1656_v32 }
0x1153   :  { %1681 = vmatpush.bf16.msra.mxu1 %v1655_v12 }
0x1156   :  { %v1462_v41 = vpop.permute.xlu0 %1461 }
0x1157   :  { %v1469_v0 = vmul.f32 %v1462_v41, %v4273_v40  ;;  %v1641_v41 = vld [vmem:[%s4290_s3] sm:$0xff]  ;;  %s3357_s3 = sld [smem:[%s4727_s0 + %s3900_s19]]  }
0x1159   :  { %1476 = vrot.lane.b32.xlu2 %v1469_v0, %s3900_s19  ;;  %v1654_v0 = vpack.c.bf16 %v1642_v43, %v1641_v41 }
0x115b   :  { %1682 = vmatpush.bf16.msra.mxu1 %v1654_v0 }
0x115e   :  { %v1607_v10 = vpop.permute.xlu0 %1606  ;;  %3432 = vmatmul.msk.bf16.vlgmr.msra.gmra.mxu1 %vm1665_vm5, %v1639_v15 }
0x115f   :  { %v1615_v49 = vmul.f32 %v1607_v10, %v4277_v48  ;;  %1786 = vmatpush.bf16.msrb.mxu1 %v1777_v31 }
0x1161   :  { %3722 = vtanh.f32 %v1615_v49 }
0x1162   :  { %3724 = vpow2.f32 %v3430_v51 }
0x1167   :  { %v3723_v50 = vpop.eup %3722 }
0x1168   :  { %1624 = vrot.lane.b32.xlu1 %v3723_v50, %s3904_s29  ;;  %v3725_v52 = vpop.eup %3724 }
0x1169   :  { %v1553_v3 = vadd.f32 1.0, %v3725_v52 }
0x116b   :  { %3726 = vrcp.f32 %v1553_v3  ;;  %vm1575_vm13 = vweird.f32 %v1553_v3  ;;  %v1581_v58 = vand.u32 2147483648, %v1553_v3  ;;  %v1579_v61 = vand.u32 2147483647, %v1553_v3 }
0x116d   :  { %v1582_v62 = vor.u32 1.1754944e-38, %v1581_v58  ;;  %vm1580_vm4 = vcmp.eq.f32.partialorder %v1579_v61, 8.507059e+37 }
0x1171   :  { %v3727_v14 = vpop.eup %3726 }
0x1172   :  { %v1571_v2 = vmul.f32 %v3727_v14, %v1553_v3  ;;  %vm1576_vm14 = vweird.f32 %v3727_v14  ;;  %v1540_v3 = vadd.f32 %v4258_v1, %v1539_v39 }
0x1173   :  { %vm1577_vm3 = vmor %vm1575_vm13, %vm1576_vm14 }
0x1174   :  { %v1572_v53 = vsub.f32 1.0, %v1571_v2 }
0x1176   :  { %v1573_v54 = vmul.f32 %v3727_v14, %v1572_v53 }
0x1178   :  { %v1574_v59 = vadd.f32 %v3727_v14, %v1573_v54 }
0x117a   :  { %v1578_v63 = vsel %vm1577_vm3, %v3727_v14, %v1574_v59 }
0x117b   :  { %v4283_v5 = vsel %vm1580_vm4, %v1582_v62, %v1578_v63 }
0x11ab   :  { %v1386_v56 = vpop.f32.mrf.mxu2  ;;  %v1475_v57 = vpop.permute.xlu1 %1474 }
0x11ac   :  { %v1483_v13 = vadd.f32 %v1475_v57, %v1453_v55  ;;  %v1392_v33 = vadd.f32 %v1386_v56, %v1357_v7  ;;  %v1703_v55 = vld [vmem:[%s3354_s11] sm:$0xff]  ;;  %v1704_v56 = vld [vmem:[%s3354_s11 + $0x8] sm:$0xff]  ;;  %s3915_s11 = smov 19  }
0x11ad   :  { %v1705_v57 = vpack.c.bf16 %v1704_v56, %v1703_v55  ;;  %s3360_s14 = sld [smem:[%s4727_s0 + %s3915_s11]]   ;;  %s3922_s11 = smov 25  }
0x11ae   :  { %3728 = vtanh.f32 %v1483_v13  ;;  %v3423_v10 = vmul.f32 -1.442695, %v1392_v33 }
0x11af   :  { %1725 = vmatpush.bf16.msra.mxu2 %v1705_v57 }
0x11b3   :  { %v1388_v4 = vpop.f32.mrf.mxu2  ;;  %v1609_v6 = vpop.permute.xlu1 %1608 }
0x11b4   :  { %v1616_v46 = vmul.f32 %v1609_v6, %v4283_v5  ;;  %v1477_v36 = vpop.permute.xlu2 %1476  ;;  %v3729_v11 = vpop.eup %3728 }
0x11b5   :  { %v1484_v16 = vadd.f32 %v1477_v36, %v1454_v60  ;;  %1492 = vrot.lane.b32.xlu2 %v3729_v11, %s3900_s19 }
0x11b6   :  { %3730 = vtanh.f32 %v1616_v46 }
0x11b7   :  { %3732 = vtanh.f32 %v1484_v16 }
0x11b8   :  { %3734 = vtanh.f32 %v1392_v33 }
0x11b9   :  { %3736 = vpow2.f32 %v3423_v10 }
0x11ba   :  { %3738 = vtanh.f32 %v1540_v3 }
0x11bc   :  { %v3731_v18 = vpop.eup %3730 }
0x11bd   :  { %v3733_v21 = vpop.eup %3732  ;;  %1626 = vrot.lane.b32.xlu2 %v3731_v18, %s3904_s29  ;;  %v1640_v18 = vpack.c.bf16 %v1638_v8, %v1638_v8 }
0x11be   :  { %1494 = vrot.lane.b32.xlu0 %v3733_v21, %s3900_s19  ;;  %v3735_v37 = vpop.eup %3734  ;;  %v1699_v21 = vld [vmem:[%s3353_s21 + $0x8] sm:$0xff]  ;;  %s3917_s21 = smov 21  }
0x11bf   :  { %v3737_v51 = vpop.eup %3736  ;;  %3433 = vmatmul.msk.bf16.gmra.mxu1 %vm1665_vm5, %v1640_v18  ;;  %v1700_v30 = vpack.c.bf16 %v1699_v21, %v1698_v20  ;;  %s3362_s24 = sld [smem:[%s4727_s0 + %s3917_s21]]   ;;  %s3924_s21 = smov 26  }
0x11c0   :  { %v1404_v53 = vadd.f32 1.0, %v3737_v51  ;;  %v3739_v1 = vpop.eup %3738 }
0x11c1   :  { %1755 = vmatpush.bf16.msra.mxu3 %v1700_v30 }
0x11c2   :  { %3740 = vrcp.f32 %v1404_v53  ;;  %v1446_v6 = vand.u32 2147483648, %v1404_v53  ;;  %vm1440_vm7 = vweird.f32 %v1404_v53  ;;  %v1444_v60 = vand.u32 2147483647, %v1404_v53 }
0x11c4   :  { %v1447_v36 = vor.u32 1.1754944e-38, %v1446_v6  ;;  %vm1445_vm9 = vcmp.eq.f32.partialorder %v1444_v60, 8.507059e+37 }
0x11c5   :  { %1463 = vrot.lane.b32.xlu2 %v3735_v37, %s3899_s18 }
0x11da   :  { %v1625_v50 = vpop.permute.xlu1 %1624 }
0x11db   :  { %v1633_v14 = vmul.f32 %v1625_v50, %v4277_v48  ;;  %v3741_v48 = vpop.eup %3740  ;;  %v1684_v42 = vpop.f32.mrf.mxu1 }
0x11dc   :  { %v1436_v58 = vmul.f32 %v3741_v48, %v1404_v53  ;;  %vm1441_vm6 = vweird.f32 %v3741_v48  ;;  %v1685_v23 = vadd.f32 %v3528_v22, %v1684_v42 }
0x11dd   :  { %vm1442_vm8 = vmor %vm1440_vm7, %vm1441_vm6 }
0x11de   :  { %v1437_v13 = vsub.f32 1.0, %v1436_v58  ;;  %v1693_v28 = vmax.f32 %v1685_v23, 0.0 }
0x11e0   :  { %v1438_v59 = vmul.f32 %v3741_v48, %v1437_v13  ;;  %v1814_v13 = vld [vmem:[%s3357_s3 + $0x10] sm:$0xff] }
0x11e2   :  { %v1439_v4 = vadd.f32 %v3741_v48, %v1438_v59  ;;  %v1815_v59 = vld [vmem:[%s3357_s3 + $0x18] sm:$0xff] }
0x11e3   :  { %v1686_v26 = vpop.f32.mrf.mxu1 }
0x11e4   :  { %v1443_v46 = vsel %vm1442_vm8, %v3741_v48, %v1439_v4  ;;  %v1687_v29 = vadd.f32 %v3528_v22, %v1686_v26  ;;  %v1812_v4 = vld [vmem:[%s3357_s3] sm:$0xff] }
0x11e5   :  { %v4335_v16 = vsel %vm1445_vm9, %v1447_v36, %v1443_v46 }
0x11e6   :  { %v1694_v34 = vmax.f32 %v1687_v29, 0.0  ;;  %v1455_v50 = vmul.f32 %v4335_v16, %v4248_v44 }
0x11e8   :  { %v1766_v35 = vpack.c.bf16 %v1694_v34, %v1693_v28 }
0x11ea   :  { %3438 = vmatmul.msk.bf16.vlgmr.msrb.gmra.mxu1 %vm177_vm1, %v1766_v35 }
0x120f   :  { %v1493_v49 = vpop.permute.xlu2 %1492 }
0x1210   :  { %v1501_v62 = vmul.f32 %v1493_v49, %v4265_v45 }
0x1217   :  { %v1627_v52 = vpop.permute.xlu2 %1626 }
0x1218   :  { %v1634_v2 = vmul.f32 %v1627_v52, %v4283_v5 }
0x121a   :  { %v1701_v54 = vpack.c.bf16 %v1634_v2, %v1633_v14 }
0x121c   :  { %1708 = vrot.lane.b32.xlu0 %v1701_v54, %s3901_s20 }
0x121f   :  { %v1464_v11 = vpop.permute.xlu2 %1463 }
0x1220   :  { %v1470_v45 = vmul.f32 %v1464_v11, %v4335_v16 }
0x1224   :  { %1610 = vrot.lane.b32.xlu0 %v3739_v1, %s3899_s18  ;;  %s3361_s18 = sld [smem:[%s4727_s0 + %s3916_s15]]   ;;  %s3923_s15 = smov 2  }
0x1230   :  { %v1495_v61 = vpop.permute.xlu0 %1494 }
0x1231   :  { %v1502_v63 = vmul.f32 %v1495_v61, %v4273_v40  ;;  %v3431_v40 = vmul.f32 -1.442695, %v1540_v3  ;;  %v1852_v61 = vld [vmem:[%s3358_s7 + $0x10] sm:$0xff] }
0x1233   :  { %v1696_v5 = vpack.c.bf16 %v1502_v63, %v1501_v62  ;;  %3742 = vpow2.f32 %v3431_v40  ;;  %v1817_v62 = vpack.c.bf16 %v1815_v59, %v1814_v13  ;;  %v1853_v63 = vld [vmem:[%s3358_s7 + $0x18] sm:$0xff] }
0x1234   :  { %v1855_v6 = vpack.c.bf16 %v1853_v63, %v1852_v61 }
0x1235   :  { %1738 = vrot.lane.b32.xlu1 %v1696_v5, %s3901_s20  ;;  %v1813_v5 = vld [vmem:[%s3357_s3 + $0x8] sm:$0xff]  ;;  %1835 = vmatpush.bf16.msrb.mxu2 %v1817_v62 }
0x1236   :  { %v1816_v60 = vpack.c.bf16 %v1813_v5, %v1812_v4  ;;  %1865 = vmatpush.bf16.msrb.mxu3 %v1855_v6  ;;  %1996 = vmatpush.bf16.msra.mxu1 %v1855_v6 }
0x1239   :  { %v3743_v7 = vpop.eup %3742  ;;  %1836 = vmatpush.bf16.msrb.mxu2 %v1816_v60 }
0x123a   :  { %v1554_v33 = vadd.f32 1.0, %v3743_v7 }
0x123c   :  { %3744 = vrcp.f32 %v1554_v33  ;;  %vm1590_vm10 = vweird.f32 %v1554_v33  ;;  %v1596_v12 = vand.u32 2147483648, %v1554_v33  ;;  %v1594_v43 = vand.u32 2147483647, %v1554_v33  ;;  %v1689_v2 = vpop.f32.mrf.mxu1 }
0x123d   :  { %1478 = vrot.lane.b32.xlu1 %v1470_v45, %s3900_s19  ;;  %v1690_v54 = vadd.f32 %v3528_v22, %v1689_v2  ;;  %v1851_v45 = vld [vmem:[%s3358_s7 + $0x8] sm:$0xff]  ;;  %v3529_v22 = vld [vmem:[%s4356_s30] ss:$0 sm:$0xff]  ;;  %s3919_s30 = smov 24  }
0x123e   :  { %v1597_v0 = vor.u32 1.1754944e-38, %v1596_v12  ;;  %vm1595_vm12 = vcmp.eq.f32.partialorder %v1594_v43, 8.507059e+37  ;;  %s3365_s3 = sld [smem:[%s4727_s0 + %s3919_s30]]   ;;  %s3926_s30 = smov 29  }
0x123f   :  { %v1695_v56 = vmax.f32 %v1690_v54, 0.0 }
0x1241   :  { %v1767_v57 = vpack.c.bf16 %v1695_v56, %v1695_v56 }
0x1242   :  { %v3745_v19 = vpop.eup %3744 }
0x1243   :  { %v1586_v37 = vmul.f32 %v3745_v19, %v1554_v33  ;;  %vm1591_vm2 = vweird.f32 %v3745_v19  ;;  %3439 = vmatmul.msk.bf16.gmra.mxu1 %vm177_vm1, %v1767_v57  ;;  %vm1822_vm1 = vcmask 261120  }
0x1244   :  { %vm1592_vm11 = vmor %vm1590_vm10, %vm1591_vm2  ;;  %v1691_v1 = vpop.f32.mrf.mxu1 }
0x1245   :  { %v1587_v24 = vsub.f32 1.0, %v1586_v37 }
0x1247   :  { %v1588_v32 = vmul.f32 %v3745_v19, %v1587_v24 }
0x1249   :  { %v1589_v41 = vadd.f32 %v3745_v19, %v1588_v32 }
0x124b   :  { %v1593_v17 = vsel %vm1592_vm11, %v3745_v19, %v1589_v41 }
0x124c   :  { %v1598_v38 = vsel %vm1595_vm12, %v1597_v0, %v1593_v17 }
0x1267   :  { %v1788_v11 = vpop.f32.mrf.mxu1 }
0x126f   :  { %v1790_v18 = vpop.f32.mrf.mxu1 }
0x128e   :  { %v1709_v39 = vpop.permute.xlu0 %1708 }
0x128f   :  { %3434 = vmatmul.msk.bf16.vlgmr.msra.gmra.mxu2 %vm318_vm15, %v1709_v39 }
0x1296   :  { %v1611_v15 = vpop.permute.xlu0 %1610 }
0x1297   :  { %v1617_v47 = vmul.f32 %v1611_v15, %v1598_v38 }
0x1299   :  { %3746 = vtanh.f32 %v1617_v47 }
0x129f   :  { %v3747_v10 = vpop.eup %3746 }
0x12a0   :  { %1628 = vrot.lane.b32.xlu2 %v3747_v10, %s3904_s29 }
0x12a7   :  { %v1739_v49 = vpop.permute.xlu1 %1738 }
0x12a8   :  { %3436 = vmatmul.msk.bf16.vlgmr.msra.gmra.mxu3 %vm318_vm15, %v1739_v49 }
0x12af   :  { %v1479_v51 = vpop.permute.xlu1 %1478 }
0x12b0   :  { %v1485_v52 = vadd.f32 %v1479_v51, %v1455_v50 }
0x12b2   :  { %3748 = vtanh.f32 %v1485_v52 }
0x12b8   :  { %v3749_v3 = vpop.eup %3748 }
0x12b9   :  { %1496 = vrot.lane.b32.xlu0 %v3749_v3, %s3900_s19  ;;  %s3913_s19 = smov 18  }
0x12ba   :  { %s3359_s9 = sld [smem:[%s4727_s0 + %s3913_s19]]   ;;  %s3921_s19 = smov 22  }
0x12c0   :  { %v1793_v25 = vpop.f32.mrf.mxu1  ;;  %v4380_v0 = vld [vmem:[%s3359_s9] ss:$0 sm:$0xff]  ;;  %s4472_s9 = sld [smem:[%s4727_s0 + %s3921_s19]]   ;;  %s3928_s19 = smov 30  }
0x12c8   :  { %v1795_v27 = vpop.f32.mrf.mxu1 }
0x12fa   :  { %v1629_v14 = vpop.permute.xlu2 %1628 }
0x12fb   :  { %v1635_v53 = vmul.f32 %v1629_v14, %v1598_v38 }
0x12fd   :  { %v1702_v55 = vpack.c.bf16 %v1635_v53, %v1635_v53 }
0x12ff   :  { %1710 = vrot.lane.b32.xlu1 %v1702_v55, %s3901_s20 }
0x1312   :  { %v1727_v36 = vpop.f32.mrf.mxu2 }
0x131a   :  { %v1729_v33 = vpop.f32.mrf.mxu2 }
0x132b   :  { %v1497_v48 = vpop.permute.xlu0 %1496  ;;  %v1757_v46 = vpop.f32.mrf.mxu3 }
0x132c   :  { %v1503_v44 = vmul.f32 %v1497_v48, %v4335_v16  ;;  %v1850_v16 = vld [vmem:[%s3358_s7] sm:$0xff]  ;;  %v1758_v42 = vadd.f32 %v1757_v46, %v1727_v36  ;;  %s4467_s7 = sld [smem:[%s4727_s0 + %s3920_s4]]   ;;  %s3927_s4 = smov 28  }
0x132d   :  { %v1854_v40 = vpack.c.bf16 %v1851_v45, %v1850_v16 }
0x132e   :  { %v1697_v58 = vpack.c.bf16 %v1503_v44, %v1503_v44  ;;  %v1797_v21 = vadd.f32 %v1788_v11, %v1758_v42 }
0x132f   :  { %1866 = vmatpush.bf16.msrb.mxu3 %v1854_v40  ;;  %1997 = vmatpush.bf16.msra.mxu1 %v1854_v40 }
0x1330   :  { %1740 = vrot.lane.b32.xlu2 %v1697_v58, %s3901_s20  ;;  %v1804_v37 = vadd.f32 %v3529_v22, %v1797_v21 }
0x1332   :  { %v1807_v24 = vmax.f32 %v1804_v37, 0.0 }
0x1333   :  { %v1759_v7 = vpop.f32.mrf.mxu3  ;;  %1930 = vmatpush.bf16.msra.mxu3 %v1855_v6 }
0x1334   :  { %v1760_v8 = vadd.f32 %v1759_v7, %v1729_v33 }
0x1336   :  { %v1798_v20 = vadd.f32 %v1790_v18, %v1760_v8 }
0x1337   :  { %1931 = vmatpush.bf16.msra.mxu3 %v1854_v40 }
0x1338   :  { %v1805_v30 = vadd.f32 %v3529_v22, %v1798_v20 }
0x133a   :  { %v1808_v23 = vmax.f32 %v1805_v30, 0.0 }
0x133c   :  { %v1810_v26 = vpack.c.bf16 %v1808_v23, %v1807_v24 }
0x1371   :  { %v1711_v19 = vpop.permute.xlu1 %1710 }
0x1372   :  { %3435 = vmatmul.msk.bf16.gmra.mxu2 %vm318_vm15, %v1711_v19 }
0x1382   :  { %3440 = vmatmul.msk.bf16.vlgmr.msrb.gmra.mxu2 %vm1822_vm1, %v1810_v26 }
0x138a   :  { %v1741_v28 = vpop.permute.xlu2 %1740 }
0x138b   :  { %3437 = vmatmul.msk.bf16.gmra.mxu3 %vm318_vm15, %v1741_v28 }
0x139b   :  { %1867 = vmatmul.bf16.vlgmr.msrb.gmra.mxu3 %v3898_v9 }
0x13f5   :  { %v1732_v29 = vpop.f32.mrf.mxu2 }
0x13fd   :  { %v1734_v31 = vpop.f32.mrf.mxu2 }
0x1405   :  { %v1838_v17 = vpop.f32.mrf.mxu2 }
0x1406   :  { %v1839_v38 = vadd.f32 %v4380_v0, %v1838_v17  ;;  %v2091_v17 = vld [vmem:[%s3361_s18 + $0x10] sm:$0xff] }
0x140d   :  { %v1840_v55 = vpop.f32.mrf.mxu2 }
0x140e   :  { %v1762_v32 = vpop.f32.mrf.mxu3  ;;  %v1841_v11 = vadd.f32 %v4380_v0, %v1840_v55 }
0x140f   :  { %v1763_v34 = vadd.f32 %v1762_v32, %v1732_v29 }
0x1411   :  { %v1799_v35 = vadd.f32 %v1793_v25, %v1763_v34 }
0x1413   :  { %v1806_v39 = vadd.f32 %v3529_v22, %v1799_v35  ;;  %v2054_v35 = vld [vmem:[%s3360_s14 + $0x10] sm:$0xff] }
0x1415   :  { %v1809_v12 = vmax.f32 %v1806_v39, 0.0  ;;  %v2055_v39 = vld [vmem:[%s3360_s14 + $0x18] sm:$0xff] }
0x1416   :  { %v1764_v41 = vpop.f32.mrf.mxu3 }
0x1417   :  { %v1811_v43 = vpack.c.bf16 %v1809_v12, %v1809_v12  ;;  %v2052_v12 = vld [vmem:[%s3360_s14] sm:$0xff]  ;;  %v2057_v41 = vpack.c.bf16 %v2055_v39, %v2054_v35 }
0x1419   :  { %3441 = vmatmul.msk.bf16.gmra.mxu2 %vm1822_vm1, %v1811_v43  ;;  %v2053_v43 = vld [vmem:[%s3360_s14 + $0x8] sm:$0xff]  ;;  %s3366_s14 = sld [smem:[%s4727_s0 + %s3922_s11]]   ;;  %s3929_s11 = smov 31  }
0x141a   :  { %2074 = vmatpush.bf16.msra.mxu2 %v2057_v41 }
0x141e   :  { %v1868_v15 = vpop.f32.mrf.mxu3 }
0x141f   :  { %v1872_v47 = vadd.f32 %v1868_v15, %v1839_v38  ;;  %v2092_v38 = vld [vmem:[%s3361_s18 + $0x18] sm:$0xff] }
0x1420   :  { %v2094_v15 = vpack.c.bf16 %v2092_v38, %v2091_v17 }
0x1421   :  { %3750 = vtanh.f32 %v1872_v47  ;;  %v3442_v50 = vmul.f32 -1.442695, %v1872_v47  ;;  %v2056_v47 = vpack.c.bf16 %v2053_v43, %v2052_v12 }
0x1422   :  { %2102 = vmatpush.bf16.msrb.mxu3 %v2094_v15  ;;  %2162 = vmatpush.bf16.msrb.mxu1 %v2094_v15 }
0x1423   :  { %3752 = vpow2.f32 %v3442_v50  ;;  %2075 = vmatpush.bf16.msra.mxu2 %v2056_v47  ;;  %v2089_v50 = vld [vmem:[%s3361_s18] sm:$0xff] }
0x1426   :  { %v1870_v10 = vpop.f32.mrf.mxu3 }
0x1427   :  { %v3751_v49 = vpop.eup %3750 }
0x1428   :  { %1895 = vrot.lane.b32.xlu0 %v3751_v49, %s3904_s29 }
0x1429   :  { %v3753_v51 = vpop.eup %3752 }
0x142a   :  { %v1876_v52 = vadd.f32 1.0, %v3753_v51  ;;  %v2090_v51 = vld [vmem:[%s3361_s18 + $0x8] sm:$0xff]  ;;  %s3344_s18 = sld [smem:[%s4727_s0 + %s3923_s15]]  }
0x142c   :  { %3754 = vrcp.f32 %v1876_v52  ;;  %v1888_v56 = vand.u32 2147483648, %v1876_v52  ;;  %vm1882_vm13 = vweird.f32 %v1876_v52  ;;  %v1886_v57 = vand.u32 2147483647, %v1876_v52 }
0x142e   :  { %v1889_v48 = vor.u32 1.1754944e-38, %v1888_v56  ;;  %vm1887_vm3 = vcmp.eq.f32.partialorder %v1886_v57, 8.507059e+37  ;;  %v4413_v56 = vld [vmem:[%s3362_s24] ss:$0 sm:$0xff]  ;;  %s3367_s24 = sld [smem:[%s4727_s0 + %s3924_s21]]  }
0x1432   :  { %v3755_v3 = vpop.eup %3754 }
0x1433   :  { %v1878_v14 = vmul.f32 %v3755_v3, %v1876_v52  ;;  %vm1883_vm15 = vweird.f32 %v3755_v3  ;;  %v2093_v52 = vpack.c.bf16 %v2090_v51, %v2089_v50 }
0x1434   :  { %vm1884_vm14 = vmor %vm1882_vm13, %vm1883_vm15 }
0x1435   :  { %v1879_v2 = vsub.f32 1.0, %v1878_v14  ;;  %2103 = vmatpush.bf16.msrb.mxu3 %v2093_v52  ;;  %2163 = vmatpush.bf16.msrb.mxu1 %v2093_v52 }
0x1437   :  { %v1880_v53 = vmul.f32 %v3755_v3, %v1879_v2 }
0x1439   :  { %v1881_v54 = vadd.f32 %v3755_v3, %v1880_v53 }
0x143b   :  { %v1885_v1 = vsel %vm1884_vm14, %v3755_v3, %v1881_v54 }
0x143c   :  { %v1890_v58 = vsel %vm1887_vm3, %v1889_v48, %v1885_v1 }
0x143d   :  { %v1893_v62 = vmul.f32 0.0, %v1890_v58 }
0x149a   :  { %v1896_v44 = vpop.permute.xlu0 %1895 }
0x149b   :  { %v1898_v13 = vmul.f32 %v1896_v44, %v1890_v58 }
0x149c   :  { %v4385_v59 = vpop.f32.mrf.mxu2 }
0x149d   :  { %1900 = vrot.lane.b32.xlu1 %v1898_v13, %s3904_s29 }
0x14a4   :  { %v1845_v61 = vpop.f32.mrf.mxu2 }
0x150f   :  { %v1901_v63 = vpop.permute.xlu1 %1900 }
0x1510   :  { %v1903_v4 = vadd.f32 %v1901_v63, %v1893_v62 }
0x1512   :  { %3756 = vtanh.f32 %v1903_v4 }
0x1518   :  { %v3757_v5 = vpop.eup %3756 }
0x1519   :  { %1906 = vrot.lane.b32.xlu2 %v3757_v5, %s3904_s29 }
0x1573   :  { %v1907_v6 = vpop.permute.xlu2 %1906 }
0x1574   :  { %v1909_v60 = vmul.f32 %v1907_v6, %v1890_v58 }
0x1576   :  { %v1917_v46 = vpack.c.bf16 %v1909_v60, %v1909_v60 }
0x1578   :  { %1919 = vrot.lane.b32.xlu0 %v1917_v46, %s3914_s10 }
0x15ea   :  { %v1920_v36 = vpop.permute.xlu0 %1919 }
0x15eb   :  { %3443 = vmatmul.msk.bf16.vlgmr.msra.gmra.mxu3 %vm1822_vm1, %v1920_v36 }
0x15ec   :  { %2222 = vmatpush.bf16.msra.mxu3 %v2094_v15 }
0x15f0   :  { %2223 = vmatpush.bf16.msra.mxu3 %v2093_v52 }
0x15fb   :  { %2104 = vmatmul.bf16.vlgmr.msrb.gmra.mxu3 %v3898_v9 }
0x166e   :  { %v1933_v16 = vpop.f32.mrf.mxu3 }
0x166f   :  { %v1937_v45 = vadd.f32 %v1933_v16, %v1841_v11 }
0x1671   :  { %3758 = vtanh.f32 %v1937_v45  ;;  %v3444_v33 = vmul.f32 -1.442695, %v1937_v45 }
0x1673   :  { %3760 = vpow2.f32 %v3444_v33 }
0x1676   :  { %v1935_v40 = vpop.f32.mrf.mxu3 }
0x1677   :  { %v3759_v7 = vpop.eup %3758 }
0x1678   :  { %1960 = vrot.lane.b32.xlu1 %v3759_v7, %s3904_s29 }
0x1679   :  { %v3761_v8 = vpop.eup %3760 }
0x167a   :  { %v1941_v18 = vadd.f32 1.0, %v3761_v8 }
0x167c   :  { %3762 = vrcp.f32 %v1941_v18  ;;  %v1953_v30 = vand.u32 2147483648, %v1941_v18  ;;  %vm1947_vm6 = vweird.f32 %v1941_v18  ;;  %v1951_v37 = vand.u32 2147483647, %v1941_v18 }
0x167e   :  { %v1954_v24 = vor.u32 1.1754944e-38, %v1953_v30  ;;  %vm1952_vm8 = vcmp.eq.f32.partialorder %v1951_v37, 8.507059e+37  ;;  %v2105_v54 = vpop.f32.mrf.mxu3 }
0x1680   :  { %1911 = vrot.lane.b32.xlu1 %v1909_v60, %s3914_s10 }
0x1682   :  { %v3763_v19 = vpop.eup %3762 }
0x1683   :  { %v1943_v42 = vmul.f32 %v3763_v19, %v1941_v18  ;;  %vm1948_vm4 = vweird.f32 %v3763_v19 }
0x1684   :  { %vm1949_vm7 = vmor %vm1947_vm6, %vm1948_vm4 }
0x1685   :  { %v1944_v20 = vsub.f32 1.0, %v1943_v42 }
0x1686   :  { %v2107_v55 = vpop.f32.mrf.mxu3 }
0x1687   :  { %v1945_v21 = vmul.f32 %v3763_v19, %v1944_v20  ;;  %v1844_v20 = vadd.f32 %v4380_v0, %v4385_v59 }
0x1689   :  { %v1946_v22 = vadd.f32 %v3763_v19, %v1945_v21 }
0x168b   :  { %v1950_v23 = vsel %vm1949_vm7, %v3763_v19, %v1946_v22 }
0x168c   :  { %v1955_v26 = vsel %vm1952_vm8, %v1954_v24, %v1950_v23 }
0x168d   :  { %v1958_v29 = vmul.f32 %v1955_v26, %v1903_v4 }
0x16ea   :  { %v1961_v25 = vpop.permute.xlu1 %1960 }
0x16eb   :  { %v1963_v27 = vmul.f32 %v1961_v25, %v1955_v26 }
0x16ed   :  { %1965 = vrot.lane.b32.xlu2 %v1963_v27, %s3904_s29 }
0x16f2   :  { %v1912_v28 = vpop.permute.xlu1 %1911 }
0x16f3   :  { %1914 = vst.msk [vmem:[#allocation4] sm:$0xff] %vm1822_vm1, %v1912_v28 }
0x16fa   :  { %v2047_v14 = vld [vmem:[#allocation4] sm:$0xff] }
0x1747   :  { %v1966_v31 = vpop.permute.xlu2 %1965 }
0x1748   :  { %v4396_v32 = vadd.f32 %v1966_v31, %v1958_v29 }
0x174a   :  { %3764 = vtanh.f32 %v4396_v32 }
0x1750   :  { %v3765_v34 = vpop.eup %3764 }
0x1751   :  { %1971 = vrot.lane.b32.xlu0 %v3765_v34, %s3904_s29 }
0x17c3   :  { %v1972_v10 = vpop.permute.xlu0 %1971 }
0x17c4   :  { %v1974_v49 = vmul.f32 %v1972_v10, %v1955_v26 }
0x17c6   :  { %1976 = vrot.lane.b32.xlu2 %v1974_v49, %s3914_s10  ;;  %v1983_v58 = vpack.c.bf16 %v1974_v49, %v1974_v49 }
0x1820   :  { %v1977_v3 = vpop.permute.xlu2 %1976 }
0x1821   :  { %1980 = vst.msk [vmem:[#allocation4 + $0x8] sm:$0xff] %vm1822_vm1, %v1977_v3 }
0x1828   :  { %v2048_v2 = vld [vmem:[#allocation4 + $0x8] sm:$0xff] }
0x1829   :  { %v2050_v53 = vpack.c.bf16 %v2048_v2, %v2047_v14 }
0x182b   :  { %3447 = vmatmul.msk.bf16.vlgmr.msra.gmra.mxu2 %vm1822_vm1, %v2050_v53 }
0x18ae   :  { %v2077_v57 = vpop.f32.mrf.mxu2 }
0x18af   :  { %v2078_v1 = vadd.f32 %v4413_v56, %v2077_v57 }
0x18b1   :  { %v2109_v48 = vadd.f32 %v2105_v54, %v2078_v1 }
0x18b3   :  { %3766 = vtanh.f32 %v2109_v48  ;;  %v3449_v13 = vmul.f32 -1.442695, %v2109_v48 }
0x18b5   :  { %3768 = vpow2.f32 %v3449_v13 }
0x18b6   :  { %v2079_v47 = vpop.f32.mrf.mxu2 }
0x18b7   :  { %v2080_v10 = vadd.f32 %v4413_v56, %v2079_v47  ;;  %v2287_v47 = vld [vmem:[%s4451_s28 + $0x58] sm:$0xff] }
0x18b9   :  { %v3767_v44 = vpop.eup %3766 }
0x18ba   :  { %2132 = vrot.lane.b32.xlu0 %v3767_v44, %s3904_s29 }
0x18bb   :  { %v3769_v61 = vpop.eup %3768 }
0x18bc   :  { %v2113_v62 = vadd.f32 1.0, %v3769_v61 }
0x18be   :  { %3770 = vrcp.f32 %v2113_v62  ;;  %v2125_v46 = vand.u32 2147483648, %v2113_v62  ;;  %vm2119_vm10 = vweird.f32 %v2113_v62  ;;  %v2123_v36 = vand.u32 2147483647, %v2113_v62 }
0x18c0   :  { %v2126_v16 = vor.u32 1.1754944e-38, %v2125_v46  ;;  %vm2124_vm11 = vcmp.eq.f32.partialorder %v2123_v36, 8.507059e+37 }
0x18c2   :  { %1985 = vrot.lane.b32.xlu0 %v1983_v58, %s3914_s10 }
0x18c4   :  { %v3771_v63 = vpop.eup %3770 }
0x18c5   :  { %v2115_v4 = vmul.f32 %v3771_v63, %v2113_v62  ;;  %vm2120_vm9 = vweird.f32 %v3771_v63 }
0x18c6   :  { %vm2121_vm2 = vmor %vm2119_vm10, %vm2120_vm9 }
0x18c7   :  { %v2116_v5 = vsub.f32 1.0, %v2115_v4 }
0x18c9   :  { %v2117_v6 = vmul.f32 %v3771_v63, %v2116_v5 }
0x18cb   :  { %v2118_v60 = vadd.f32 %v3771_v63, %v2117_v6 }
0x18cd   :  { %v2122_v11 = vsel %vm2121_vm2, %v3771_v63, %v2118_v60 }
0x18ce   :  { %v2127_v40 = vsel %vm2124_vm11, %v2126_v16, %v2122_v11 }
0x18cf   :  { %v2130_v8 = vmul.f32 0.0, %v2127_v40 }
0x192c   :  { %v2133_v45 = vpop.permute.xlu0 %2132 }
0x192d   :  { %v2135_v7 = vmul.f32 %v2133_v45, %v2127_v40 }
0x192f   :  { %2137 = vrot.lane.b32.xlu1 %v2135_v7, %s3904_s29 }
0x1934   :  { %v1986_v33 = vpop.permute.xlu0 %1985 }
0x1935   :  { %3445 = vmatmul.msk.bf16.vlgmr.msra.gmra.mxu1 %vm1822_vm1, %v1986_v33 }
0x19a1   :  { %v2138_v18 = vpop.permute.xlu1 %2137 }
0x19a2   :  { %v4420_v19 = vadd.f32 %v2138_v18, %v2130_v8 }
0x19a4   :  { %3772 = vtanh.f32 %v4420_v19 }
0x19aa   :  { %v3773_v42 = vpop.eup %3772 }
0x19ab   :  { %2143 = vrot.lane.b32.xlu2 %v3773_v42, %s3904_s29 }
0x19b2   :  { %v1999_v21 = vpop.f32.mrf.mxu1 }
0x19b3   :  { %v2003_v22 = vadd.f32 %v1999_v21, %v1844_v20 }
0x19b5   :  { %3774 = vtanh.f32 %v2003_v22  ;;  %v3446_v23 = vmul.f32 -1.442695, %v2003_v22 }
0x19b7   :  { %3776 = vpow2.f32 %v3446_v23 }
0x19ba   :  { %v2001_v30 = vpop.f32.mrf.mxu1 }
0x19bb   :  { %v3775_v37 = vpop.eup %3774 }
0x19bc   :  { %2026 = vrot.lane.b32.xlu2 %v3775_v37, %s3904_s29 }
0x19bd   :  { %v3777_v24 = vpop.eup %3776 }
0x19be   :  { %v2007_v25 = vadd.f32 1.0, %v3777_v24 }
0x19c0   :  { %3778 = vrcp.f32 %v2007_v25  ;;  %v2019_v35 = vand.u32 2147483648, %v2007_v25  ;;  %vm2013_vm15 = vweird.f32 %v2007_v25  ;;  %v2017_v39 = vand.u32 2147483647, %v2007_v25 }
0x19c2   :  { %v2020_v41 = vor.u32 1.1754944e-38, %v2019_v35  ;;  %vm2018_vm14 = vcmp.eq.f32.partialorder %v2017_v39, 8.507059e+37 }
0x19c6   :  { %v3779_v26 = vpop.eup %3778 }
0x19c7   :  { %v2009_v27 = vmul.f32 %v3779_v26, %v2007_v25  ;;  %vm2014_vm12 = vweird.f32 %v3779_v26 }
0x19c8   :  { %vm2015_vm13 = vmor %vm2013_vm15, %vm2014_vm12 }
0x19c9   :  { %v2010_v31 = vsub.f32 1.0, %v2009_v27 }
0x19cb   :  { %v2011_v0 = vmul.f32 %v3779_v26, %v2010_v31 }
0x19cd   :  { %v2012_v59 = vadd.f32 %v3779_v26, %v2011_v0 }
0x19cf   :  { %v2016_v12 = vsel %vm2015_vm13, %v3779_v26, %v2012_v59 }
0x19d0   :  { %v2021_v17 = vsel %vm2018_vm14, %v2020_v41, %v2016_v12 }
0x19d1   :  { %v2024_v52 = vmul.f32 %v2021_v17, %v4396_v32 }
0x1a05   :  { %v2144_v28 = vpop.permute.xlu2 %2143 }
0x1a06   :  { %v2146_v29 = vmul.f32 %v2144_v28, %v2127_v40 }
0x1a08   :  { %v2149_v34 = vpack.c.bf16 %v2146_v29, %v2146_v29 }
0x1a0a   :  { %2151 = vrot.lane.b32.xlu1 %v2149_v34, %s3914_s10 }
0x1a16   :  { %v2027_v43 = vpop.permute.xlu2 %2026 }
0x1a17   :  { %v2029_v38 = vmul.f32 %v2027_v43, %v2021_v17 }
0x1a19   :  { %2031 = vrot.lane.b32.xlu1 %v2029_v38, %s3904_s29 }
0x1a7c   :  { %v2152_v15 = vpop.permute.xlu1 %2151 }
0x1a7d   :  { %3450 = vmatmul.msk.bf16.vlgmr.msrb.gmra.mxu1 %vm1822_vm1, %v2152_v15  ;;  %v2286_v15 = vld [vmem:[%s4451_s28 + $0x50] sm:$0xff] }
0x1a8b   :  { %v2032_v51 = vpop.permute.xlu1 %2031 }
0x1a8c   :  { %v2034_v3 = vadd.f32 %v2032_v51, %v2024_v52  ;;  %v2285_v51 = vld [vmem:[%s4451_s28 + $0x48] sm:$0xff] }
0x1afa   :  { %v2165_v49 = vpop.f32.mrf.mxu1 }
0x1afb   :  { %v2169_v50 = vadd.f32 %v2165_v49, %v2080_v10  ;;  %v2294_v49 = vpack.c.bf16 %v2287_v47, %v2286_v15 }
0x1afd   :  { %3780 = vtanh.f32 %v2169_v50  ;;  %v3451_v54 = vmul.f32 -1.442695, %v2169_v50  ;;  %v2284_v50 = vld [vmem:[%s4451_s28 + $0x40] sm:$0xff] }
0x1afe   :  { %3782 = vtanh.f32 %v2034_v3  ;;  %v2293_v52 = vpack.c.bf16 %v2285_v51, %v2284_v50 }
0x1aff   :  { %3784 = vpow2.f32 %v3451_v54  ;;  %v2282_v54 = vld [vmem:[%s4451_s28 + $0x30] sm:$0xff] }
0x1b02   :  { %v2167_v14 = vpop.f32.mrf.mxu1 }
0x1b03   :  { %v3781_v2 = vpop.eup %3780 }
0x1b04   :  { %2192 = vrot.lane.b32.xlu0 %v3781_v2, %s3904_s29  ;;  %v3783_v53 = vpop.eup %3782 }
0x1b05   :  { %v3785_v55 = vpop.eup %3784 }
0x1b06   :  { %v2173_v57 = vadd.f32 1.0, %v3785_v55  ;;  %v2283_v55 = vld [vmem:[%s4451_s28 + $0x38] sm:$0xff] }
0x1b08   :  { %3786 = vrcp.f32 %v2173_v57  ;;  %v2185_v32 = vand.u32 2147483648, %v2173_v57  ;;  %vm2179_vm4 = vweird.f32 %v2173_v57  ;;  %v2183_v61 = vand.u32 2147483647, %v2173_v57 }
0x1b0a   :  { %v2186_v63 = vor.u32 1.1754944e-38, %v2185_v32  ;;  %vm2184_vm7 = vcmp.eq.f32.partialorder %v2183_v61, 8.507059e+37 }
0x1b0c   :  { %2037 = vrot.lane.b32.xlu0 %v3783_v53, %s3904_s29 }
0x1b0e   :  { %v3787_v1 = vpop.eup %3786 }
0x1b0f   :  { %v2175_v48 = vmul.f32 %v3787_v1, %v2173_v57  ;;  %vm2180_vm3 = vweird.f32 %v3787_v1  ;;  %v2280_v57 = vld [vmem:[%s4451_s28 + $0x20] sm:$0xff] }
0x1b10   :  { %vm2181_vm6 = vmor %vm2179_vm4, %vm2180_vm3 }
0x1b11   :  { %v2176_v44 = vsub.f32 1.0, %v2175_v48  ;;  %v2281_v48 = vld [vmem:[%s4451_s28 + $0x28] sm:$0xff] }
0x1b12   :  { %v2291_v32 = vpack.c.bf16 %v2281_v48, %v2280_v57 }
0x1b13   :  { %v2177_v58 = vmul.f32 %v3787_v1, %v2176_v44  ;;  %v2350_v44 = vld [vmem:[%s3365_s3 + $0x10] sm:$0xff] }
0x1b15   :  { %v2178_v13 = vadd.f32 %v3787_v1, %v2177_v58  ;;  %v2351_v58 = vld [vmem:[%s3365_s3 + $0x18] sm:$0xff] }
0x1b16   :  { %v2353_v61 = vpack.c.bf16 %v2351_v58, %v2350_v44 }
0x1b17   :  { %v2182_v62 = vsel %vm2181_vm6, %v3787_v1, %v2178_v13  ;;  %v2292_v1 = vpack.c.bf16 %v2283_v55, %v2282_v54  ;;  %v2348_v13 = vld [vmem:[%s3365_s3] sm:$0xff] }
0x1b18   :  { %v2187_v5 = vsel %vm2184_vm7, %v2186_v63, %v2182_v62  ;;  %v2349_v62 = vld [vmem:[%s3365_s3 + $0x8] sm:$0xff]  ;;  %v2278_v63 = vld [vmem:[%s4451_s28 + $0x10] sm:$0xff]  ;;  %2369 = vmatpush.bf16.msrb.mxu2 %v2353_v61  ;;  %s4557_s3 = sld [smem:[%s4727_s0 + %s3926_s30]]  }
0x1b19   :  { %v2190_v36 = vmul.f32 %v2187_v5, %v4420_v19 }
0x1b76   :  { %v2193_v4 = vpop.permute.xlu0 %2192 }
0x1b77   :  { %v2195_v6 = vmul.f32 %v2193_v4, %v2187_v5  ;;  %v2279_v4 = vld [vmem:[%s4451_s28 + $0x18] sm:$0xff] }
0x1b79   :  { %2197 = vrot.lane.b32.xlu2 %v2195_v6, %s3904_s29  ;;  %v2352_v6 = vpack.c.bf16 %v2349_v62, %v2348_v13 }
0x1b7b   :  { %2370 = vmatpush.bf16.msrb.mxu2 %v2352_v6 }
0x1b7e   :  { %v2038_v60 = vpop.permute.xlu0 %2037 }
0x1b7f   :  { %v2040_v46 = vmul.f32 %v2038_v60, %v2021_v17  ;;  %v2288_v17 = vld [vmem:[%s4451_s28 + $0x60] sm:$0xff]  ;;  %v2340_v60 = vld [vmem:[%s4467_s7 + $0x8] sm:$0xff] }
0x1b80   :  { %v2295_v38 = vpack.c.bf16 %v2288_v17, %v2288_v17 }
0x1b81   :  { %2042 = vrot.lane.b32.xlu2 %v2040_v46, %s3914_s10  ;;  %v2270_v46 = vld [vmem:[%s4472_s9 + $0x10] sm:$0xff] }
0x1b82   :  { %v2300_v10 = vsel %vm214_vm0, %v2295_v38, 0 }
0x1b83   :  { %2303 = vmatpush.bf16.msrb.mxu0 %v2300_v10 }
0x1b87   :  { %2304 = vmatpush.bf16.msrb.mxu0 %v2294_v49 }
0x1b8b   :  { %2305 = vmatpush.bf16.msrb.mxu0 %v2293_v52 }
0x1b8f   :  { %2306 = vmatpush.bf16.msrb.mxu0 %v2292_v1 }
0x1b93   :  { %2307 = vmatpush.bf16.msrb.mxu0 %v2291_v32 }
0x1bd3   :  { %v2198_v11 = vpop.permute.xlu2 %2197 }
0x1bd4   :  { %v2200_v16 = vadd.f32 %v2198_v11, %v2190_v36  ;;  %v2271_v36 = vld [vmem:[%s4472_s9 + $0x18] sm:$0xff] }
0x1bd5   :  { %v2273_v11 = vpack.c.bf16 %v2271_v36, %v2270_v46 }
0x1bd6   :  { %3788 = vtanh.f32 %v2200_v16 }
0x1bd7   :  { %2327 = vmatpush.bf16.msra.mxu1 %v2273_v11 }
0x1bdb   :  { %v2043_v45 = vpop.permute.xlu2 %2042 }
0x1bdc   :  { %v3789_v40 = vpop.eup %3788  ;;  %2046 = vst.msk [vmem:[#allocation4 + $0x10] sm:$0xff] %vm1822_vm1, %v2043_v45  ;;  %v2402_v45 = vld [vmem:[%s3366_s14 + $0x18] sm:$0xff] }
0x1bdd   :  { %2203 = vrot.lane.b32.xlu1 %v3789_v40, %s3904_s29  ;;  %v2399_v40 = vld [vmem:[%s3366_s14] sm:$0xff] }
0x1be3   :  { %v2049_v7 = vld [vmem:[#allocation4 + $0x10] sm:$0xff] }
0x1be4   :  { %v2051_v33 = vpack.c.bf16 %v2049_v7, %v2049_v7  ;;  %v2290_v7 = vpack.c.bf16 %v2279_v4, %v2278_v63 }
0x1be6   :  { %3448 = vmatmul.msk.bf16.gmra.mxu2 %vm1822_vm1, %v2051_v33  ;;  %2308 = vmatpush.bf16.msrb.mxu0 %v2290_v7 }
0x1c4f   :  { %v2204_v8 = vpop.permute.xlu1 %2203 }
0x1c50   :  { %v2206_v18 = vmul.f32 %v2204_v8, %v2187_v5  ;;  %v2339_v5 = vld [vmem:[%s4467_s7] sm:$0xff]  ;;  %v2400_v8 = vld [vmem:[%s3366_s14 + $0x8] sm:$0xff] }
0x1c52   :  { %v2209_v42 = vpack.c.bf16 %v2206_v18, %v2206_v18  ;;  %v2345_v18 = vpack.c.bf16 %v2340_v60, %v2339_v5 }
0x1c54   :  { %2211 = vrot.lane.b32.xlu0 %v2209_v42, %s3914_s10  ;;  %v2276_v42 = vld [vmem:[%s4451_s28] sm:$0xff]  ;;  %3456 = vmatmul.msk.bf16.vlgmr.msrb.gmra.mxu2 %vm1822_vm1, %v2345_v18 }
0x1c69   :  { %v2082_v20 = vpop.f32.mrf.mxu2 }
0x1c6a   :  { %v2083_v22 = vadd.f32 %v4413_v56, %v2082_v20  ;;  %v2277_v20 = vld [vmem:[%s4451_s28 + $0x8] sm:$0xff]  ;;  %s3368_s28 = sld [smem:[%s4727_s0 + %s3925_s25]]  }
0x1c71   :  { %v2084_v19 = vpop.f32.mrf.mxu2 }
0x1c72   :  { %v2403_v19 = vpack.c.bf16 %v2400_v8, %v2399_v40 }
0x1cc6   :  { %v2212_v21 = vpop.permute.xlu0 %2211 }
0x1cc7   :  { %3452 = vmatmul.msk.bf16.vlgmr.msra.gmra.mxu3 %vm1822_vm1, %v2212_v21  ;;  %v2289_v21 = vpack.c.bf16 %v2277_v20, %v2276_v42 }
0x1cc9   :  { %2309 = vmatpush.bf16.msrb.mxu0 %v2289_v21 }
0x1cd7   :  { %v2372_v47 = vpop.f32.mrf.mxu2 }
0x1cdf   :  { %v2374_v11 = vpop.f32.mrf.mxu2 }
0x1d4a   :  { %v2225_v30 = vpop.f32.mrf.mxu3 }
0x1d4b   :  { %v2229_v37 = vadd.f32 %v2225_v30, %v2083_v22  ;;  %v2274_v22 = vld [vmem:[%s3344_s18] sm:$0xff] }
0x1d4c   :  { %v2268_v30 = vld [vmem:[%s4472_s9] sm:$0xff] }
0x1d4d   :  { %3790 = vtanh.f32 %v2229_v37  ;;  %v3453_v25 = vmul.f32 -1.442695, %v2229_v37  ;;  %v2269_v37 = vld [vmem:[%s4472_s9 + $0x8] sm:$0xff]  ;;  %s3371_s9 = sld [smem:[%s4727_s0 + %s3928_s19]]  }
0x1d4f   :  { %3792 = vpow2.f32 %v3453_v25  ;;  %v2341_v25 = vld [vmem:[%s4467_s7 + $0x10] sm:$0xff] }
0x1d52   :  { %v2227_v23 = vpop.f32.mrf.mxu3 }
0x1d53   :  { %v3791_v24 = vpop.eup %3790  ;;  %v2272_v23 = vpack.c.bf16 %v2269_v37, %v2268_v30 }
0x1d54   :  { %2252 = vrot.lane.b32.xlu1 %v3791_v24, %s3904_s29  ;;  %v2275_v24 = vpack.c.bf16 %v2274_v22, %v2274_v22 }
0x1d55   :  { %v3793_v26 = vpop.eup %3792  ;;  %2328 = vmatpush.bf16.msra.mxu1 %v2272_v23 }
0x1d56   :  { %v2233_v27 = vadd.f32 1.0, %v3793_v26  ;;  %3454 = vmatmul.msk.bf16.vlgmr.msrb.gmra.mxu0 %vm1665_vm5, %v2275_v24  ;;  %v2342_v26 = vld [vmem:[%s4467_s7 + $0x18] sm:$0xff] }
0x1d58   :  { %3794 = vrcp.f32 %v2233_v27  ;;  %v2245_v59 = vand.u32 2147483648, %v2233_v27  ;;  %vm2239_vm9 = vweird.f32 %v2233_v27  ;;  %v2243_v56 = vand.u32 2147483647, %v2233_v27 }
0x1d5a   :  { %v2246_v39 = vor.u32 1.1754944e-38, %v2245_v59  ;;  %vm2244_vm2 = vcmp.eq.f32.partialorder %v2243_v56, 8.507059e+37 }
0x1d5e   :  { %v3795_v28 = vpop.eup %3794 }
0x1d5f   :  { %v2235_v29 = vmul.f32 %v3795_v28, %v2233_v27  ;;  %vm2240_vm8 = vweird.f32 %v3795_v28  ;;  %v2346_v27 = vpack.c.bf16 %v2342_v26, %v2341_v25 }
0x1d60   :  { %vm2241_vm10 = vmor %vm2239_vm9, %vm2240_vm8 }
0x1d61   :  { %v2236_v31 = vsub.f32 1.0, %v2235_v29  ;;  %3457 = vmatmul.msk.bf16.gmra.mxu2 %vm1822_vm1, %v2346_v27 }
0x1d63   :  { %v2237_v34 = vmul.f32 %v3795_v28, %v2236_v31 }
0x1d65   :  { %v2238_v0 = vadd.f32 %v3795_v28, %v2237_v34  ;;  %v2343_v34 = vld [vmem:[%s4467_s7 + $0x20] sm:$0xff] }
0x1d67   :  { %v2242_v35 = vsel %vm2241_vm10, %v3795_v28, %v2238_v0  ;;  %v2344_v0 = vld [vmem:[%s4467_s7 + $0x28] sm:$0xff]  ;;  %s3369_s7 = sld [smem:[%s4727_s0 + %s3927_s4]]  }
0x1d68   :  { %v4444_v41 = vsel %vm2244_vm2, %v2246_v39, %v2242_v35  ;;  %v2347_v59 = vpack.c.bf16 %v2344_v0, %v2343_v34 }
0x1d69   :  { %v2250_v3 = vmul.f32 %v4444_v41, %v2200_v16  ;;  %v2401_v16 = vld [vmem:[%s3366_s14 + $0x10] sm:$0xff]  ;;  %s3372_s14 = sld [smem:[%s4727_s0 + %s3929_s11]]  }
0x1d6a   :  { %v2404_v33 = vpack.c.bf16 %v2402_v45, %v2401_v16 }
0x1d6c   :  { %2412 = vmatpush.bf16.msrb.mxu3 %v2404_v33  ;;  %2477 = vmatpush.bf16.msra.mxu0 %v2404_v33 }
0x1d6d   :  { %2543 = vmatpush.bf16.msrb.mxu1 %v2404_v33 }
0x1d70   :  { %2413 = vmatpush.bf16.msrb.mxu3 %v2403_v19  ;;  %2478 = vmatpush.bf16.msra.mxu0 %v2403_v19 }
0x1d71   :  { %2544 = vmatpush.bf16.msrb.mxu1 %v2403_v19  ;;  %3458 = vmatmul.msk.bf16.gmra.mxu2 %vm1822_vm1, %v2347_v59 }
0x1d73   :  { %2414 = vmatmul.bf16.vlgmr.msrb.gmra.mxu3 %v3898_v9 }
0x1d74   :  { %2609 = vmatpush.bf16.msra.mxu3 %v2404_v33  ;;  %2675 = vmatpush.bf16.msrb.mxu0 %v2404_v33 }
0x1d78   :  { %2610 = vmatpush.bf16.msra.mxu3 %v2403_v19  ;;  %2676 = vmatpush.bf16.msrb.mxu0 %v2403_v19 }
0x1dc6   :  { %v2253_v12 = vpop.permute.xlu1 %2252 }
0x1dc7   :  { %v2255_v43 = vmul.f32 %v2253_v12, %v4444_v41 }
0x1dc9   :  { %2257 = vrot.lane.b32.xlu2 %v2255_v43, %s3904_s29  ;;  %v3532_v43 = vld [vmem:[%s3367_s24] ss:$0 sm:$0xff] }
0x1dd3   :  { %v2311_v56 = vpop.f32.mrf.mxu0 }
0x1ddb   :  { %v2313_v12 = vpop.f32.mrf.mxu0 }
0x1de4   :  { %v2377_v12 = vpop.f32.mrf.mxu2 }
0x1df6   :  { %v2415_v39 = vpop.f32.mrf.mxu3 }
0x1e23   :  { %v2258_v14 = vpop.permute.xlu2 %2257 }
0x1e24   :  { %v2260_v2 = vadd.f32 %v2258_v14, %v2250_v3 }
0x1e26   :  { %3796 = vtanh.f32 %v2260_v2 }
0x1e2c   :  { %v3797_v53 = vpop.eup %3796 }
0x1e2d   :  { %2263 = vrot.lane.b32.xlu0 %v3797_v53, %s3904_s29 }
0x1e9f   :  { %v2264_v28 = vpop.permute.xlu0 %2263 }
0x1ea0   :  { %v2266_v29 = vmul.f32 %v2264_v28, %v4444_v41  ;;  %v2417_v41 = vpop.f32.mrf.mxu3 }
0x1ea2   :  { %v2267_v31 = vpack.c.bf16 %v2266_v29, %v2266_v29 }
0x1ea4   :  { %2316 = vrot.lane.b32.xlu1 %v2267_v31, %s3914_s10 }
0x1f16   :  { %v2317_v35 = vpop.permute.xlu1 %2316 }
0x1f17   :  { %3455 = vmatmul.msk.bf16.vlgmr.msra.gmra.mxu1 %vm1822_vm1, %v2317_v35 }
0x1f18   :  { %2741 = vmatpush.bf16.msra.mxu1 %v2404_v33 }
0x1f1c   :  { %2742 = vmatpush.bf16.msra.mxu1 %v2403_v19 }
0x1f94   :  { %v2330_v17 = vpop.f32.mrf.mxu1 }
0x1f95   :  { %v2331_v38 = vadd.f32 %v2330_v17, %v2311_v56 }
0x1f97   :  { %v4509_v15 = vadd.f32 %v3532_v43, %v2331_v38 }
0x1f99   :  { %v2387_v10 = vadd.f32 %v2372_v47, %v4509_v15  ;;  %v2388_v16 = vadd.f32 %v2374_v11, %v4509_v15  ;;  %v2389_v41 = vadd.f32 %v2377_v12, %v4509_v15 }
0x1f9b   :  { %v2419_v49 = vadd.f32 %v2415_v39, %v2387_v10 }
0x1f9c   :  { %v2332_v50 = vpop.f32.mrf.mxu1 }
0x1f9d   :  { %3798 = vtanh.f32 %v2419_v49  ;;  %v3459_v52 = vmul.f32 -1.442695, %v2419_v49 }
0x1f9f   :  { %3800 = vpow2.f32 %v3459_v52 }
0x1fa3   :  { %v3799_v51 = vpop.eup %3798 }
0x1fa4   :  { %2442 = vrot.lane.b32.xlu2 %v3799_v51, %s3904_s29 }
0x1fa5   :  { %v3801_v3 = vpop.eup %3800 }
0x1fa6   :  { %v2423_v14 = vadd.f32 1.0, %v3801_v3 }
0x1fa8   :  { %3802 = vrcp.f32 %v2423_v14  ;;  %v2435_v1 = vand.u32 2147483648, %v2423_v14  ;;  %vm2429_vm5 = vweird.f32 %v2423_v14  ;;  %v2433_v48 = vand.u32 2147483647, %v2423_v14 }
0x1faa   :  { %v2436_v58 = vor.u32 1.1754944e-38, %v2435_v1  ;;  %vm2434_vm12 = vcmp.eq.f32.partialorder %v2433_v48, 8.507059e+37 }
0x1fae   :  { %v3803_v2 = vpop.eup %3802 }
0x1faf   :  { %v2425_v53 = vmul.f32 %v3803_v2, %v2423_v14  ;;  %vm2430_vm0 = vweird.f32 %v3803_v2 }
0x1fb0   :  { %vm2431_vm11 = vmor %vm2429_vm5, %vm2430_vm0 }
0x1fb1   :  { %v2426_v54 = vsub.f32 1.0, %v2425_v53 }
0x1fb3   :  { %v2427_v55 = vmul.f32 %v3803_v2, %v2426_v54 }
0x1fb5   :  { %v2428_v57 = vadd.f32 %v3803_v2, %v2427_v55 }
0x1fb7   :  { %v2432_v44 = vsel %vm2431_vm11, %v3803_v2, %v2428_v57 }
0x1fb8   :  { %v2437_v32 = vsel %vm2434_vm12, %v2436_v58, %v2432_v44 }
0x1fb9   :  { %v2440_v62 = vmul.f32 0.0, %v2437_v32 }
0x1ffe   :  { %v2443_v13 = vpop.permute.xlu2 %2442 }
0x1fff   :  { %v2445_v61 = vmul.f32 %v2443_v13, %v2437_v32 }
0x2001   :  { %2447 = vrot.lane.b32.xlu0 %v2445_v61, %s3904_s29 }
0x2073   :  { %v2448_v63 = vpop.permute.xlu0 %2447 }
0x2074   :  { %v2450_v4 = vadd.f32 %v2448_v63, %v2440_v62 }
0x2076   :  { %3804 = vtanh.f32 %v2450_v4 }
0x207c   :  { %v3805_v5 = vpop.eup %3804 }
0x207d   :  { %2453 = vrot.lane.b32.xlu1 %v3805_v5, %s3904_s29 }
0x20ef   :  { %v2454_v6 = vpop.permute.xlu1 %2453 }
0x20f0   :  { %v4515_v60 = vmul.f32 %v2454_v6, %v2437_v32  ;;  %v2379_v6 = vpop.f32.mrf.mxu2 }
0x20f2   :  { %v2464_v46 = vpack.c.bf16 %v4515_v60, %v4515_v60 }
0x20f4   :  { %2466 = vrot.lane.b32.xlu2 %v2464_v46, %s3914_s10  ;;  %v2390_v46 = vadd.f32 %v2379_v6, %v4509_v15 }
0x214e   :  { %v2467_v36 = vpop.permute.xlu2 %2466 }
0x214f   :  { %3460 = vmatmul.msk.bf16.vlgmr.msra.gmra.mxu0 %vm1822_vm1, %v2467_v36 }
0x21cc   :  { %v2480_v45 = vpop.f32.mrf.mxu0 }
0x21cd   :  { %v2484_v40 = vadd.f32 %v2480_v45, %v2388_v16 }
0x21cf   :  { %3806 = vtanh.f32 %v2484_v40  ;;  %v3461_v8 = vmul.f32 -1.442695, %v2484_v40 }
0x21d1   :  { %3808 = vpow2.f32 %v3461_v8 }
0x21d4   :  { %v2482_v7 = vpop.f32.mrf.mxu0 }
0x21d5   :  { %v3807_v33 = vpop.eup %3806 }
0x21d6   :  { %2507 = vrot.lane.b32.xlu0 %v3807_v33, %s3904_s29 }
0x21d7   :  { %v3809_v18 = vpop.eup %3808 }
0x21d8   :  { %v2488_v42 = vadd.f32 1.0, %v3809_v18 }
0x21da   :  { %3810 = vrcp.f32 %v2488_v42  ;;  %v2500_v37 = vand.u32 2147483648, %v2488_v42  ;;  %vm2494_vm13 = vweird.f32 %v2488_v42  ;;  %v2498_v23 = vand.u32 2147483647, %v2488_v42 }
0x21dc   :  { %v2501_v25 = vor.u32 1.1754944e-38, %v2500_v37  ;;  %vm2499_vm3 = vcmp.eq.f32.partialorder %v2498_v23, 8.507059e+37 }
0x21e0   :  { %v3811_v20 = vpop.eup %3810 }
0x21e1   :  { %v2490_v19 = vmul.f32 %v3811_v20, %v2488_v42  ;;  %vm2495_vm15 = vweird.f32 %v3811_v20 }
0x21e2   :  { %vm2496_vm14 = vmor %vm2494_vm13, %vm2495_vm15 }
0x21e3   :  { %v2491_v21 = vsub.f32 1.0, %v2490_v19 }
0x21e5   :  { %v2492_v22 = vmul.f32 %v3811_v20, %v2491_v21 }
0x21e7   :  { %v2493_v30 = vadd.f32 %v3811_v20, %v2492_v22 }
0x21e9   :  { %v2497_v24 = vsel %vm2496_vm14, %v3811_v20, %v2493_v30 }
0x21ea   :  { %v2502_v27 = vsel %vm2499_vm3, %v2501_v25, %v2497_v24 }
0x21eb   :  { %v2505_v29 = vmul.f32 %v2502_v27, %v2450_v4 }
0x2248   :  { %v2508_v26 = vpop.permute.xlu0 %2507 }
0x2249   :  { %v2510_v28 = vmul.f32 %v2508_v26, %v2502_v27  ;;  %v2803_v26 = vld [vmem:[%s3368_s28 + $0x10] sm:$0xff] }
0x224b   :  { %2512 = vrot.lane.b32.xlu1 %v2510_v28, %s3904_s29  ;;  %v2801_v28 = vld [vmem:[%s3368_s28] sm:$0xff] }
0x22bd   :  { %v2513_v31 = vpop.permute.xlu1 %2512 }
0x22be   :  { %v2515_v34 = vadd.f32 %v2513_v31, %v2505_v29  ;;  %v2802_v31 = vld [vmem:[%s3368_s28 + $0x8] sm:$0xff] }
0x22c0   :  { %3812 = vtanh.f32 %v2515_v34 }
0x22c6   :  { %v3813_v0 = vpop.eup %3812 }
0x22c7   :  { %2518 = vrot.lane.b32.xlu2 %v3813_v0, %s3904_s29 }
0x2321   :  { %v2519_v59 = vpop.permute.xlu2 %2518 }
0x2322   :  { %v4525_v56 = vmul.f32 %v2519_v59, %v2502_v27  ;;  %v2804_v27 = vld [vmem:[%s3368_s28 + $0x18] sm:$0xff] }
0x2323   :  { %v2806_v29 = vpack.c.bf16 %v2804_v27, %v2803_v26 }
0x2324   :  { %v2530_v35 = vpack.c.bf16 %v4525_v56, %v4525_v56 }
0x2325   :  { %2826 = vmatpush.bf16.msrb.mxu3 %v2806_v29 }
0x2326   :  { %2532 = vrot.lane.b32.xlu0 %v2530_v35, %s3914_s10 }
0x2398   :  { %v2533_v39 = vpop.permute.xlu0 %2532 }
0x2399   :  { %3462 = vmatmul.msk.bf16.vlgmr.msrb.gmra.mxu1 %vm1822_vm1, %v2533_v39 }
0x2416   :  { %v2546_v43 = vpop.f32.mrf.mxu1 }
0x2417   :  { %v2550_v17 = vadd.f32 %v2546_v43, %v2389_v41 }
0x2419   :  { %3814 = vtanh.f32 %v2550_v17  ;;  %v3463_v10 = vmul.f32 -1.442695, %v2550_v17 }
0x241b   :  { %3816 = vpow2.f32 %v3463_v10  ;;  %v2852_v10 = vld [vmem:[%s3369_s7 + $0x10] sm:$0xff] }
0x241e   :  { %v2548_v38 = vpop.f32.mrf.mxu1 }
0x241f   :  { %v3815_v47 = vpop.eup %3814 }
0x2420   :  { %2573 = vrot.lane.b32.xlu1 %v3815_v47, %s3904_s29 }
0x2421   :  { %v3817_v49 = vpop.eup %3816 }
0x2422   :  { %v2554_v50 = vadd.f32 1.0, %v3817_v49  ;;  %v2853_v49 = vld [vmem:[%s3369_s7 + $0x18] sm:$0xff] }
0x2424   :  { %3818 = vrcp.f32 %v2554_v50  ;;  %v2566_v53 = vand.u32 2147483648, %v2554_v50  ;;  %vm2560_vm6 = vweird.f32 %v2554_v50  ;;  %v2564_v54 = vand.u32 2147483647, %v2554_v50 }
0x2426   :  { %v2567_v57 = vor.u32 1.1754944e-38, %v2566_v53  ;;  %vm2565_vm8 = vcmp.eq.f32.partialorder %v2564_v54, 8.507059e+37 }
0x242a   :  { %v3819_v51 = vpop.eup %3818 }
0x242b   :  { %v2556_v52 = vmul.f32 %v3819_v51, %v2554_v50  ;;  %vm2561_vm4 = vweird.f32 %v3819_v51  ;;  %v2850_v50 = vld [vmem:[%s3369_s7] sm:$0xff] }
0x242c   :  { %vm2562_vm7 = vmor %vm2560_vm6, %vm2561_vm4 }
0x242d   :  { %v2557_v3 = vsub.f32 1.0, %v2556_v52  ;;  %v2851_v52 = vld [vmem:[%s3369_s7 + $0x8] sm:$0xff] }
0x242f   :  { %v2558_v14 = vmul.f32 %v3819_v51, %v2557_v3  ;;  %v4574_v3 = vpack.c.bf16 %v2851_v52, %v2850_v50 }
0x2431   :  { %v2559_v2 = vadd.f32 %v3819_v51, %v2558_v14 }
0x2433   :  { %v2563_v55 = vsel %vm2562_vm7, %v3819_v51, %v2559_v2  ;;  %v4571_v51 = vpack.c.bf16 %v2853_v49, %v2852_v10  ;;  %v2382_v2 = vpop.f32.mrf.mxu2 }
0x2434   :  { %v2568_v48 = vsel %vm2565_vm8, %v2567_v57, %v2563_v55  ;;  %v2391_v53 = vadd.f32 %v2382_v2, %v4509_v15 }
0x2435   :  { %v2571_v58 = vmul.f32 %v2568_v48, %v2515_v34  ;;  %v2805_v34 = vpack.c.bf16 %v2802_v31, %v2801_v28  ;;  %2863 = vmatpush.bf16.msra.mxu0 %v4571_v51  ;;  %2928 = vmatpush.bf16.msrb.mxu1 %v4571_v51 }
0x2436   :  { %2994 = vmatpush.bf16.msra.mxu2 %v4571_v51 }
0x2437   :  { %2827 = vmatpush.bf16.msrb.mxu3 %v2805_v34 }
0x2439   :  { %2864 = vmatpush.bf16.msra.mxu0 %v4574_v3  ;;  %2929 = vmatpush.bf16.msrb.mxu1 %v4574_v3 }
0x243a   :  { %2995 = vmatpush.bf16.msra.mxu2 %v4574_v3 }
0x243b   :  { %v2384_v2 = vpop.f32.mrf.mxu2 }
0x243e   :  { %3192 = vmatpush.bf16.msrb.mxu2 %v4571_v51 }
0x2442   :  { %3193 = vmatpush.bf16.msrb.mxu2 %v4574_v3 }
0x2492   :  { %v2574_v1 = vpop.permute.xlu1 %2573 }
0x2493   :  { %v2576_v44 = vmul.f32 %v2574_v1, %v2568_v48 }
0x2495   :  { %2578 = vrot.lane.b32.xlu2 %v2576_v44, %s3904_s29 }
0x24ef   :  { %v2579_v13 = vpop.permute.xlu2 %2578 }
0x24f0   :  { %v2581_v32 = vadd.f32 %v2579_v13, %v2571_v58 }
0x24f2   :  { %3820 = vtanh.f32 %v2581_v32 }
0x24f8   :  { %v3821_v61 = vpop.eup %3820 }
0x24f9   :  { %2584 = vrot.lane.b32.xlu0 %v3821_v61, %s3904_s29 }
0x256b   :  { %v2585_v62 = vpop.permute.xlu0 %2584 }
0x256c   :  { %v4535_v63 = vmul.f32 %v2585_v62, %v2568_v48  ;;  %v4590_v48 = vld [vmem:[%s4557_s3] ss:$0 sm:$0xff] }
0x256e   :  { %v2596_v4 = vpack.c.bf16 %v4535_v63, %v4535_v63 }
0x2570   :  { %2598 = vrot.lane.b32.xlu1 %v2596_v4, %s3914_s10 }
0x25e2   :  { %v2599_v5 = vpop.permute.xlu1 %2598 }
0x25e3   :  { %3464 = vmatmul.msk.bf16.vlgmr.msra.gmra.mxu3 %vm1822_vm1, %v2599_v5 }
0x2666   :  { %v2612_v36 = vpop.f32.mrf.mxu3 }
0x2667   :  { %v2616_v11 = vadd.f32 %v2612_v36, %v2390_v46 }
0x2669   :  { %3822 = vtanh.f32 %v2616_v11  ;;  %v3465_v40 = vmul.f32 -1.442695, %v2616_v11 }
0x266b   :  { %3824 = vpow2.f32 %v3465_v40 }
0x266e   :  { %v2614_v16 = vpop.f32.mrf.mxu3 }
0x266f   :  { %v3823_v45 = vpop.eup %3822 }
0x2670   :  { %2639 = vrot.lane.b32.xlu2 %v3823_v45, %s3904_s29 }
0x2671   :  { %v3825_v7 = vpop.eup %3824 }
0x2672   :  { %v2620_v33 = vadd.f32 1.0, %v3825_v7 }
0x2674   :  { %3826 = vrcp.f32 %v2620_v33  ;;  %v2632_v21 = vand.u32 2147483648, %v2620_v33  ;;  %vm2626_vm10 = vweird.f32 %v2620_v33  ;;  %v2630_v22 = vand.u32 2147483647, %v2620_v33 }
0x2676   :  { %v2633_v37 = vor.u32 1.1754944e-38, %v2632_v21  ;;  %vm2631_vm0 = vcmp.eq.f32.partialorder %v2630_v22, 8.507059e+37 }
0x2678   :  { %2458 = vrot.lane.b32.xlu2 %v4515_v60, %s3914_s10 }
0x267a   :  { %v3827_v8 = vpop.eup %3826 }
0x267b   :  { %v2622_v18 = vmul.f32 %v3827_v8, %v2620_v33  ;;  %vm2627_vm9 = vweird.f32 %v3827_v8 }
0x267c   :  { %vm2628_vm2 = vmor %vm2626_vm10, %vm2627_vm9 }
0x267d   :  { %v2623_v42 = vsub.f32 1.0, %v2622_v18 }
0x267f   :  { %v2624_v20 = vmul.f32 %v3827_v8, %v2623_v42 }
0x2681   :  { %v2625_v19 = vadd.f32 %v3827_v8, %v2624_v20 }
0x2683   :  { %v2629_v30 = vsel %vm2628_vm2, %v3827_v8, %v2625_v19 }
0x2684   :  { %v2634_v60 = vsel %vm2631_vm0, %v2633_v37, %v2629_v30 }
0x2685   :  { %v2637_v0 = vmul.f32 %v2634_v60, %v2581_v32 }
0x26ca   :  { %v2640_v23 = vpop.permute.xlu2 %2639 }
0x26cb   :  { %v2642_v24 = vmul.f32 %v2640_v23, %v2634_v60 }
0x26cd   :  { %2644 = vrot.lane.b32.xlu0 %v2642_v24, %s3904_s29 }
0x26d2   :  { %v2459_v25 = vpop.permute.xlu2 %2458 }
0x26d3   :  { %2461 = vst.msk [vmem:[#allocation7] sm:$0xff] %vm1822_vm1, %v2459_v25 }
0x26d5   :  { %2523 = vrot.lane.b32.xlu0 %v4525_v56, %s3914_s10 }
0x26da   :  { %v2792_v12 = vld [vmem:[#allocation7] sm:$0xff] }
0x273f   :  { %v2645_v59 = vpop.permute.xlu0 %2644 }
0x2740   :  { %v4552_v35 = vadd.f32 %v2645_v59, %v2637_v0 }
0x2742   :  { %3828 = vtanh.f32 %v4552_v35 }
0x2747   :  { %v2524_v56 = vpop.permute.xlu0 %2523 }
0x2748   :  { %v3829_v39 = vpop.eup %3828  ;;  %2527 = vst.msk [vmem:[#allocation7 + $0x8] sm:$0xff] %vm1822_vm1, %v2524_v56 }
0x2749   :  { %2650 = vrot.lane.b32.xlu1 %v3829_v39, %s3904_s29 }
0x274f   :  { %v2793_v41 = vld [vmem:[#allocation7 + $0x8] sm:$0xff] }
0x2750   :  { %v2798_v43 = vpack.c.bf16 %v2793_v41, %v2792_v12 }
0x2752   :  { %3470 = vmatmul.msk.bf16.vlgmr.msrb.gmra.mxu3 %vm1822_vm1, %v2798_v43 }
0x27bb   :  { %v2651_v17 = vpop.permute.xlu1 %2650 }
0x27bc   :  { %v4563_v38 = vmul.f32 %v2651_v17, %v2634_v60 }
0x27be   :  { %v2662_v47 = vpack.c.bf16 %v4563_v38, %v4563_v38 }
0x27c0   :  { %2664 = vrot.lane.b32.xlu1 %v2662_v47, %s3914_s10 }
0x27d5   :  { %v2829_v44 = vpop.f32.mrf.mxu3 }
0x27d6   :  { %v2830_v58 = vadd.f32 %v4590_v48, %v2829_v44 }
0x2832   :  { %v2665_v14 = vpop.permute.xlu1 %2664 }
0x2833   :  { %3466 = vmatmul.msk.bf16.vlgmr.msrb.gmra.mxu0 %vm1822_vm1, %v2665_v14 }
0x2834   :  { %3060 = vmatpush.bf16.msrb.mxu0 %v4571_v51 }
0x2838   :  { %3061 = vmatpush.bf16.msrb.mxu0 %v4574_v3 }
0x2843   :  { %2865 = vmatmul.bf16.vlgmr.msra.gmra.mxu0 %v3898_v9 }
0x28b0   :  { %v2678_v54 = vpop.f32.mrf.mxu0 }
0x28b1   :  { %v2682_v55 = vadd.f32 %v2678_v54, %v2391_v53  ;;  %v2392_v53 = vadd.f32 %v2384_v2, %v4509_v15 }
0x28b3   :  { %3830 = vtanh.f32 %v2682_v55  ;;  %v3467_v62 = vmul.f32 -1.442695, %v2682_v55 }
0x28b8   :  { %v2680_v57 = vpop.f32.mrf.mxu0 }
0x28b9   :  { %v3831_v1 = vpop.eup %3830 }
0x28ba   :  { %2705 = vrot.lane.b32.xlu2 %v3831_v1, %s3904_s29  ;;  %v2831_v1 = vpop.f32.mrf.mxu3 }
0x28bb   :  { %v2832_v44 = vadd.f32 %v4590_v48, %v2831_v1 }
0x28c0   :  { %v2866_v13 = vpop.f32.mrf.mxu0 }
0x28c1   :  { %v2870_v32 = vadd.f32 %v2866_v13, %v2830_v58 }
0x28c3   :  { %3832 = vtanh.f32 %v2870_v32  ;;  %v3473_v40 = vmul.f32 -1.442695, %v2870_v32 }
0x28c4   :  { %3834 = vpow2.f32 %v3467_v62 }
0x28c8   :  { %v2868_v61 = vpop.f32.mrf.mxu0 }
0x28c9   :  { %v3833_v9 = vpop.eup %3832 }
0x28ca   :  { %2893 = vrot.lane.b32.xlu0 %v3833_v9, %s3904_s29  ;;  %v3835_v4 = vpop.eup %3834 }
0x28cb   :  { %v2686_v5 = vadd.f32 1.0, %v3835_v4 }
0x28cd   :  { %3836 = vrcp.f32 %v2686_v5  ;;  %v2698_v45 = vand.u32 2147483648, %v2686_v5  ;;  %vm2692_vm11 = vweird.f32 %v2686_v5  ;;  %v2696_v7 = vand.u32 2147483647, %v2686_v5 }
0x28ce   :  { %3838 = vpow2.f32 %v3473_v40 }
0x28cf   :  { %v2699_v8 = vor.u32 1.1754944e-38, %v2698_v45  ;;  %vm2697_vm15 = vcmp.eq.f32.partialorder %v2696_v7, 8.507059e+37 }
0x28d3   :  { %v3837_v6 = vpop.eup %3836 }
0x28d4   :  { %v2688_v46 = vmul.f32 %v3837_v6, %v2686_v5  ;;  %vm2693_vm5 = vweird.f32 %v3837_v6  ;;  %v3839_v19 = vpop.eup %3838 }
0x28d5   :  { %vm2694_vm12 = vmor %vm2692_vm11, %vm2693_vm5  ;;  %v2874_v21 = vadd.f32 1.0, %v3839_v19 }
0x28d6   :  { %v2689_v36 = vsub.f32 1.0, %v2688_v46 }
0x28d7   :  { %3840 = vrcp.f32 %v2874_v21  ;;  %v2886_v24 = vand.u32 2147483648, %v2874_v21  ;;  %vm2880_vm14 = vweird.f32 %v2874_v21  ;;  %v2884_v25 = vand.u32 2147483647, %v2874_v21 }
0x28d8   :  { %v2690_v11 = vmul.f32 %v3837_v6, %v2689_v36 }
0x28d9   :  { %v2887_v27 = vor.u32 1.1754944e-38, %v2886_v24  ;;  %vm2885_vm4 = vcmp.eq.f32.partialorder %v2884_v25, 8.507059e+37 }
0x28da   :  { %v2691_v16 = vadd.f32 %v3837_v6, %v2690_v11 }
0x28dc   :  { %v2695_v33 = vsel %vm2694_vm12, %v3837_v6, %v2691_v16 }
0x28dd   :  { %v2700_v42 = vsel %vm2697_vm15, %v2699_v8, %v2695_v33  ;;  %v3841_v22 = vpop.eup %3840 }
0x28de   :  { %v2876_v30 = vmul.f32 %v3841_v22, %v2874_v21  ;;  %vm2881_vm13 = vweird.f32 %v3841_v22  ;;  %v2703_v34 = vmul.f32 %v2700_v42, %v4552_v35 }
0x28df   :  { %vm2882_vm3 = vmor %vm2880_vm14, %vm2881_vm13 }
0x28e0   :  { %v2877_v37 = vsub.f32 1.0, %v2876_v30 }
0x28e2   :  { %v2878_v23 = vmul.f32 %v3841_v22, %v2877_v37 }
0x28e4   :  { %v2879_v60 = vadd.f32 %v3841_v22, %v2878_v23 }
0x28e6   :  { %v2883_v26 = vsel %vm2882_vm3, %v3841_v22, %v2879_v60 }
0x28e7   :  { %v2888_v29 = vsel %vm2885_vm4, %v2887_v27, %v2883_v26 }
0x28e8   :  { %v2891_v39 = vmul.f32 0.0, %v2888_v29 }
0x2914   :  { %v2706_v18 = vpop.permute.xlu2 %2705 }
0x2915   :  { %v2708_v20 = vmul.f32 %v2706_v18, %v2700_v42 }
0x2917   :  { %2710 = vrot.lane.b32.xlu1 %v2708_v20, %s3904_s29 }
0x293c   :  { %v2894_v28 = vpop.permute.xlu0 %2893 }
0x293d   :  { %v2896_v31 = vmul.f32 %v2894_v28, %v2888_v29 }
0x293f   :  { %2898 = vrot.lane.b32.xlu2 %v2896_v31, %s3904_s29 }
0x2989   :  { %v2711_v0 = vpop.permute.xlu1 %2710 }
0x298a   :  { %v4597_v59 = vadd.f32 %v2711_v0, %v2703_v34 }
0x298c   :  { %3842 = vtanh.f32 %v4597_v59 }
0x2992   :  { %v3843_v56 = vpop.eup %3842 }
0x2993   :  { %2716 = vrot.lane.b32.xlu0 %v3843_v56, %s3904_s29 }
0x2999   :  { %v2899_v12 = vpop.permute.xlu2 %2898 }
0x299a   :  { %v2901_v41 = vadd.f32 %v2899_v12, %v2891_v39 }
0x299c   :  { %3844 = vtanh.f32 %v2901_v41 }
0x29a2   :  { %v3845_v43 = vpop.eup %3844 }
0x29a3   :  { %2904 = vrot.lane.b32.xlu1 %v3845_v43, %s3904_s29 }
0x2a05   :  { %v2717_v17 = vpop.permute.xlu0 %2716 }
0x2a06   :  { %v4602_v47 = vmul.f32 %v2717_v17, %v2700_v42 }
0x2a08   :  { %v2728_v35 = vpack.c.bf16 %v4602_v47, %v4602_v47 }
0x2a0a   :  { %2730 = vrot.lane.b32.xlu2 %v2728_v35, %s3914_s10 }
0x2a15   :  { %v2905_v10 = vpop.permute.xlu1 %2904 }
0x2a16   :  { %v4607_v49 = vmul.f32 %v2905_v10, %v2888_v29 }
0x2a18   :  { %v2915_v50 = vpack.c.bf16 %v4607_v49, %v4607_v49 }
0x2a1a   :  { %2917 = vrot.lane.b32.xlu0 %v2915_v50, %s3914_s10 }
0x2a64   :  { %v2731_v52 = vpop.permute.xlu2 %2730 }
0x2a65   :  { %3468 = vmatmul.msk.bf16.vlgmr.msra.gmra.mxu1 %vm1822_vm1, %v2731_v52 }
0x2a66   :  { %3126 = vmatpush.bf16.msra.mxu1 %v4571_v51 }
0x2a6a   :  { %3127 = vmatpush.bf16.msra.mxu1 %v4574_v3 }
0x2a8c   :  { %v2918_v14 = vpop.permute.xlu0 %2917 }
0x2a8d   :  { %3474 = vmatmul.msk.bf16.vlgmr.msrb.gmra.mxu1 %vm1822_vm1, %v2918_v14 }
0x2ae2   :  { %v2744_v54 = vpop.f32.mrf.mxu1 }
0x2ae3   :  { %v4617_v55 = vadd.f32 %v2744_v54, %v2392_v53 }
0x2aea   :  { %v2746_v57 = vpop.f32.mrf.mxu1 }
0x2b0a   :  { %v2931_v58 = vpop.f32.mrf.mxu1 }
0x2b0b   :  { %v2935_v13 = vadd.f32 %v2931_v58, %v2832_v44  ;;  %v3469_v44 = vmul.f32 -1.442695, %v4617_v55 }
0x2b0d   :  { %3846 = vtanh.f32 %v2935_v13  ;;  %v3475_v3 = vmul.f32 -1.442695, %v2935_v13 }
0x2b0f   :  { %3848 = vpow2.f32 %v3475_v3 }
0x2b12   :  { %v2933_v32 = vpop.f32.mrf.mxu1 }
0x2b13   :  { %v3847_v51 = vpop.eup %3846 }
0x2b14   :  { %2958 = vrot.lane.b32.xlu1 %v3847_v51, %s3904_s29 }
0x2b15   :  { %v3849_v15 = vpop.eup %3848 }
0x2b16   :  { %v2939_v61 = vadd.f32 1.0, %v3849_v15 }
0x2b18   :  { %3850 = vrcp.f32 %v2939_v61  ;;  %v2951_v46 = vand.u32 2147483648, %v2939_v61  ;;  %vm2945_vm7 = vweird.f32 %v2939_v61  ;;  %v2949_v36 = vand.u32 2147483647, %v2939_v61 }
0x2b1a   :  { %v2952_v16 = vor.u32 1.1754944e-38, %v2951_v46  ;;  %vm2950_vm9 = vcmp.eq.f32.partialorder %v2949_v36, 8.507059e+37 }
0x2b1c   :  { %2589 = vrot.lane.b32.xlu1 %v4535_v63, %s3914_s10 }
0x2b1e   :  { %v3851_v9 = vpop.eup %3850 }
0x2b1f   :  { %v2941_v62 = vmul.f32 %v3851_v9, %v2939_v61  ;;  %vm2946_vm6 = vweird.f32 %v3851_v9 }
0x2b20   :  { %vm2947_vm8 = vmor %vm2945_vm7, %vm2946_vm6 }
0x2b21   :  { %v2942_v4 = vsub.f32 1.0, %v2941_v62 }
0x2b23   :  { %v2943_v5 = vmul.f32 %v3851_v9, %v2942_v4 }
0x2b25   :  { %v2944_v6 = vadd.f32 %v3851_v9, %v2943_v5 }
0x2b27   :  { %v2948_v11 = vsel %vm2947_vm8, %v3851_v9, %v2944_v6 }
0x2b28   :  { %v2953_v63 = vsel %vm2950_vm9, %v2952_v16, %v2948_v11 }
0x2b29   :  { %v2956_v33 = vmul.f32 %v2953_v63, %v2901_v41 }
0x2b86   :  { %v2959_v45 = vpop.permute.xlu1 %2958 }
0x2b87   :  { %v2961_v40 = vmul.f32 %v2959_v45, %v2953_v63 }
0x2b89   :  { %2963 = vrot.lane.b32.xlu2 %v2961_v40, %s3904_s29 }
0x2b8e   :  { %v2590_v7 = vpop.permute.xlu1 %2589 }
0x2b8f   :  { %2593 = vst.msk [vmem:[#allocation7 + $0x10] sm:$0xff] %vm1822_vm1, %v2590_v7 }
0x2b91   :  { %2655 = vrot.lane.b32.xlu2 %v4563_v38, %s3914_s10 }
0x2b96   :  { %v2794_v19 = vld [vmem:[#allocation7 + $0x10] sm:$0xff] }
0x2be3   :  { %v2964_v8 = vpop.permute.xlu2 %2963 }
0x2be4   :  { %v2966_v18 = vadd.f32 %v2964_v8, %v2956_v33 }
0x2be6   :  { %3852 = vtanh.f32 %v2966_v18 }
0x2beb   :  { %v2656_v42 = vpop.permute.xlu2 %2655 }
0x2bec   :  { %v3853_v20 = vpop.eup %3852  ;;  %2659 = vst.msk [vmem:[#allocation7 + $0x18] sm:$0xff] %vm1822_vm1, %v2656_v42 }
0x2bed   :  { %2969 = vrot.lane.b32.xlu0 %v3853_v20, %s3904_s29 }
0x2bf3   :  { %v2795_v21 = vld [vmem:[#allocation7 + $0x18] sm:$0xff] }
0x2bf4   :  { %v2799_v22 = vpack.c.bf16 %v2795_v21, %v2794_v19 }
0x2bf6   :  { %3471 = vmatmul.msk.bf16.gmra.mxu3 %vm1822_vm1, %v2799_v22 }
0x2c5f   :  { %v2970_v30 = vpop.permute.xlu0 %2969 }
0x2c60   :  { %v4630_v37 = vmul.f32 %v2970_v30, %v2953_v63 }
0x2c62   :  { %v2981_v38 = vpack.c.bf16 %v4630_v37, %v4630_v37 }
0x2c64   :  { %2983 = vrot.lane.b32.xlu0 %v2981_v38, %s3914_s10 }
0x2c79   :  { %v2834_v60 = vpop.f32.mrf.mxu3 }
0x2c7a   :  { %v2835_v24 = vadd.f32 %v4590_v48, %v2834_v60 }
0x2c81   :  { %v2836_v63 = vpop.f32.mrf.mxu3 }
0x2c82   :  { %v2837_v40 = vadd.f32 %v4590_v48, %v2836_v63 }
0x2cd6   :  { %v2984_v23 = vpop.permute.xlu0 %2983 }
0x2cd7   :  { %3476 = vmatmul.msk.bf16.vlgmr.msra.gmra.mxu2 %vm1822_vm1, %v2984_v23 }
0x2d5a   :  { %v2997_v25 = vpop.f32.mrf.mxu2 }
0x2d5b   :  { %v3001_v26 = vadd.f32 %v2997_v25, %v2835_v24 }
0x2d5d   :  { %3854 = vtanh.f32 %v3001_v26  ;;  %v3477_v29 = vmul.f32 -1.442695, %v3001_v26 }
0x2d5f   :  { %3856 = vpow2.f32 %v3477_v29 }
0x2d62   :  { %v2999_v27 = vpop.f32.mrf.mxu2 }
0x2d63   :  { %v3855_v28 = vpop.eup %3854 }
0x2d64   :  { %3024 = vrot.lane.b32.xlu1 %v3855_v28, %s3904_s29 }
0x2d65   :  { %v3857_v31 = vpop.eup %3856 }
0x2d66   :  { %v3005_v34 = vadd.f32 1.0, %v3857_v31 }
0x2d68   :  { %3858 = vrcp.f32 %v3005_v34  ;;  %v3017_v43 = vand.u32 2147483648, %v3005_v34  ;;  %vm3011_vm2 = vweird.f32 %v3005_v34  ;;  %v3015_v17 = vand.u32 2147483647, %v3005_v34 }
0x2d69   :  { %3860 = vtanh.f32 %v4617_v55 }
0x2d6a   :  { %v3018_v10 = vor.u32 1.1754944e-38, %v3017_v43  ;;  %vm3016_vm5 = vcmp.eq.f32.partialorder %v3015_v17, 8.507059e+37 }
0x2d6e   :  { %v3859_v0 = vpop.eup %3858 }
0x2d6f   :  { %v3007_v56 = vmul.f32 %v3859_v0, %v3005_v34  ;;  %vm3012_vm10 = vweird.f32 %v3859_v0  ;;  %v3861_v2 = vpop.eup %3860 }
0x2d70   :  { %vm3013_vm0 = vmor %vm3011_vm2, %vm3012_vm10 }
0x2d71   :  { %v3008_v39 = vsub.f32 1.0, %v3007_v56 }
0x2d73   :  { %v3009_v12 = vmul.f32 %v3859_v0, %v3008_v39 }
0x2d75   :  { %v3010_v41 = vadd.f32 %v3859_v0, %v3009_v12 }
0x2d77   :  { %v3014_v35 = vsel %vm3013_vm0, %v3859_v0, %v3010_v41 }
0x2d78   :  { %v3019_v52 = vsel %vm3016_vm5, %v3018_v10, %v3014_v35 }
0x2d79   :  { %v3022_v53 = vmul.f32 %v3019_v52, %v2966_v18 }
0x2dd6   :  { %v3025_v50 = vpop.permute.xlu1 %3024 }
0x2dd7   :  { %v3027_v14 = vmul.f32 %v3025_v50, %v3019_v52 }
0x2dd9   :  { %3029 = vrot.lane.b32.xlu2 %v3027_v14, %s3904_s29 }
0x2de1   :  { %2771 = vrot.lane.b32.xlu2 %v3861_v2, %s3904_s29 }
0x2e33   :  { %v3030_v54 = vpop.permute.xlu2 %3029 }
0x2e34   :  { %v4641_v57 = vadd.f32 %v3030_v54, %v3022_v53 }
0x2e36   :  { %3862 = vtanh.f32 %v4641_v57 }
0x2e37   :  { %3864 = vpow2.f32 %v3469_v44 }
0x2e3b   :  { %v2772_v36 = vpop.permute.xlu2 %2771 }
0x2e3c   :  { %v3863_v1 = vpop.eup %3862 }
0x2e3d   :  { %3035 = vrot.lane.b32.xlu0 %v3863_v1, %s3904_s29  ;;  %v3865_v58 = vpop.eup %3864 }
0x2e3e   :  { %v2752_v13 = vadd.f32 1.0, %v3865_v58 }
0x2e40   :  { %3866 = vrcp.f32 %v2752_v13  ;;  %v2764_v5 = vand.u32 2147483648, %v2752_v13  ;;  %vm2758_vm12 = vweird.f32 %v2752_v13  ;;  %v2762_v6 = vand.u32 2147483647, %v2752_v13 }
0x2e42   :  { %v2765_v46 = vor.u32 1.1754944e-38, %v2764_v5  ;;  %vm2763_vm13 = vcmp.eq.f32.partialorder %v2762_v6, 8.507059e+37 }
0x2e46   :  { %v3867_v32 = vpop.eup %3866 }
0x2e47   :  { %v2754_v51 = vmul.f32 %v3867_v32, %v2752_v13  ;;  %vm2759_vm11 = vweird.f32 %v3867_v32 }
0x2e48   :  { %vm2760_vm15 = vmor %vm2758_vm12, %vm2759_vm11 }
0x2e49   :  { %v2755_v3 = vsub.f32 1.0, %v2754_v51 }
0x2e4b   :  { %v2756_v15 = vmul.f32 %v3867_v32, %v2755_v3 }
0x2e4d   :  { %v2757_v62 = vadd.f32 %v3867_v32, %v2756_v15 }
0x2e4f   :  { %v2761_v55 = vsel %vm2760_vm15, %v3867_v32, %v2757_v62 }
0x2e50   :  { %v2766_v11 = vsel %vm2763_vm13, %v2765_v46, %v2761_v55 }
0x2e51   :  { %v2774_v16 = vmul.f32 %v2772_v36, %v2766_v11  ;;  %v2769_v18 = vmul.f32 %v2766_v11, %v4597_v59 }
0x2eaf   :  { %v3036_v61 = vpop.permute.xlu0 %3035 }
0x2eb0   :  { %v4646_v9 = vmul.f32 %v3036_v61, %v3019_v52 }
0x2eb2   :  { %v3047_v4 = vpack.c.bf16 %v4646_v9, %v4646_v9 }
0x2eb4   :  { %3049 = vrot.lane.b32.xlu1 %v3047_v4, %s3914_s10 }
0x2ebc   :  { %2776 = vrot.lane.b32.xlu1 %v2774_v16, %s3904_s29 }
0x2f26   :  { %v3050_v45 = vpop.permute.xlu1 %3049 }
0x2f27   :  { %3478 = vmatmul.msk.bf16.vlgmr.msrb.gmra.mxu0 %vm1822_vm1, %v3050_v45 }
0x2f2e   :  { %v2777_v8 = vpop.permute.xlu1 %2776 }
0x2f2f   :  { %v2779_v42 = vadd.f32 %v2777_v8, %v2769_v18 }
0x2fa4   :  { %v3063_v7 = vpop.f32.mrf.mxu0 }
0x2fa5   :  { %v3067_v33 = vadd.f32 %v3063_v7, %v2837_v40 }
0x2fa7   :  { %3868 = vtanh.f32 %v3067_v33  ;;  %v3479_v22 = vmul.f32 -1.442695, %v3067_v33 }
0x2fa8   :  { %3870 = vtanh.f32 %v2779_v42 }
0x2fa9   :  { %3872 = vpow2.f32 %v3479_v22 }
0x2fac   :  { %v3065_v20 = vpop.f32.mrf.mxu0 }
0x2fad   :  { %v3869_v19 = vpop.eup %3868 }
0x2fae   :  { %3090 = vrot.lane.b32.xlu0 %v3869_v19, %s3904_s29  ;;  %v3871_v21 = vpop.eup %3870 }
0x2faf   :  { %v3873_v30 = vpop.eup %3872 }
0x2fb0   :  { %v3071_v38 = vadd.f32 1.0, %v3873_v30 }
0x2fb2   :  { %3874 = vrcp.f32 %v3071_v38  ;;  %v3083_v59 = vand.u32 2147483648, %v3071_v38  ;;  %vm3077_vm3 = vweird.f32 %v3071_v38  ;;  %v3081_v27 = vand.u32 2147483647, %v3071_v38 }
0x2fb4   :  { %v3084_v29 = vor.u32 1.1754944e-38, %v3083_v59  ;;  %vm3082_vm6 = vcmp.eq.f32.partialorder %v3081_v27, 8.507059e+37 }
0x2fb6   :  { %2782 = vrot.lane.b32.xlu0 %v3871_v21, %s3904_s29 }
0x2fb8   :  { %v3875_v23 = vpop.eup %3874 }
0x2fb9   :  { %v3073_v60 = vmul.f32 %v3875_v23, %v3071_v38  ;;  %vm3078_vm14 = vweird.f32 %v3875_v23 }
0x2fba   :  { %vm3079_vm4 = vmor %vm3077_vm3, %vm3078_vm14 }
0x2fbb   :  { %v3074_v24 = vsub.f32 1.0, %v3073_v60 }
0x2fbd   :  { %v3075_v25 = vmul.f32 %v3875_v23, %v3074_v24 }
0x2fbf   :  { %v3076_v26 = vadd.f32 %v3875_v23, %v3075_v25 }
0x2fc1   :  { %v3080_v28 = vsel %vm3079_vm4, %v3875_v23, %v3076_v26 }
0x2fc2   :  { %v3085_v34 = vsel %vm3082_vm6, %v3084_v29, %v3080_v28 }
0x2fc3   :  { %v3088_v12 = vmul.f32 %v3085_v34, %v4641_v57 }
0x3020   :  { %v3091_v31 = vpop.permute.xlu0 %3090 }
0x3021   :  { %v3093_v0 = vmul.f32 %v3091_v31, %v3085_v34 }
0x3023   :  { %3095 = vrot.lane.b32.xlu2 %v3093_v0, %s3904_s29 }
0x3028   :  { %v2783_v56 = vpop.permute.xlu0 %2782 }
0x3029   :  { %v2785_v39 = vmul.f32 %v2783_v56, %v2766_v11 }
0x302b   :  { %2721 = vrot.lane.b32.xlu2 %v4602_v47, %s3914_s10  ;;  %2787 = vrot.lane.b32.xlu0 %v2785_v39, %s3914_s10 }
0x307d   :  { %v3096_v41 = vpop.permute.xlu2 %3095 }
0x307e   :  { %v3098_v43 = vadd.f32 %v3096_v41, %v3088_v12 }
0x3080   :  { %3876 = vtanh.f32 %v3098_v43 }
0x3085   :  { %v2722_v17 = vpop.permute.xlu2 %2721 }
0x3086   :  { %v3877_v35 = vpop.eup %3876  ;;  %2725 = vst.msk [vmem:[#allocation7 + $0x20] sm:$0xff] %vm1822_vm1, %v2722_v17  ;;  %v3256_v17 = vld [vmem:[%s3371_s9 + $0x20] sm:$0xff] }
0x3087   :  { %3101 = vrot.lane.b32.xlu1 %v3877_v35, %s3904_s29  ;;  %v3258_v35 = vld [vmem:[%s3371_s9 + $0x30] sm:$0xff] }
0x308d   :  { %v2796_v50 = vld [vmem:[#allocation7 + $0x20] sm:$0xff] }
0x309d   :  { %v2788_v10 = vpop.permute.xlu0 %2787 }
0x309e   :  { %2791 = vst.msk [vmem:[#allocation7 + $0x28] sm:$0xff] %vm1822_vm1, %v2788_v10  ;;  %v3257_v10 = vld [vmem:[%s3371_s9 + $0x28] sm:$0xff] }
0x30a5   :  { %v2797_v52 = vld [vmem:[#allocation7 + $0x28] sm:$0xff] }
0x30a6   :  { %v2800_v14 = vpack.c.bf16 %v2797_v52, %v2796_v50  ;;  %v3262_v50 = vpack.c.bf16 %v3258_v35, %v3256_v17  ;;  %v3259_v52 = vld [vmem:[%s3371_s9 + $0x38] sm:$0xff] }
0x30a8   :  { %3472 = vmatmul.msk.bf16.gmra.mxu3 %vm1822_vm1, %v2800_v14  ;;  %v3252_v14 = vld [vmem:[%s3371_s9] sm:$0xff]  ;;  %3285 = vmatpush.bf16.msra.mxu0 %v3262_v50 }
0x30f9   :  { %v3102_v47 = vpop.permute.xlu1 %3101 }
0x30fa   :  { %v3104_v2 = vmul.f32 %v3102_v47, %v3085_v34  ;;  %v3254_v47 = vld [vmem:[%s3371_s9 + $0x10] sm:$0xff] }
0x30fc   :  { %v3113_v53 = vpack.c.bf16 %v3104_v2, %v3104_v2 }
0x30fe   :  { %3115 = vrot.lane.b32.xlu1 %v3113_v53, %s3914_s10  ;;  %v3253_v53 = vld [vmem:[%s3371_s9 + $0x8] sm:$0xff] }
0x312b   :  { %v2839_v57 = vpop.f32.mrf.mxu3 }
0x312c   :  { %v2840_v1 = vadd.f32 %v4590_v48, %v2839_v57 }
0x3133   :  { %v2841_v21 = vpop.f32.mrf.mxu3 }
0x3134   :  { %v2842_v22 = vadd.f32 %v4590_v48, %v2841_v21 }
0x3170   :  { %v3116_v54 = vpop.permute.xlu1 %3115 }
0x3171   :  { %3480 = vmatmul.msk.bf16.vlgmr.msra.gmra.mxu1 %vm1822_vm1, %v3116_v54  ;;  %v3260_v54 = vpack.c.bf16 %v3254_v47, %v3252_v14 }
0x3173   :  { %3286 = vmatpush.bf16.msra.mxu0 %v3260_v54 }
0x31ee   :  { %v3129_v44 = vpop.f32.mrf.mxu1 }
0x31ef   :  { %v3133_v58 = vadd.f32 %v3129_v44, %v2840_v1 }
0x31f1   :  { %3878 = vtanh.f32 %v3133_v58  ;;  %v3481_v51 = vmul.f32 -1.442695, %v3133_v58 }
0x31f3   :  { %3880 = vpow2.f32 %v3481_v51 }
0x31f6   :  { %v3131_v13 = vpop.f32.mrf.mxu1 }
0x31f7   :  { %v3879_v32 = vpop.eup %3878 }
0x31f8   :  { %3156 = vrot.lane.b32.xlu2 %v3879_v32, %s3904_s29 }
0x31f9   :  { %v3881_v3 = vpop.eup %3880 }
0x31fa   :  { %v3137_v15 = vadd.f32 1.0, %v3881_v3 }
0x31fc   :  { %3882 = vrcp.f32 %v3137_v15  ;;  %v3149_v55 = vand.u32 2147483648, %v3137_v15  ;;  %vm3143_vm8 = vweird.f32 %v3137_v15  ;;  %v3147_v46 = vand.u32 2147483647, %v3137_v15 }
0x31fe   :  { %v3150_v11 = vor.u32 1.1754944e-38, %v3149_v55  ;;  %vm3148_vm10 = vcmp.eq.f32.partialorder %v3147_v46, 8.507059e+37 }
0x3202   :  { %v3883_v61 = vpop.eup %3882 }
0x3203   :  { %v3139_v62 = vmul.f32 %v3883_v61, %v3137_v15  ;;  %vm3144_vm7 = vweird.f32 %v3883_v61 }
0x3204   :  { %vm3145_vm9 = vmor %vm3143_vm8, %vm3144_vm7 }
0x3205   :  { %v3140_v4 = vsub.f32 1.0, %v3139_v62 }
0x3207   :  { %v3141_v5 = vmul.f32 %v3883_v61, %v3140_v4 }
0x3209   :  { %v3142_v6 = vadd.f32 %v3883_v61, %v3141_v5 }
0x320b   :  { %v3146_v36 = vsel %vm3145_vm9, %v3883_v61, %v3142_v6 }
0x320c   :  { %v3151_v45 = vsel %vm3148_vm10, %v3150_v11, %v3146_v36 }
0x320d   :  { %v3154_v40 = vmul.f32 %v3151_v45, %v3098_v43 }
0x3252   :  { %v3157_v16 = vpop.permute.xlu2 %3156 }
0x3253   :  { %v3159_v63 = vmul.f32 %v3157_v16, %v3151_v45 }
0x3255   :  { %3161 = vrot.lane.b32.xlu0 %v3159_v63, %s3904_s29 }
0x32c7   :  { %v3162_v7 = vpop.permute.xlu0 %3161 }
0x32c8   :  { %v4671_v33 = vadd.f32 %v3162_v7, %v3154_v40 }
0x32ca   :  { %3884 = vtanh.f32 %v4671_v33 }
0x32d0   :  { %v3885_v8 = vpop.eup %3884 }
0x32d1   :  { %3167 = vrot.lane.b32.xlu1 %v3885_v8, %s3904_s29 }
0x3343   :  { %v3168_v18 = vpop.permute.xlu1 %3167 }
0x3344   :  { %v3170_v42 = vmul.f32 %v3168_v18, %v3151_v45 }
0x3346   :  { %v3179_v20 = vpack.c.bf16 %v3170_v42, %v3170_v42 }
0x3348   :  { %3181 = vrot.lane.b32.xlu2 %v3179_v20, %s3914_s10 }
0x33a2   :  { %v3182_v19 = vpop.permute.xlu2 %3181 }
0x33a3   :  { %3482 = vmatmul.msk.bf16.vlgmr.msrb.gmra.mxu2 %vm1822_vm1, %v3182_v19 }
0x3426   :  { %v3195_v30 = vpop.f32.mrf.mxu2 }
0x3427   :  { %v3199_v38 = vadd.f32 %v3195_v30, %v2842_v22 }
0x3429   :  { %3886 = vtanh.f32 %v3199_v38  ;;  %v3483_v24 = vmul.f32 -1.442695, %v3199_v38 }
0x342b   :  { %3888 = vpow2.f32 %v3483_v24 }
0x342e   :  { %v3197_v23 = vpop.f32.mrf.mxu2 }
0x342f   :  { %v3887_v60 = vpop.eup %3886 }
0x3430   :  { %3222 = vrot.lane.b32.xlu0 %v3887_v60, %s3904_s29 }
0x3431   :  { %v3889_v25 = vpop.eup %3888 }
0x3432   :  { %v3203_v26 = vadd.f32 1.0, %v3889_v25 }
0x3434   :  { %3890 = vrcp.f32 %v3203_v26  ;;  %v3215_v31 = vand.u32 2147483648, %v3203_v26  ;;  %vm3209_vm0 = vweird.f32 %v3203_v26  ;;  %v3213_v34 = vand.u32 2147483647, %v3203_v26 }
0x3436   :  { %v3216_v56 = vor.u32 1.1754944e-38, %v3215_v31  ;;  %vm3214_vm11 = vcmp.eq.f32.partialorder %v3213_v34, 8.507059e+37 }
0x3438   :  { %2909 = vrot.lane.b32.xlu0 %v4607_v49, %s3914_s10 }
0x343a   :  { %v3891_v59 = vpop.eup %3890 }
0x343b   :  { %v3205_v27 = vmul.f32 %v3891_v59, %v3203_v26  ;;  %vm3210_vm2 = vweird.f32 %v3891_v59 }
0x343c   :  { %vm3211_vm5 = vmor %vm3209_vm0, %vm3210_vm2 }
0x343d   :  { %v3206_v48 = vsub.f32 1.0, %v3205_v27 }
0x343f   :  { %v3207_v28 = vmul.f32 %v3891_v59, %v3206_v48 }
0x3440   :  { %3106 = vrot.lane.b32.xlu0 %v3104_v2, %s3914_s10  ;;  %v3263_v2 = vpack.c.bf16 %v3259_v52, %v3257_v10 }
0x3441   :  { %v3208_v29 = vadd.f32 %v3891_v59, %v3207_v28 }
0x3442   :  { %3309 = vmatpush.bf16.msrb.mxu1 %v3263_v2 }
0x3443   :  { %v3212_v0 = vsel %vm3211_vm5, %v3891_v59, %v3208_v29 }
0x3444   :  { %v3217_v39 = vsel %vm3214_vm11, %v3216_v56, %v3212_v0 }
0x3445   :  { %v3220_v1 = vmul.f32 %v3217_v39, %v4671_v33 }
0x34a2   :  { %v3223_v49 = vpop.permute.xlu0 %3222 }
0x34a3   :  { %v3225_v12 = vmul.f32 %v3223_v49, %v3217_v39 }
0x34a5   :  { %3227 = vrot.lane.b32.xlu1 %v3225_v12, %s3904_s29 }
0x34aa   :  { %v2910_v41 = vpop.permute.xlu0 %2909 }
0x34ab   :  { %2912 = vst.msk [vmem:[#allocation9] sm:$0xff] %vm1822_vm1, %v2910_v41 }
0x34ad   :  { %2974 = vrot.lane.b32.xlu1 %v4630_v37, %s3914_s10  ;;  %v3255_v37 = vld [vmem:[%s3371_s9 + $0x18] sm:$0xff] }
0x34ae   :  { %v3261_v57 = vpack.c.bf16 %v3255_v37, %v3253_v53 }
0x34b0   :  { %3310 = vmatpush.bf16.msrb.mxu1 %v3261_v57 }
0x34b2   :  { %v3107_v43 = vpop.permute.xlu0 %3106  ;;  %v3243_v3 = vld [vmem:[#allocation9] sm:$0xff] }
0x34b3   :  { %3110 = vst.msk [vmem:[#allocation9 + $0x18] sm:$0xff] %vm1822_vm1, %v3107_v43 }
0x34b5   :  { %3172 = vrot.lane.b32.xlu1 %v3170_v42, %s3914_s10 }
0x34ba   :  { %v3246_v55 = vld [vmem:[#allocation9 + $0x18] sm:$0xff] }
0x3517   :  { %v3228_v44 = vpop.permute.xlu1 %3227 }
0x3518   :  { %v3230_v58 = vadd.f32 %v3228_v44, %v3220_v1 }
0x351a   :  { %3892 = vtanh.f32 %v3230_v58 }
0x351f   :  { %v2975_v13 = vpop.permute.xlu1 %2974 }
0x3520   :  { %v3893_v32 = vpop.eup %3892  ;;  %2978 = vst.msk [vmem:[#allocation9 + $0x8] sm:$0xff] %vm1822_vm1, %v2975_v13 }
0x3521   :  { %3233 = vrot.lane.b32.xlu2 %v3893_v32, %s3904_s29 }
0x3527   :  { %v3173_v51 = vpop.permute.xlu1 %3172  ;;  %v3244_v15 = vld [vmem:[#allocation9 + $0x8] sm:$0xff] }
0x3528   :  { %3176 = vst.msk [vmem:[#allocation9 + $0x20] sm:$0xff] %vm1822_vm1, %v3173_v51  ;;  %v3249_v61 = vpack.c.bf16 %v3244_v15, %v3243_v3 }
0x3529   :  { %3040 = vrot.lane.b32.xlu2 %v4646_v9, %s3914_s10  ;;  %v3264_v9 = vld [vmem:[%s3372_s14] sm:$0x3] }
0x352a   :  { %3484 = vmatmul.msk.bf16.vlgmr.msra.gmra.mxu0 %vm1822_vm1, %v3249_v61  ;;  %3487 = vmatmul.msk.bf16.vlgmr.msrb.gmra.mxu1 %vm1822_vm1, %v3249_v61  ;;  %v3266_v36 = vperm.slane %v3264_v9, 0  ;;  %v3267_v11 = vperm.slane %v3264_v9, 1 }
0x352f   :  { %v3247_v20 = vld [vmem:[#allocation9 + $0x20] sm:$0xff] }
0x357b   :  { %v3234_v62 = vpop.permute.xlu2 %3233 }
0x357c   :  { %v3236_v4 = vmul.f32 %v3234_v62, %v3217_v39 }
0x357e   :  { %3238 = vrot.lane.b32.xlu2 %v3236_v4, %s3914_s10  ;;  %s4710_s10 = sld [smem:[%s4727_s0 + %s3904_s29]]  }
0x3583   :  { %v3041_v5 = vpop.permute.xlu2 %3040 }
0x3584   :  { %3044 = vst.msk [vmem:[#allocation9 + $0x10] sm:$0xff] %vm1822_vm1, %v3041_v5 }
0x358b   :  { %v3245_v6 = vld [vmem:[#allocation9 + $0x10] sm:$0xff] }
0x358c   :  { %v3250_v46 = vpack.c.bf16 %v3246_v55, %v3245_v6 }
0x358e   :  { %3485 = vmatmul.msk.bf16.gmra.mxu0 %vm1822_vm1, %v3250_v46  ;;  %3488 = vmatmul.msk.bf16.gmra.mxu1 %vm1822_vm1, %v3250_v46 }
0x35a7   :  { %v3288_v16 = vpop.f32.mrf.mxu0  ;;  %v3312_v45 = vpop.f32.mrf.mxu1 }
0x35a8   :  { %v3289_v63 = vadd.f32 %v3288_v16, %v3266_v36  ;;  %v3313_v40 = vadd.f32 %v3312_v45, %v3267_v11 }
0x35aa   :  { %3327 = vst [vmem:[%s4710_s10] sm:$0xff] %v3289_v63 }
0x35ab   :  { %3328 = vst [vmem:[%s4710_s10 + $0x8] sm:$0xff] %v3313_v40 }
0x35af   :  { %v3290_v7 = vpop.f32.mrf.mxu0  ;;  %v3314_v33 = vpop.f32.mrf.mxu1 }
0x35b0   :  { %v3291_v8 = vadd.f32 %v3290_v7, %v3266_v36  ;;  %v3315_v18 = vadd.f32 %v3314_v33, %v3267_v11 }
0x35b2   :  { %3329 = vst [vmem:[%s4710_s10 + $0x10] sm:$0xff] %v3291_v8 }
0x35b3   :  { %3330 = vst [vmem:[%s4710_s10 + $0x18] sm:$0xff] %v3315_v18 }
0x35d8   :  { %v3239_v42 = vpop.permute.xlu2 %3238 }
0x35d9   :  { %3242 = vst.msk [vmem:[#allocation9 + $0x28] sm:$0xff] %vm1822_vm1, %v3239_v42 }
0x35e0   :  { %v3248_v19 = vld [vmem:[#allocation9 + $0x28] sm:$0xff] }
0x35e1   :  { %v3251_v21 = vpack.c.bf16 %v3248_v19, %v3247_v20 }
0x35e3   :  { %3486 = vmatmul.msk.bf16.gmra.mxu0 %vm1822_vm1, %v3251_v21  ;;  %3489 = vmatmul.msk.bf16.gmra.mxu1 %vm1822_vm1, %v3251_v21 }
0x360b   :  { %v3293_v22 = vpop.f32.mrf.mxu0  ;;  %v3317_v30 = vpop.f32.mrf.mxu1 }
0x360c   :  { %v3294_v38 = vadd.f32 %v3293_v22, %v3266_v36  ;;  %v3318_v23 = vadd.f32 %v3317_v30, %v3267_v11 }
0x360e   :  { %3331 = vst [vmem:[%s4710_s10 + $0x20] sm:$0xff] %v3294_v38 }
0x360f   :  { %3332 = vst [vmem:[%s4710_s10 + $0x28] sm:$0xff] %v3318_v23 }
0x3613   :  { %v3295_v60 = vpop.f32.mrf.mxu0  ;;  %v3319_v24 = vpop.f32.mrf.mxu1 }
0x3614   :  { %v3296_v25 = vadd.f32 %v3295_v60, %v3266_v36  ;;  %v3320_v26 = vadd.f32 %v3319_v24, %v3267_v11 }
0x3616   :  { %3333 = vst [vmem:[%s4710_s10 + $0x30] sm:$0xff] %v3296_v25 }
0x3617   :  { %3334 = vst [vmem:[%s4710_s10 + $0x38] sm:$0xff] %v3320_v26 }
0x3660   :  { %v3298_v59 = vpop.f32.mrf.mxu0  ;;  %v3322_v27 = vpop.f32.mrf.mxu1 }
0x3661   :  { %v3299_v48 = vadd.f32 %v3298_v59, %v3266_v36  ;;  %v3323_v28 = vadd.f32 %v3322_v27, %v3267_v11 }
0x3663   :  { %3335 = vst [vmem:[%s4710_s10 + $0x40] sm:$0xff] %v3299_v48 }
0x3664   :  { %3336 = vst [vmem:[%s4710_s10 + $0x48] sm:$0xff] %v3323_v28 }
0x3668   :  { %v3300_v29 = vpop.f32.mrf.mxu0  ;;  %v3324_v31 = vpop.f32.mrf.mxu1 }
0x3669   :  { %v3301_v34 = vadd.f32 %v3300_v29, %v3266_v36  ;;  %v3325_v0 = vadd.f32 %v3324_v31, %v3267_v11 }
0x366b   :  { %3337 = vst [vmem:[%s4710_s10 + $0x50] sm:$0xff] %v3301_v34 }
0x366c   :  { %3338 = vst [vmem:[%s4710_s10 + $0x58] sm:$0xff] %v3325_v0 }

</bundles_post_ra>
